<compile_context>
chip_gen: v5e
topology: v5e:2x2
jax: 0.10.0
libtpu: 0.0.40
codegen_flags: <defaults>
</compile_context>

<pallas_src>
import jax
import jax.numpy as jnp
from jax.experimental import pallas as pl
from jax.experimental.pallas import tpu as pltpu

HIDDEN = 128            # fc1 width, matches nn.Linear(num_inputs, 128)
MAX_TM = 4096           # upper bound on the batch (lane) tile
MIN_TM = 512            # lower bound / rounding granularity of the batch tile
PALLAS_MIN_BATCH = 512  # below this, plain XLA fusion beats pallas dispatch


def _round_up(a, b):
    return ((a + b - 1) // b) * b


def _select_tm(batch):
    """Batch tile: ~B/2 rounded up to a multiple of 512, clamped to [512, 4096].

    Keeps nb = B_pad / tm >= 2 and usually even, so the ("parallel",) grid axis
    shards across both TensorCores on v7x; on v5e/v6e (1 TC) it simply gives
    big, DMA-efficient tiles.
    """
    half = _round_up(max(1, (batch + 1) // 2), MIN_TM)
    return max(MIN_TM, min(MAX_TM, half))


def _qnet_kernel(xT_ref, w1_ref, b1_ref, w2_ref, b2_ref, outT_ref):
    # Feature-major formulation: batch on the lane axis.
    xT = xT_ref[...]                      # [In, TM]  f32
    w1 = w1_ref[...]                      # [H,  In]  f32
    num_inputs = xT.shape[0]
    tm = xT.shape[1]

    # fc1 on the VPU: K = num_inputs is tiny (4), so a statically unrolled
    # outer-product accumulation avoids a near-empty MXU push.  All f32
    # (v5e-safe, and more accurate than a bf16 MXU pass).
    h = jnp.broadcast_to(b1_ref[...], (HIDDEN, tm))      # start from bias
    for k in range(num_inputs):                          # static unroll
        h = h + w1[:, k:k + 1] * xT[k:k + 1, :]
    h = jnp.maximum(h, 0.0)                              # ReLU in f32

    # fc2 on the MXU: qT[Out, TM] = W2[Out, H] @ hT[H, TM]
    # bf16 operands, f32 accumulation.
    q = jnp.dot(w2_ref[...], h.astype(w2_ref.dtype),
                preferred_element_type=jnp.float32)
    outT_ref[...] = (q + b2_ref[...]).astype(outT_ref.dtype)


def qnet_forward(x, w1, b1, w2, b2, *, feature_major_out=False):
    """QNet forward: q = relu(x @ W1^T + b1) @ W2^T + b2.

    x:  [B, num_inputs] f32
    w1: [HIDDEN, num_inputs]   (PyTorch nn.Linear layout [out, in])
    b1: [HIDDEN]
    w2: [num_outputs, HIDDEN]
    b2: [num_outputs]
    returns [B, num_outputs] f32 (or [num_outputs, B] if feature_major_out,
    which lets argmax / TD-target consumers skip the final transpose).
    """
    B, num_inputs = x.shape
    num_outputs = w2.shape[0]

    # Small-batch path (action selection / tiny replay batches): dispatch and
    # pad/transpose overhead dominate, so let XLA fuse the whole MLP.
    if B < PALLAS_MIN_BATCH:
        q = jnp.maximum(x @ w1.T + b1, 0.0) @ w2.T + b2
        return q.T if feature_major_out else q

    tm = _select_tm(B)
    B_pad = _round_up(B, tm)
    nb = B_pad // tm

    # Single pad of the transposed input; fc1 runs in f32 so x stays f32
    # (no bf16 cast in the wrapper).
    xT = jnp.pad(x.T, ((0, 0), (0, B_pad - B)))

    w1_f32 = w1.astype(jnp.float32)
    w2_bf = w2.astype(jnp.bfloat16)
    b1_2d = b1.reshape(HIDDEN, 1).astype(jnp.float32)
    b2_2d = b2.reshape(num_outputs, 1).astype(jnp.float32)

    cost = pl.CostEstimate(
        flops=2 * B_pad * (num_inputs * HIDDEN + HIDDEN * num_outputs),
        transcendentals=0,
        bytes_accessed=(num_inputs * B_pad * 4          # xT (f32 in)
                        + num_outputs * B_pad * 4       # qT (f32 out)
                        + HIDDEN * num_inputs * 4       # w1 (f32)
                        + HIDDEN * 4                    # b1
                        + num_outputs * HIDDEN * 2      # w2 (bf16)
                        + num_outputs * 4),             # b2
    )

    qT = pl.pallas_call(
        _qnet_kernel,
        out_shape=jax.ShapeDtypeStruct((num_outputs, B_pad), jnp.float32),
        grid_spec=pltpu.PrefetchScalarGridSpec(
            num_scalar_prefetch=0,
            grid=(nb,),
            in_specs=[
                # streamed per-tile activations (batch on lanes)
                pl.BlockSpec((num_inputs, tm), lambda i: (0, i)),
                # weights / biases: constant block index -> VMEM-resident
                pl.BlockSpec((HIDDEN, num_inputs), lambda i: (0, 0)),
                pl.BlockSpec((HIDDEN, 1), lambda i: (0, 0)),
                pl.BlockSpec((num_outputs, HIDDEN), lambda i: (0, 0)),
                pl.BlockSpec((num_outputs, 1), lambda i: (0, 0)),
            ],
            out_specs=pl.BlockSpec((num_outputs, tm), lambda i: (0, i)),
        ),
        compiler_params=pltpu.CompilerParams(
            dimension_semantics=("parallel",)),          # dual-TC split on v7x
        cost_estimate=cost,
    )(xT, w1_f32, b1_2d, w2_bf, b2_2d)

    if feature_major_out:
        return qT[:, :B]
    return qT[:, :B].T


def init_qnet_params(key, num_inputs, num_outputs):
    """Xavier-uniform weights (as in the PyTorch __init__), default
    nn.Linear-style uniform biases.  Weights in PyTorch [out, in] layout —
    used directly by the transposed (feature-major) kernel."""
    k1, k2, k3, k4 = jax.random.split(key, 4)

    def xavier(k, fan_out, fan_in):
        limit = jnp.sqrt(6.0 / (fan_in + fan_out))
        return jax.random.uniform(k, (fan_out, fan_in), jnp.float32, -limit, limit)

    def bias(k, fan_in, size):
        bound = 1.0 / jnp.sqrt(fan_in)
        return jax.random.uniform(k, (size,), jnp.float32, -bound, bound)

    w1 = xavier(k1, HIDDEN, num_inputs)
    b1 = bias(k2, num_inputs, HIDDEN)
    w2 = xavier(k3, num_outputs, HIDDEN)
    b2 = bias(k4, HIDDEN, num_outputs)
    return w1, b1, w2, b2


def qnet_reference_f32(x, w1, b1, w2, b2):
    h = jnp.maximum(x @ w1.T + b1, 0.0)
    return h @ w2.T + b2


def qnet_reference_mixed(x, w1, b1, w2, b2):
    # Same numeric recipe as the kernel: f32 fc1 (+bias+ReLU), bf16-operand /
    # f32-accumulate fc2.
    h = jnp.maximum(x @ w1.T + b1, 0.0)
    q = jnp.dot(h.astype(jnp.bfloat16), w2.T.astype(jnp.bfloat16),
                preferred_element_type=jnp.float32) + b2
    return q


if __name__ == "__main__":
    # Rotary inverted pendulum: small state vector, discrete actions.
    num_inputs, num_outputs = 4, 2

    key = jax.random.PRNGKey(0)
    kx, kp, ks = jax.random.split(key, 3)
    w1, b1, w2, b2 = init_qnet_params(kp, num_inputs, num_outputs)

    # Replay-buffer-sized batch: exercises the Pallas path, the padding logic
    # (B=1200 -> tm=1024, B_pad=2048) and a 2-step "parallel" grid (dual-TC on
    # v7x, plain sequential grid on v5e/v6e).
    B = 1200
    x = jax.random.normal(kx, (B, num_inputs), jnp.float32)

    q = qnet_forward(x, w1, b1, w2, b2)
    q = jax.block_until_ready(q)
    assert q.shape == (B, num_outputs)

    # Tight check vs a reference using the same f32-fc1 / bf16-fc2 recipe.
    q_ref_mixed = qnet_reference_mixed(x, w1, b1, w2, b2)
    assert jnp.allclose(q, q_ref_mixed, atol=2e-3, rtol=2e-3), \
        float(jnp.max(jnp.abs(q - q_ref_mixed)))

    # Loose check vs the full-f32 reference (only bf16 quantization of h, W2).
    q_ref_f32 = qnet_reference_f32(x, w1, b1, w2, b2)
    assert jnp.allclose(q, q_ref_f32, atol=2e-2, rtol=2e-2), \
        float(jnp.max(jnp.abs(q - q_ref_f32)))

    # Feature-major output path (skips the final transpose for argmax users).
    qT = jax.block_until_ready(
        qnet_forward(x, w1, b1, w2, b2, feature_major_out=True))
    assert qT.shape == (num_outputs, B)
    assert jnp.allclose(qT.T, q, atol=0, rtol=0)

    # Small-batch (action-selection) path: XLA fallback, exact vs f32 ref.
    xs = jax.random.normal(ks, (8, num_inputs), jnp.float32)
    qs = jax.block_until_ready(qnet_forward(xs, w1, b1, w2, b2))
    assert qs.shape == (8, num_outputs)
    assert jnp.allclose(qs, qnet_reference_f32(xs, w1, b1, w2, b2),
                        atol=1e-5, rtol=1e-5)

    print("KERNEL_OK")
</pallas_src>

<mosaic_0001>
module attributes {stable_mosaic.version = 11 : i64} {
  func.func @_qnet_kernel(%arg0: i32, %arg1: memref<4x1024xf32, #tpu.memory_space<vmem>>, %arg2: memref<128x4xf32, #tpu.memory_space<vmem>>, %arg3: memref<128x1xf32, #tpu.memory_space<vmem>>, %arg4: memref<2x128xbf16, #tpu.memory_space<vmem>>, %arg5: memref<2x1xf32, #tpu.memory_space<vmem>>, %arg6: memref<2x1024xf32, #tpu.memory_space<vmem>>) attributes {dimension_semantics = [#tpu.dimension_semantics<parallel>], iteration_bounds = array<i64: 2>, scalar_prefetch = 0 : i64, scratch_operands = 0 : i64, tpu.core_type = #tpu.core_type<tc>, window_params = [{transform_indices = @transform_0, window_bounds = array<i64: 4, 1024>}, {pipeline_mode = #tpu.pipeline_mode<synchronous>, transform_indices = @transform_1, window_bounds = array<i64: 128, 4>}, {pipeline_mode = #tpu.pipeline_mode<synchronous>, transform_indices = @transform_2, window_bounds = array<i64: 128, 1>}, {pipeline_mode = #tpu.pipeline_mode<synchronous>, transform_indices = @transform_3, window_bounds = array<i64: 2, 128>}, {pipeline_mode = #tpu.pipeline_mode<synchronous>, transform_indices = @transform_4, window_bounds = array<i64: 2, 1>}, {transform_indices = @transform_5, window_bounds = array<i64: 2, 1024>}]} {
    %c0 = arith.constant 0 : index
    %c0_0 = arith.constant 0 : index
    %0 = vector.load %arg1[%c0, %c0_0] : memref<4x1024xf32, #tpu.memory_space<vmem>>, vector<4x1024xf32>
    %c0_1 = arith.constant 0 : index
    %c0_2 = arith.constant 0 : index
    %1 = vector.load %arg2[%c0_1, %c0_2] : memref<128x4xf32, #tpu.memory_space<vmem>>, vector<128x4xf32>
    %c0_3 = arith.constant 0 : index
    %c0_4 = arith.constant 0 : index
    %2 = vector.load %arg3[%c0_3, %c0_4] : memref<128x1xf32, #tpu.memory_space<vmem>>, vector<128x1xf32>
    %3 = vector.shape_cast %2 : vector<128x1xf32> to vector<128x1xf32>
    %4 = vector.broadcast %3 : vector<128x1xf32> to vector<128x1024xf32>
    %5 = vector.extract_strided_slice %1 {offsets = [0, 0], sizes = [128, 1], strides = [1, 1]} : vector<128x4xf32> to vector<128x1xf32>
    %6 = vector.extract_strided_slice %0 {offsets = [0, 0], sizes = [1, 1024], strides = [1, 1]} : vector<4x1024xf32> to vector<1x1024xf32>
    %7 = vector.broadcast %5 : vector<128x1xf32> to vector<128x1024xf32>
    %8 = vector.broadcast %6 : vector<1x1024xf32> to vector<128x1024xf32>
    %9 = arith.mulf %7, %8 : vector<128x1024xf32>
    %10 = arith.addf %4, %9 : vector<128x1024xf32>
    %11 = vector.extract_strided_slice %1 {offsets = [0, 1], sizes = [128, 1], strides = [1, 1]} : vector<128x4xf32> to vector<128x1xf32>
    %12 = vector.extract_strided_slice %0 {offsets = [1, 0], sizes = [1, 1024], strides = [1, 1]} : vector<4x1024xf32> to vector<1x1024xf32>
    %13 = vector.broadcast %11 : vector<128x1xf32> to vector<128x1024xf32>
    %14 = vector.broadcast %12 : vector<1x1024xf32> to vector<128x1024xf32>
    %15 = arith.mulf %13, %14 : vector<128x1024xf32>
    %16 = arith.addf %10, %15 : vector<128x1024xf32>
    %17 = vector.extract_strided_slice %1 {offsets = [0, 2], sizes = [128, 1], strides = [1, 1]} : vector<128x4xf32> to vector<128x1xf32>
    %18 = vector.extract_strided_slice %0 {offsets = [2, 0], sizes = [1, 1024], strides = [1, 1]} : vector<4x1024xf32> to vector<1x1024xf32>
    %19 = vector.broadcast %17 : vector<128x1xf32> to vector<128x1024xf32>
    %20 = vector.broadcast %18 : vector<1x1024xf32> to vector<128x1024xf32>
    %21 = arith.mulf %19, %20 : vector<128x1024xf32>
    %22 = arith.addf %16, %21 : vector<128x1024xf32>
    %23 = vector.extract_strided_slice %1 {offsets = [0, 3], sizes = [128, 1], strides = [1, 1]} : vector<128x4xf32> to vector<128x1xf32>
    %24 = vector.extract_strided_slice %0 {offsets = [3, 0], sizes = [1, 1024], strides = [1, 1]} : vector<4x1024xf32> to vector<1x1024xf32>
    %25 = vector.broadcast %23 : vector<128x1xf32> to vector<128x1024xf32>
    %26 = vector.broadcast %24 : vector<1x1024xf32> to vector<128x1024xf32>
    %27 = arith.mulf %25, %26 : vector<128x1024xf32>
    %28 = arith.addf %22, %27 : vector<128x1024xf32>
    %cst = arith.constant 0.000000e+00 : f32
    %29 = vector.broadcast %cst : f32 to vector<128x1024xf32>
    %30 = arith.maximumf %28, %29 : vector<128x1024xf32>
    %c0_5 = arith.constant 0 : index
    %c0_6 = arith.constant 0 : index
    %31 = vector.load %arg4[%c0_5, %c0_6] : memref<2x128xbf16, #tpu.memory_space<vmem>>, vector<2x128xbf16>
    %32 = arith.truncf %30 : vector<128x1024xf32> to vector<128x1024xbf16>
    %cst_7 = arith.constant dense<0.000000e+00> : vector<2x1024xf32>
    %33 = tpu.matmul %31, %32, %cst_7 {dimension_numbers = #tpu.dot_dimension_numbers<[1], [0], [0], [1], [0, 0, 1, 1], [], []>} : vector<2x128xbf16>, vector<128x1024xbf16>, vector<2x1024xf32> -> vector<2x1024xf32>
    %c0_8 = arith.constant 0 : index
    %c0_9 = arith.constant 0 : index
    %34 = vector.load %arg5[%c0_8, %c0_9] : memref<2x1xf32, #tpu.memory_space<vmem>>, vector<2x1xf32>
    %35 = vector.broadcast %34 : vector<2x1xf32> to vector<2x1024xf32>
    %36 = arith.addf %33, %35 : vector<2x1024xf32>
    %c0_10 = arith.constant 0 : index
    %c0_11 = arith.constant 0 : index
    %37 = vector.load %arg6[%c0_10, %c0_11] : memref<2x1024xf32, #tpu.memory_space<vmem>>, vector<2x1024xf32>
    tpu.vector_store %arg6[%c0_10, %c0_11], %36 {strides = array<i32>} : memref<2x1024xf32, #tpu.memory_space<vmem>>, vector<2x1024xf32>,
    return
  }
  func.func @transform_0(%arg0: i32) -> (i32, i32) {
    %c0_i32 = arith.constant 0 : i32
    %c0_i32_0 = arith.constant 0 : i32
    return %c0_i32, %arg0 : i32, i32
  }
  func.func @transform_1(%arg0: i32) -> (i32, i32) {
    %c0_i32 = arith.constant 0 : i32
    %c0_i32_0 = arith.constant 0 : i32
    %c0_i32_1 = arith.constant 0 : i32
    return %c0_i32, %c0_i32_0 : i32, i32
  }
  func.func @transform_2(%arg0: i32) -> (i32, i32) {
    %c0_i32 = arith.constant 0 : i32
    %c0_i32_0 = arith.constant 0 : i32
    %c0_i32_1 = arith.constant 0 : i32
    return %c0_i32, %c0_i32_0 : i32, i32
  }
  func.func @transform_3(%arg0: i32) -> (i32, i32) {
    %c0_i32 = arith.constant 0 : i32
    %c0_i32_0 = arith.constant 0 : i32
    %c0_i32_1 = arith.constant 0 : i32
    return %c0_i32, %c0_i32_0 : i32, i32
  }
  func.func @transform_4(%arg0: i32) -> (i32, i32) {
    %c0_i32 = arith.constant 0 : i32
    %c0_i32_0 = arith.constant 0 : i32
    %c0_i32_1 = arith.constant 0 : i32
    return %c0_i32, %c0_i32_0 : i32, i32
  }
  func.func @transform_5(%arg0: i32) -> (i32, i32) {
    %c0_i32 = arith.constant 0 : i32
    %c0_i32_0 = arith.constant 0 : i32
    return %c0_i32, %arg0 : i32, i32
  }
}

</mosaic_0001>

<bundles_post_ra>
// kernel: tpu_custom_call.1
= control target key start
LH: loop header
LB: loop body
LE: loop exit
PB: predicated region body
PF: predicated region fallthrough
CT: control target
= control target key end

     0   :  { %10 = vsyncpa [#allocation3], 0  ;;  %s4746_s0 = inlined_call_operand.vmem [shape: f32[4,2048], index: 0, kind: input, shape index: {}]   ;;  %s4747_s1 = inlined_call_operand.vmem [shape: f32[128,4], index: 1, kind: input, shape index: {}]   ;;  %s4748_s2 = inlined_call_operand.vmem [shape: f32[128,1], index: 2, kind: input, shape index: {}]   ;;  %s4749_s3 = inlined_call_operand.vmem [shape: bf16[2,128], index: 3, kind: input, shape index: {}]   ;;  %s4750_s4 = inlined_call_operand.vmem [shape: f32[2,1], index: 4, kind: input, shape index: {}]   ;;  %s4751_s5 = inlined_call_operand.hbm [shape: f32[2,2048], index: 5, kind: output, shape index: {}]  }
   0x1   :  { %12 = vsyncpa [#allocation3 + $0x1], 0  ;;  %s2330_s18 = smov 0   ;;  %s2332_s19 = smov 0  }
   0x2   :  { %s2334_s20 = smov 0   ;;  %s2336_s21 = smov 0  }
   0x3 LB: > { %s2351_s22 = sadd.s32 4294967295, %s2294_s21   ;;  %s2144_s23 = sadd.s32 4294967294, %s2294_s21   ;;  %s2294_s21 = sphi %s2336_s21, %s5340_s21   ;;  %s2290_s20 = sphi %s2334_s20, %s5339_s20   ;;  %s2286_s19 = sphi %s2332_s19, %s5338_s19   ;;  %s2282_s18 = sphi %s2330_s18, %s5337_s18  }
   0x4   : > { %s2355_s24 = sadd.s32 1, %s2294_s21   ;;  %s135_s25 = sadd.s32 1, %s2290_s20 }
   0x5   : > { %s132_s26 = ssub.s32 %s2294_s21, %s2355_s24  ;;  %p145_p0 = scmp.ne.s32.totalorder %s2290_s20, %s2286_s19 }
   0x6   : > { %p133_p1 = scmp.eq.s32.totalorder %s132_s26, 0  ;;  %p146_p2 = scmp.eq.s32.totalorder %s2351_s22, 1 }
   0x7   : > { %p151_p3 = scmp.ne.s32.totalorder %s2286_s19, %s2282_s18  ;;  %p152_p4 = scmp.eq.s32.totalorder %s2144_s23, 1 }
   0x8   : > { %s2366_s27 = scalar_select %p133_p1, %s2290_s20, %s135_s25  }
   0x9   : > { %p2368_p5 = por %p146_p2, %p145_p0  ;;  %p2372_p6 = por %p152_p4, %p151_p3 }
   0xa   : > { %p2147_p7 = scmp.ge.s32.totalorder %s2294_s21, 1  ;;  %p191_p8 = scmp.lt.s32.totalorder %s2294_s21, 3 }
   0xc   : > { %p192_p9 = pnand %p2147_p7, %p191_p8 }
   0xe   : > { %195 = sbr.rel (%p192_p9) target bundleno = 680 (0x2a8), region = 40 }
  0x13   : > { %v250_v0 = vld [vmem:[%s4748_s2 + $0x20] sm:$0xff]  ;;  %v248_v1 = vld [vmem:[%s4748_s2 + $0x10] sm:$0xff]  ;;  %v4752_v3 = vmov 0   ;;  %v251_v4 = vld [vmem:[%s4748_s2 + $0x28] sm:$0xff]  ;;  %v2297_v33 = vmov 1   ;;  %v4754_v37 = vmov 2  }
  0x14   : > { %v246_v2 = vld [vmem:[%s4748_s2] sm:$0xff]  ;;  %2202 = vset.pattern.permute.xlu2 %v4752_v3  ;;  %2201 = vset.pattern.permute.xlu1 %v4752_v3  ;;  %v249_v5 = vld [vmem:[%s4748_s2 + $0x18] sm:$0xff]  ;;  %v247_v6 = vld [vmem:[%s4748_s2 + $0x8] sm:$0xff]  ;;  %v4756_v44 = vmov 3   ;;  %s2149_s30 = sshll.u32 %s2351_s22, 3  ;;  %s216_s14 = sand.u32 1, %s2286_s19  }
  0x15   : > { %2200 = vset.pattern.permute.xlu0 %v4752_v3  ;;  %284 = vperm.xlu2 %2202, %v250_v0   ;;  %v254_v7 = vld [vmem:[%s4748_s2 + $0x40] sm:$0xff]  ;;  %v253_v8 = vld [vmem:[%s4748_s2 + $0x38] sm:$0xff]  ;;  %v252_v9 = vld [vmem:[%s4748_s2 + $0x30] sm:$0xff]  ;;  %p220_p10 = scmp.lt.s32.totalorder %s2149_s30, 15  ;;  %s2148_s15 = sshll.u32 %s216_s14, 4  ;;  %vm2055_vm0 = vcmask 1041408  }
  0x16   : > { %274 = vperm.xlu1 %2201, %v248_v1   ;;  %264 = vperm.xlu0 %2200, %v246_v2   ;;  %v257_v10 = vld [vmem:[%s4748_s2 + $0x58] sm:$0xff]  ;;  %v256_v11 = vld [vmem:[%s4748_s2 + $0x50] sm:$0xff]  ;;  %v255_v12 = vld [vmem:[%s4748_s2 + $0x48] sm:$0xff]  ;;  %vm2057_vm1 = vcmask 1045508   ;;  %vm2059_vm2 = vcmask 1043456   ;;  %s218_s16 = scalar_lea.vmem [#allocation2], %s2148_s15 }
  0x17   : > { %v260_v13 = vld [vmem:[%s4748_s2 + $0x70] sm:$0xff]  ;;  %v259_v14 = vld [vmem:[%s4748_s2 + $0x68] sm:$0xff]  ;;  %v258_v15 = vld [vmem:[%s4748_s2 + $0x60] sm:$0xff]  ;;  %s5342_s30 = smov (!%p220_p10, %s2149_s30), 15  ;;  %s2156_s17 = sshll.u32 %s2351_s22, 4 }
  0x18   : > { %v2429_v16 = vld [vmem:[%s4747_s1 + $0x8] sm:$0xff]  ;;  %v261_v17 = vld [vmem:[%s4748_s2 + $0x78] sm:$0xff]  ;;  %v2437_v18 = vld [vmem:[%s4747_s1] sm:$0xff]  ;;  %s2150_s6 = sshll.u32 %s5342_s30, 2  ;;  %s2080_s26 = scalar_lea.hbm %s4751_s5, %s2156_s17 }
  0x19   : > { %4943 = vst [vmem:[#allocation5_spill] sm:$0xff] %v2429_v16  ;;  %v2444_v19 = vld [vmem:[%s4747_s1 + $0x20] sm:$0xff]  ;;  %v2449_v20 = vld [vmem:[%s4747_s1 + $0x10] sm:$0xff]  ;;  %v2454_v21 = vld [vmem:[%s4747_s1 + $0x18] sm:$0xff]  ;;  %s2579_s9 = scalar_lea.vmem %s4746_s0, %s2150_s6  ;;  %s2082_s30 = sshll.u32 %s218_s16, 4  ;;  %s2083_s30 = int_to_ptr.vmem [resolvable:$true] %s2082_s30 }
  0x1a   : > { %4944 = vst [vmem:[#allocation6_spill] sm:$0xff] %v2437_v18  ;;  %v2462_v22 = vld [vmem:[%s4747_s1 + $0x38] sm:$0xff]  ;;  %v2467_v23 = vld [vmem:[%s4747_s1 + $0x28] sm:$0xff]  ;;  %v2472_v24 = vld [vmem:[%s4747_s1 + $0x30] sm:$0xff]  ;;  %s2084_s6 = sshll.u32 %s2080_s26, 4  ;;  %s2069_s22 = scalar_lea.sflag [#allocation3], %s216_s14  ;;  %s2085_s6 = int_to_ptr.hbm [resolvable:$true] %s2084_s6 }
  0x1b   : > { %4945 = vst [vmem:[#allocation7_spill] sm:$0xff] %v2454_v21  ;;  %v2480_v25 = vld [vmem:[%s4747_s1 + $0x50] sm:$0xff]  ;;  %v2485_v26 = vld [vmem:[%s4747_s1 + $0x40] sm:$0xff]  ;;  %v2490_v27 = vld [vmem:[%s4747_s1 + $0x48] sm:$0xff]  ;;  %s2246_s7 = sshra.s32 %s2085_s6, 4  ;;  %s2252_s11 = scalar_lea.hbm %s4751_s5, 32  ;;  %s2247_s7 = int_to_ptr.hbm [resolvable:$true] %s2246_s7 }
  0x1c   : > { %v2498_v28 = vld [vmem:[%s4747_s1 + $0x68] sm:$0xff]  ;;  %v2503_v29 = vld [vmem:[%s4747_s1 + $0x58] sm:$0xff]  ;;  %v2508_v30 = vld [vmem:[%s4747_s1 + $0x60] sm:$0xff]  ;;  %s2248_s8 = scalar_lea.hbm %s2247_s7, 16  ;;  %p2253_p0 = scmp.lt.s32.totalorder %s2247_s7, %s4751_s5 }
  0x1d   : > { %289 = vperm.xlu2 %2202, %v251_v4   ;;  %v244_v31 = vld [vmem:[%s4747_s1 + $0x70] sm:$0xff]  ;;  %v245_v32 = vld [vmem:[%s4747_s1 + $0x78] sm:$0xff]  ;;  %v2588_v54 = vld [vmem:[%s2579_s9] sm:$0xff]  ;;  %p2249_p11 = scmp.ne.s32.totalorder %s2247_s7, %s2248_s8  ;;  %p2254_p1 = scmp.lt.s32.totalorder %s2252_s11, %s2248_s8 }
  0x1e   : > { %279 = vperm.xlu1 %2201, %v249_v5   ;;  %269 = vperm.xlu0 %2200, %v247_v6   ;;  %v2593_v55 = vld [vmem:[%s2579_s9 + $0x8] sm:$0xff]  ;;  %v426_v56 = vperm.slane %v2588_v54, 0  ;;  %v427_v57 = vperm.slane %v2588_v54, 4  ;;  %v2607_v62 = vld [vmem:[%s2579_s9 + $0x10] sm:$0xff]  ;;  %v2618_v4 = vld [vmem:[%s2579_s9 + $0x18] sm:$0xff] }
  0x1f   : > { %v428_v58 = vperm.slane %v2593_v55, 0  ;;  %v429_v59 = vperm.slane %v2593_v55, 4  ;;  %4965 = vst [vmem:[#allocation27_spill] sm:$0xff] %v2607_v62  ;;  %v430_v6 = vperm.slane %v2607_v62, 0  ;;  %p2250_p12 = pnand %p2249_p11, %p2368_p5  ;;  %p2255_p2 = por %p2254_p1, %p2253_p0 }
  0x20   : > { %v2604_v61 = vperm.slane %v426_v56, 0  ;;  %v2613_v1 = vperm.slane %v427_v57, 0  ;;  %4968 = vst [vmem:[#allocation30_spill] sm:$0xff] %v2618_v4 }
  0x21   : > { %v2615_v2 = vperm.slane %v428_v58, 0  ;;  %v2621_v5 = vperm.slane %v429_v59, 0  ;;  %p2251_p13 = pneg %p2250_p12 }
  0x23   : > { %p2256_p3 = pnand %p2255_p2, %p2251_p13 }
  0x25   : > { %304 = vperm.xlu2 %2202, %v254_v7   ;;  %v431_v7 = vperm.slane %v2607_v62, 4 }
  0x26   : > { %299 = vperm.xlu1 %2201, %v253_v8   ;;  %294 = vperm.xlu0 %2200, %v252_v9   ;;  %v432_v9 = vperm.slane %v2618_v4, 0 }
  0x28   : > { %v2656_v57 = vperm.slane %v432_v9, 0 }
  0x2a   : > { %4972 = vst [vmem:[#allocation34_spill] sm:$0xff] %v2656_v57 }
  0x2d   : > { %319 = vperm.xlu2 %2202, %v257_v10  }
  0x2e   : > { %314 = vperm.xlu1 %2201, %v256_v11   ;;  %309 = vperm.xlu0 %2200, %v255_v12   ;;  %v770_v12 = vperm.slane %v2588_v54, 1 }
  0x35   : > { %334 = vperm.xlu2 %2202, %v260_v13   ;;  %v771_v13 = vperm.slane %v2588_v54, 5 }
  0x36   : > { %329 = vperm.xlu1 %2201, %v259_v14   ;;  %324 = vperm.xlu0 %2200, %v258_v15   ;;  %v772_v15 = vperm.slane %v2593_v55, 1 }
  0x37   : > { %v2674_v9 = vperm.slane %v771_v13, 1 }
  0x38   : > { %v2681_v57 = vperm.slane %v772_v15, 1 }
  0x3d   : > { %349 = vperm.xlu2 %2202, %v2429_v16  }
  0x3e   : > { %339 = vperm.xlu0 %2200, %v261_v17   ;;  %344 = vperm.xlu1 %2201, %v2437_v18  }
  0x45   : > { %364 = vperm.xlu2 %2202, %v2444_v19  }
  0x46   : > { %354 = vperm.xlu0 %2200, %v2449_v20   ;;  %359 = vperm.xlu1 %2201, %v2454_v21  }
  0x4d   : > { %379 = vperm.xlu2 %2202, %v2462_v22  }
  0x4e   : > { %369 = vperm.xlu0 %2200, %v2467_v23   ;;  %374 = vperm.xlu1 %2201, %v2472_v24  }
  0x55   : > { %394 = vperm.xlu2 %2202, %v2480_v25  }
  0x56   : > { %384 = vperm.xlu0 %2200, %v2485_v26   ;;  %389 = vperm.xlu1 %2201, %v2490_v27  }
  0x5d   : > { %409 = vperm.xlu2 %2202, %v2498_v28  }
  0x5e   : > { %399 = vperm.xlu0 %2200, %v2503_v29   ;;  %404 = vperm.xlu1 %2201, %v2508_v30  }
  0x65   : > { %2203 = vset.pattern.permute.xlu2 %v2297_v33 }
  0x66   : > { %414 = vperm.xlu0 %2200, %v244_v31   ;;  %419 = vperm.xlu1 %2201, %v245_v32  }
  0x67   : > { %707 = vperm.xlu2 %2203, %v2437_v18  }
  0x6e   : > { %2204 = vset.pattern.permute.xlu0 %v2297_v33  ;;  %2205 = vset.pattern.permute.xlu1 %v2297_v33 }
  0x6f   : > { %711 = vperm.xlu0 %2204, %v2429_v16   ;;  %719 = vperm.xlu2 %2203, %v2454_v21   ;;  %v2525_v34 = vpop.permute.xlu2 %284 }
  0x70   : > { %4946 = vst [vmem:[#allocation8_spill] sm:$0xff] %v2525_v34  ;;  %715 = vperm.xlu1 %2205, %v2449_v20  }
  0x77   : > { %731 = vperm.xlu0 %2204, %v2472_v24   ;;  %727 = vperm.xlu2 %2203, %v2467_v23   ;;  %v2530_v35 = vpop.permute.xlu2 %289 }
  0x78   : > { %4947 = vst [vmem:[#allocation9_spill] sm:$0xff] %v2530_v35  ;;  %723 = vperm.xlu1 %2205, %v2444_v19  }
  0x7f   : > { %743 = vperm.xlu0 %2204, %v2490_v27   ;;  %739 = vperm.xlu2 %2203, %v2485_v26   ;;  %v2535_v36 = vpop.permute.xlu2 %304 }
  0x80   : > { %4948 = vst [vmem:[#allocation10_spill] sm:$0xff] %v2535_v36  ;;  %735 = vperm.xlu1 %2205, %v2462_v22  }
  0x87   : > { %2206 = vset.pattern.permute.xlu0 %v4754_v37  ;;  %767 = vperm.xlu2 %2203, %v245_v32   ;;  %v2539_v38 = vpop.permute.xlu2 %319 }
  0x88   : > { %4949 = vst [vmem:[#allocation11_spill] sm:$0xff] %v2539_v38  ;;  %763 = vperm.xlu1 %2205, %v244_v31   ;;  %v2541_v39 = vpop.permute.xlu1 %274  ;;  %v2543_v40 = vpop.permute.xlu0 %264  ;;  %1107 = vperm.xlu0 %2206, %v244_v31  }
  0x89   : > { %4950 = vst [vmem:[#allocation12_spill] sm:$0xff] %v2541_v39 }
  0x8a   : > { %4951 = vst [vmem:[#allocation13_spill] sm:$0xff] %v2543_v40 }
  0x8f   : > { %755 = vperm.xlu2 %2203, %v2508_v30   ;;  %v2546_v41 = vpop.permute.xlu2 %334 }
  0x90   : > { %4952 = vst [vmem:[#allocation14_spill] sm:$0xff] %v2546_v41  ;;  %2207 = vset.pattern.permute.xlu1 %v4754_v37  ;;  %v2549_v42 = vpop.permute.xlu1 %279  ;;  %v2551_v43 = vpop.permute.xlu0 %269  ;;  %1095 = vperm.xlu0 %2206, %v2503_v29  }
  0x91   : > { %4953 = vst [vmem:[#allocation15_spill] sm:$0xff] %v2549_v42  ;;  %1111 = vperm.xlu1 %2207, %v245_v32  }
  0x92   : > { %4954 = vst [vmem:[#allocation16_spill] sm:$0xff] %v2551_v43 }
  0x97   : > { %2209 = vset.pattern.permute.xlu2 %v4756_v44  ;;  %v2555_v45 = vpop.permute.xlu2 %349 }
  0x98   : > { %4955 = vst [vmem:[#allocation17_spill] sm:$0xff] %v2555_v45  ;;  %v2558_v46 = vpop.permute.xlu1 %299  ;;  %v2560_v47 = vpop.permute.xlu0 %294  ;;  %1063 = vperm.xlu0 %2206, %v2454_v21   ;;  %1451 = vperm.xlu2 %2209, %v244_v31   ;;  %v458_v8 = vmul.f32 %v2604_v61, %v2555_v45  ;;  %v459_v10 = vmul.f32 %v2613_v1, %v2555_v45  ;;  %v2645_v31 = vperm.slane %v431_v7, 0 }
  0x99   : > { %4956 = vst [vmem:[#allocation18_spill] sm:$0xff] %v2558_v46  ;;  %2208 = vset.pattern.permute.xlu1 %v2297_v33  ;;  %v460_v11 = vmul.f32 %v2615_v2, %v2555_v45  ;;  %v461_v14 = vmul.f32 %v2621_v5, %v2555_v45 }
  0x9a   : > { %4957 = vst [vmem:[#allocation19_spill] sm:$0xff] %v2560_v47  ;;  %759 = vperm.xlu1 %2208, %v2498_v28   ;;  %v2654_v56 = vadd.f32 %v458_v8, %v2551_v43  ;;  %v2666_v3 = vadd.f32 %v459_v10, %v2551_v43  ;;  %v2672_v8 = vperm.slane %v770_v12, 1  ;;  %v4979_v12 = vmov 3  }
  0x9b   : > { %4970 = vst [vmem:[#allocation32_spill] sm:$0xff] %v2645_v31  ;;  %v2679_v45 = vadd.f32 %v461_v14, %v2551_v43 }
  0x9c   : > { %4975 = vst [vmem:[#allocation37_spill] sm:$0xff] %v2666_v3 }
  0x9d   : > { %4977 = vst [vmem:[#allocation39_spill] sm:$0xff] %v2679_v45 }
  0x9f   : > { %v2565_v48 = vpop.permute.xlu2 %364 }
  0xa0   : > { %4958 = vst [vmem:[#allocation20_spill] sm:$0xff] %v2565_v48  ;;  %v2567_v49 = vpop.permute.xlu1 %314  ;;  %v2569_v50 = vpop.permute.xlu0 %309  ;;  %2224 = vset.pattern.permute.xlu0 %v4756_v44  ;;  %2211 = vset.pattern.permute.xlu2 %v4754_v37  ;;  %v482_v17 = vmul.f32 %v2604_v61, %v2565_v48  ;;  %v485_v7 = vmul.f32 %v2621_v5, %v2565_v48 }
  0xa1   : > { %4959 = vst [vmem:[#allocation21_spill] sm:$0xff] %v2567_v49  ;;  %1455 = vperm.xlu0 %2224, %v245_v32   ;;  %1103 = vperm.xlu2 %2211, %v2498_v28  }
  0xa2   : > { %4960 = vst [vmem:[#allocation22_spill] sm:$0xff] %v2569_v50  ;;  %2210 = vset.pattern.permute.xlu1 %v4754_v37 }
  0xa3   : > { %1099 = vperm.xlu1 %2210, %v2508_v30  }
  0xa7   : > { %v2581_v51 = vpop.permute.xlu2 %379 }
  0xa8   : > { %4961 = vst [vmem:[#allocation23_spill] sm:$0xff] %v2581_v51  ;;  %v2583_v52 = vpop.permute.xlu1 %329  ;;  %v2585_v53 = vpop.permute.xlu0 %324  ;;  %v507_v10 = vmul.f32 %v2613_v1, %v2581_v51  ;;  %v509_v14 = vmul.f32 %v2621_v5, %v2581_v51 }
  0xa9   : > { %4962 = vst [vmem:[#allocation24_spill] sm:$0xff] %v2583_v52  ;;  %1443 = vperm.xlu0 %2224, %v2508_v30   ;;  %2213 = vset.pattern.permute.xlu2 %v2297_v33  ;;  %v2643_v30 = vperm.slane %v430_v6, 0  ;;  %v773_v6 = vperm.slane %v2593_v55, 5 }
  0xaa   : > { %4963 = vst [vmem:[#allocation25_spill] sm:$0xff] %v2585_v53  ;;  %751 = vperm.xlu2 %2213, %v2503_v29  }
  0xab   : > { %2212 = vset.pattern.permute.xlu1 %v2297_v33  ;;  %4969 = vst [vmem:[#allocation31_spill] sm:$0xff] %v2643_v30  ;;  %v484_v33 = vmul.f32 %v2615_v2, %v2565_v48  ;;  %v2702_v16 = vperm.slane %v773_v6, 1 }
  0xac   : > { %747 = vperm.xlu1 %2212, %v2480_v25  }
  0xaf   : > { %v2602_v60 = vpop.permute.xlu2 %394 }
  0xb0   : > { %4964 = vst [vmem:[#allocation26_spill] sm:$0xff] %v2602_v60  ;;  %v2609_v63 = vpop.permute.xlu0 %339  ;;  %v2611_v0 = vpop.permute.xlu1 %344  ;;  %v530_v13 = vmul.f32 %v2604_v61, %v2602_v60  ;;  %v532_v31 = vmul.f32 %v2615_v2, %v2602_v60 }
  0xb1   : > { %4966 = vst [vmem:[#allocation28_spill] sm:$0xff] %v2609_v63  ;;  %1427 = vperm.xlu0 %2224, %v2485_v26   ;;  %v451_v6 = vmul.f32 %v2613_v1, %v2611_v0 }
  0xb2   : > { %4967 = vst [vmem:[#allocation29_spill] sm:$0xff] %v2611_v0  ;;  %2215 = vset.pattern.permute.xlu2 %v4754_v37  ;;  %v2669_v37 = vadd.f32 %v460_v11, %v2551_v43  ;;  %v508_v11 = vmul.f32 %v2615_v2, %v2581_v51  ;;  %v2699_v43 = vadd.f32 %v484_v33, %v2525_v34 }
  0xb3   : > { %1091 = vperm.xlu2 %2215, %v2480_v25  }
  0xb4   : > { %2214 = vset.pattern.permute.xlu1 %v4756_v44  ;;  %4976 = vst [vmem:[#allocation38_spill] sm:$0xff] %v2669_v37  ;;  %v506_v44 = vmul.f32 %v2604_v61, %v2581_v51  ;;  %v2722_v51 = vadd.f32 %v507_v10, %v2558_v46  ;;  %v774_v10 = vperm.slane %v2607_v62, 1 }
  0xb5   : > { %1447 = vperm.xlu1 %2214, %v2498_v28   ;;  %v483_v28 = vmul.f32 %v2613_v1, %v2565_v48  ;;  %v2688_v48 = vadd.f32 %v482_v17, %v2525_v34  ;;  %4981 = vst [vmem:[#allocation42_spill] sm:$0xff] %v2699_v43  ;;  %v531_v17 = vmul.f32 %v2613_v1, %v2602_v60 }
  0xb6   : > { %v2715_v33 = vadd.f32 %v506_v44, %v2558_v46  ;;  %4984 = vst [vmem:[#allocation45_spill] sm:$0xff] %v2722_v51  ;;  %v2766_v43 = vadd.f32 %v451_v6, %v2543_v40 }
  0xb7   : > { %v2647_v32 = vpop.permute.xlu2 %409  ;;  %4978 = vst [vmem:[#allocation40_spill] sm:$0xff] %v2688_v48  ;;  %v2696_v15 = vadd.f32 %v483_v28, %v2525_v34  ;;  %v2709_v48 = vadd.f32 %v485_v7, %v2525_v34  ;;  %v533_v28 = vmul.f32 %v2621_v5, %v2602_v60  ;;  %v2725_v7 = vadd.f32 %v508_v11, %v2558_v46 }
  0xb8   : > { %4971 = vst [vmem:[#allocation33_spill] sm:$0xff] %v2647_v32  ;;  %v2658_v58 = vpop.permute.xlu0 %354  ;;  %v2660_v59 = vpop.permute.xlu1 %359  ;;  %v453_v34 = vmul.f32 %v2621_v5, %v2611_v0  ;;  %v554_v44 = vmul.f32 %v2604_v61, %v2647_v32  ;;  %v2734_v60 = vadd.f32 %v530_v13, %v2567_v49  ;;  %v2752_v13 = vadd.f32 %v532_v31, %v2567_v49 }
  0xb9   : > { %4973 = vst [vmem:[#allocation35_spill] sm:$0xff] %v2658_v58  ;;  %1423 = vperm.xlu0 %2224, %v2462_v22   ;;  %v466_v31 = vmul.f32 %v2604_v61, %v2658_v58  ;;  %v475_v6 = vmul.f32 %v2613_v1, %v2660_v59 }
  0xba   : > { %4974 = vst [vmem:[#allocation36_spill] sm:$0xff] %v2660_v59 }
  0xbb   : > { %2216 = vset.pattern.permute.xlu2 %v4979_v12  ;;  %4980 = vst [vmem:[#allocation41_spill] sm:$0xff] %v2696_v15 }
  0xbc   : > { %1439 = vperm.xlu2 %2216, %v2503_v29   ;;  %4982 = vst [vmem:[#allocation43_spill] sm:$0xff] %v2709_v48  ;;  %v450_v29 = vmul.f32 %v2604_v61, %v2611_v0  ;;  %v2749_v48 = vadd.f32 %v531_v17, %v2567_v49  ;;  %v474_v17 = vmul.f32 %v2604_v61, %v2660_v59 }
  0xbd   : > { %1435 = vperm.xlu1 %2214, %v2480_v25   ;;  %4983 = vst [vmem:[#allocation44_spill] sm:$0xff] %v2715_v33  ;;  %v452_v25 = vmul.f32 %v2615_v2, %v2611_v0  ;;  %v2737_v33 = vadd.f32 %v509_v14, %v2558_v46  ;;  %v556_v0 = vmul.f32 %v2615_v2, %v2647_v32 }
  0xbe   : > { %4985 = vst [vmem:[#allocation46_spill] sm:$0xff] %v2725_v7  ;;  %v555_v7 = vmul.f32 %v2613_v1, %v2647_v32  ;;  %v557_v46 = vmul.f32 %v2621_v5, %v2647_v32  ;;  %v2776_v32 = vadd.f32 %v453_v34, %v2543_v40  ;;  %v468_v34 = vmul.f32 %v2615_v2, %v2658_v58 }
  0xbf   : > { %4986 = vst [vmem:[#allocation47_spill] sm:$0xff] %v2734_v60  ;;  %v2760_v60 = vadd.f32 %v533_v28, %v2567_v49  ;;  %v2779_v28 = vadd.f32 %v554_v44, %v2583_v52  ;;  %v2785_v49 = vperm.slane %v774_v10, 1  ;;  %v476_v44 = vmul.f32 %v2615_v2, %v2660_v59 }
  0xc0   : > { %4987 = vst [vmem:[#allocation48_spill] sm:$0xff] %v2737_v33  ;;  %v2740_v51 = vpop.permute.xlu0 %369  ;;  %v2742_v11 = vpop.permute.xlu1 %374  ;;  %v2763_v33 = vadd.f32 %v450_v29, %v2543_v40  ;;  %v467_v29 = vmul.f32 %v2613_v1, %v2658_v58  ;;  %v2801_v10 = vadd.f32 %v557_v46, %v2583_v52  ;;  %v433_v46 = vperm.slane %v2618_v4, 4 }
  0xc1   : > { %4988 = vst [vmem:[#allocation49_spill] sm:$0xff] %v2740_v51  ;;  %v2754_v14 = vpop.permute.xlu2 %707  ;;  %1411 = vperm.xlu0 %2224, %v2444_v19   ;;  %v490_v15 = vmul.f32 %v2604_v61, %v2740_v51  ;;  %v2840_v21 = vadd.f32 %v476_v44, %v2549_v42  ;;  %v492_v44 = vmul.f32 %v2615_v2, %v2740_v51 }
  0xc2   : > { %4989 = vst [vmem:[#allocation50_spill] sm:$0xff] %v2742_v11  ;;  %v2862_v37 = vperm.slane %v433_v46, 0  ;;  %v796_v46 = vmul.f32 %v2681_v57, %v2754_v14 }
  0xc3   : > { %4990 = vst [vmem:[#allocation51_spill] sm:$0xff] %v2749_v48  ;;  %v2789_v48 = vadd.f32 %v555_v7, %v2583_v52  ;;  %v469_v7 = vmul.f32 %v2621_v5, %v2658_v58  ;;  %v499_v58 = vmul.f32 %v2613_v1, %v2742_v11 }
  0xc4   : > { %4991 = vst [vmem:[#allocation52_spill] sm:$0xff] %v2752_v13  ;;  %v2773_v13 = vadd.f32 %v452_v25, %v2543_v40  ;;  %v2792_v25 = vadd.f32 %v556_v0, %v2583_v52  ;;  %v477_v0 = vmul.f32 %v2621_v5, %v2660_v59  ;;  %v775_v40 = vperm.slane %v2607_v62, 5 }
  0xc5   : > { %4992 = vst [vmem:[#allocation53_spill] sm:$0xff] %v2754_v14  ;;  %v500_v59 = vmul.f32 %v2615_v2, %v2742_v11  ;;  %v2823_v52 = vadd.f32 %v467_v29, %v2541_v39  ;;  %v2837_v62 = vadd.f32 %v468_v34, %v2541_v39  ;;  %v2865_v3 = vadd.f32 %v499_v58, %v2560_v47 }
  0xc6   : > { %4993 = vst [vmem:[#allocation54_spill] sm:$0xff] %v2760_v60  ;;  %v4996_v60 = vmov 2   ;;  %v2853_v45 = vperm.slane %v775_v40, 1  ;;  %v794_v40 = vmul.f32 %v2672_v8, %v2754_v14  ;;  %v776_v58 = vperm.slane %v2618_v4, 1 }
  0xc7   : > { %4994 = vst [vmem:[#allocation55_spill] sm:$0xff] %v2779_v28  ;;  %2218 = vset.pattern.permute.xlu2 %v4996_v60  ;;  %2217 = vset.pattern.permute.xlu1 %v4996_v60  ;;  %v2815_v28 = vadd.f32 %v474_v17, %v2549_v42  ;;  %v501_v17 = vmul.f32 %v2621_v5, %v2742_v11 }
  0xc8   : > { %4995 = vst [vmem:[#allocation56_spill] sm:$0xff] %v2785_v49  ;;  %1087 = vperm.xlu2 %2218, %v2490_v27   ;;  %1083 = vperm.xlu1 %2217, %v2485_v26   ;;  %v2826_v26 = vadd.f32 %v475_v6, %v2549_v42  ;;  %v491_v6 = vmul.f32 %v2613_v1, %v2740_v51 }
  0xc9   : > { %4997 = vst [vmem:[#allocation57_spill] sm:$0xff] %v2789_v48  ;;  %v2812_v48 = vadd.f32 %v466_v31, %v2541_v39  ;;  %v2830_v31 = vpop.permute.xlu1 %389  ;;  %v2842_v29 = vpop.permute.xlu2 %719  ;;  %1395 = vperm.xlu0 %2224, %v2437_v18   ;;  %v2848_v49 = vadd.f32 %v469_v7, %v2541_v39  ;;  %v493_v18 = vmul.f32 %v2621_v5, %v2740_v51 }
  0xca   : > { %4998 = vst [vmem:[#allocation58_spill] sm:$0xff] %v2792_v25  ;;  %v498_v25 = vmul.f32 %v2604_v61, %v2742_v11  ;;  %v2851_v11 = vadd.f32 %v477_v0, %v2549_v42  ;;  %v2868_v7 = vadd.f32 %v500_v59, %v2560_v47  ;;  %v2875_v0 = vadd.f32 %v501_v17, %v2560_v47 }
  0xcb   : > { %4999 = vst [vmem:[#allocation59_spill] sm:$0xff] %v2801_v10  ;;  %v2828_v10 = vpop.permute.xlu0 %384  ;;  %v2878_v42 = vadd.f32 %v490_v15, %v2530_v35  ;;  %v522_v39 = vmul.f32 %v2604_v61, %v2830_v31  ;;  %v2889_v51 = vadd.f32 %v491_v6, %v2530_v35  ;;  %v797_v15 = vmul.f32 %v2702_v16, %v2754_v14 }
  0xcc   : > { %5000 = vst [vmem:[#allocation60_spill] sm:$0xff] %v2828_v10  ;;  %v2856_v34 = vadd.f32 %v498_v25, %v2560_v47  ;;  %v795_v25 = vmul.f32 %v2674_v9, %v2754_v14  ;;  %v514_v59 = vmul.f32 %v2604_v61, %v2828_v10  ;;  %v515_v17 = vmul.f32 %v2613_v1, %v2828_v10 }
  0xcd   : > { %5001 = vst [vmem:[#allocation61_spill] sm:$0xff] %v2830_v31  ;;  %v523_v47 = vmul.f32 %v2613_v1, %v2830_v31  ;;  %v524_v4 = vmul.f32 %v2615_v2, %v2830_v31  ;;  %v2904_v6 = vadd.f32 %v492_v44, %v2530_v35  ;;  %v2907_v14 = vadd.f32 %v493_v18, %v2530_v35 }
  0xce   : > { %5002 = vst [vmem:[#allocation62_spill] sm:$0xff] %v2842_v29  ;;  %v2924_v44 = vadd.f32 %v796_v46, %v2773_v13  ;;  %v2926_v18 = vperm.slane %v776_v58, 1  ;;  %v2939_v35 = vadd.f32 %v797_v15, %v2776_v32  ;;  %v2943_v13 = vadd.f32 %v515_v17, %v2535_v36 }
  0xcf   : > { %5003 = vst [vmem:[#allocation63_spill] sm:$0xff] %v2853_v45  ;;  %v2910_v45 = vadd.f32 %v794_v40, %v2763_v33  ;;  %v2934_v40 = vadd.f32 %v522_v39, %v2569_v50  ;;  %v2946_v46 = vadd.f32 %v523_v47, %v2569_v50  ;;  %v2952_v39 = vadd.f32 %v524_v4, %v2569_v50 }
  0xd0   : > { %5004 = vst [vmem:[#allocation64_spill] sm:$0xff] %v2856_v34  ;;  %1075 = vperm.xlu2 %2218, %v2472_v24   ;;  %2219 = vset.pattern.permute.xlu1 %v4979_v12  ;;  %v517_v34 = vmul.f32 %v2621_v5, %v2828_v10  ;;  %v819_v32 = vmul.f32 %v2674_v9, %v2842_v29 }
  0xd1   : > { %5005 = vst [vmem:[#allocation65_spill] sm:$0xff] %v2862_v37  ;;  %v516_v37 = vmul.f32 %v2615_v2, %v2828_v10  ;;  %1431 = vperm.xlu1 %2219, %v2490_v27   ;;  %v525_v27 = vmul.f32 %v2621_v5, %v2830_v31  ;;  %v2928_v33 = vpop.permute.xlu2 %727  ;;  %v5017_v31 = vmov 0   ;;  %v820_v15 = vmul.f32 %v2681_v57, %v2842_v29 }
  0xd2   : > { %5006 = vst [vmem:[#allocation66_spill] sm:$0xff] %v2865_v3  ;;  %v2917_v3 = vpop.permute.xlu1 %404  ;;  %2230 = vset.pattern.permute.xlu0 %v5017_v31  ;;  %v821_v17 = vmul.f32 %v2702_v16, %v2842_v29  ;;  %v2967_v4 = vadd.f32 %v517_v34, %v2535_v36 }
  0xd3   : > { %5007 = vst [vmem:[#allocation67_spill] sm:$0xff] %v2868_v7  ;;  %v2915_v7 = vpop.permute.xlu0 %399  ;;  %v2949_v58 = vadd.f32 %v516_v37, %v2535_v36  ;;  %v547_v47 = vmul.f32 %v2613_v1, %v2917_v3  ;;  %v548_v37 = vmul.f32 %v2615_v2, %v2917_v3  ;;  %v2970_v10 = vadd.f32 %v525_v27, %v2569_v50 }
  0xd4   : > { %5008 = vst [vmem:[#allocation68_spill] sm:$0xff] %v2875_v0  ;;  %v2913_v0 = vadd.f32 %v795_v25, %v2766_v43  ;;  %v2931_v43 = vadd.f32 %v514_v59, %v2535_v36  ;;  %v818_v25 = vmul.f32 %v2672_v8, %v2842_v29  ;;  %v546_v59 = vmul.f32 %v2604_v61, %v2917_v3 }
  0xd5   : > { %5009 = vst [vmem:[#allocation69_spill] sm:$0xff] %v2910_v45  ;;  %v538_v29 = vmul.f32 %v2604_v61, %v2915_v7  ;;  %v540_v34 = vmul.f32 %v2615_v2, %v2915_v7  ;;  %v541_v27 = vmul.f32 %v2621_v5, %v2915_v7  ;;  %v834_v50 = vmul.f32 %v2672_v8, %v2928_v33 }
  0xd6   : > { %5010 = vst [vmem:[#allocation70_spill] sm:$0xff] %v2913_v0  ;;  %v2980_v0 = vadd.f32 %v818_v25, %v2815_v28  ;;  %v835_v36 = vmul.f32 %v2674_v9, %v2928_v33  ;;  %v2993_v45 = vadd.f32 %v546_v59, %v2585_v53  ;;  %v2996_v28 = vadd.f32 %v819_v32, %v2826_v26 }
  0xd7   : > { %5011 = vst [vmem:[#allocation71_spill] sm:$0xff] %v2915_v7  ;;  %v3002_v25 = vadd.f32 %v821_v17, %v2851_v11  ;;  %v3013_v59 = vadd.f32 %v548_v37, %v2585_v53  ;;  %v836_v26 = vmul.f32 %v2681_v57, %v2928_v33  ;;  %v3036_v37 = vadd.f32 %v541_v27, %v2539_v38 }
  0xd8   : > { %5012 = vst [vmem:[#allocation72_spill] sm:$0xff] %v2917_v3  ;;  %2221 = vset.pattern.permute.xlu2 %v4979_v12  ;;  %v1458_v27 = vperm.slane %v2588_v54, 3 }
  0xd9   : > { %5013 = vst [vmem:[#allocation73_spill] sm:$0xff] %v2924_v44  ;;  %v539_v44 = vmul.f32 %v2613_v1, %v2915_v7  ;;  %1419 = vperm.xlu2 %2221, %v2472_v24   ;;  %2220 = vset.pattern.permute.xlu1 %v4996_v60  ;;  %v2999_v24 = vadd.f32 %v820_v15, %v2840_v21  ;;  %v3019_v11 = vpop.permute.xlu2 %739 }
  0xda   : > { %5014 = vst [vmem:[#allocation74_spill] sm:$0xff] %v2926_v18  ;;  %1079 = vperm.xlu1 %2220, %v2462_v22   ;;  %v837_v21 = vmul.f32 %v2702_v16, %v2928_v33  ;;  %v3027_v15 = vadd.f32 %v538_v29, %v2539_v38  ;;  %v1114_v29 = vperm.slane %v2588_v54, 2 }
  0xdb   : > { %5015 = vst [vmem:[#allocation75_spill] sm:$0xff] %v2928_v33  ;;  %v3005_v7 = vpop.permute.xlu0 %414  ;;  %v3030_v17 = vadd.f32 %v539_v44, %v2539_v38  ;;  %v3039_v33 = vadd.f32 %v834_v50, %v2878_v42  ;;  %v3054_v42 = vadd.f32 %v836_v26, %v2904_v6  ;;  %v1460_v6 = vperm.slane %v2593_v55, 3 }
  0xdc   : > { %5016 = vst [vmem:[#allocation76_spill] sm:$0xff] %v2939_v35  ;;  %v549_v35 = vmul.f32 %v2621_v5, %v2917_v3  ;;  %v3007_v3 = vpop.permute.xlu1 %419  ;;  %v562_v22 = vmul.f32 %v2604_v61, %v3005_v7  ;;  %v563_v44 = vmul.f32 %v2613_v1, %v3005_v7 }
  0xdd   : > { %5018 = vst [vmem:[#allocation77_spill] sm:$0xff] %v2980_v0  ;;  %v3010_v0 = vadd.f32 %v547_v47, %v2585_v53  ;;  %v3033_v47 = vadd.f32 %v540_v34, %v2539_v38  ;;  %v571_v34 = vmul.f32 %v2613_v1, %v3007_v3  ;;  %v1115_v38 = vperm.slane %v2588_v54, 6 }
  0xde   : > { %5019 = vst [vmem:[#allocation78_spill] sm:$0xff] %v2996_v28  ;;  %v3024_v32 = vadd.f32 %v549_v35, %v2585_v53  ;;  %v570_v35 = vmul.f32 %v2604_v61, %v3007_v3  ;;  %v3060_v50 = vadd.f32 %v562_v22, %v2546_v41  ;;  %v564_v61 = vmul.f32 %v2615_v2, %v3005_v7 }
  0xdf   : > { %5020 = vst [vmem:[#allocation79_spill] sm:$0xff] %v2999_v24  ;;  %v572_v1 = vmul.f32 %v2615_v2, %v3007_v3  ;;  %v1116_v53 = vperm.slane %v2593_v55, 2  ;;  %v573_v26 = vmul.f32 %v2621_v5, %v3007_v3  ;;  %v3079_v2 = vadd.f32 %v563_v44, %v2546_v41 }
  0xe0   : > { %5021 = vst [vmem:[#allocation80_spill] sm:$0xff] %v3002_v25  ;;  %v3042_v25 = vadd.f32 %v835_v36, %v2889_v51  ;;  %v3057_v36 = vadd.f32 %v837_v21, %v2907_v14  ;;  %v1459_v51 = vperm.slane %v2588_v54, 7  ;;  %v565_v14 = vmul.f32 %v2621_v5, %v3005_v7 }
  0xe1   : > { %5022 = vst [vmem:[#allocation81_spill] sm:$0xff] %v3005_v7  ;;  %2222 = vset.pattern.permute.xlu2 %v4996_v60  ;;  %v698_v54 = vadd.f32 %v570_v35, %v2609_v63  ;;  %v3076_v21 = vperm.slane %v1114_v29, 2  ;;  %v699_v22 = vadd.f32 %v571_v34, %v2609_v63  ;;  %v1461_v5 = vperm.slane %v2593_v55, 7  ;;  %v3091_v35 = vpop.permute.xlu2 %767 }
  0xe2   : > { %5023 = vst [vmem:[#allocation82_spill] sm:$0xff] %v3019_v11  ;;  %1071 = vperm.xlu2 %2222, %v2467_v23   ;;  %1067 = vperm.xlu1 %2220, %v2444_v19   ;;  %v3093_v29 = vperm.slane %v1459_v51, 3  ;;  %v3096_v44 = vadd.f32 %v564_v61, %v2546_v41  ;;  %v700_v34 = vadd.f32 %v572_v1, %v2609_v63  ;;  %v3105_v24 = vperm.slane %v1460_v6, 3 }
  0xe3   : > { %5024 = vst [vmem:[#allocation83_spill] sm:$0xff] %v3027_v15  ;;  %v858_v19 = vmul.f32 %v2672_v8, %v3019_v11  ;;  %v701_v51 = vadd.f32 %v573_v26, %v2609_v63  ;;  %v914_v61 = vmul.f32 %v2672_v8, %v3091_v35  ;;  %v915_v1 = vmul.f32 %v2674_v9, %v3091_v35 }
  0xe4   : > { %5025 = vst [vmem:[#allocation84_spill] sm:$0xff] %v3030_v17  ;;  %v859_v28 = vmul.f32 %v2674_v9, %v3019_v11  ;;  %v916_v6 = vmul.f32 %v2681_v57, %v3091_v35  ;;  %v3125_v26 = vperm.slane %v1461_v5, 3  ;;  %v861_v17 = vmul.f32 %v2702_v16, %v3019_v11 }
  0xe5   : > { %5026 = vst [vmem:[#allocation85_spill] sm:$0xff] %v3033_v47  ;;  %v3128_v47 = vadd.f32 %v858_v19, %v2931_v43  ;;  %v3145_v19 = vadd.f32 %v914_v61, %v698_v54 }
  0xe6   : > { %5027 = vst [vmem:[#allocation86_spill] sm:$0xff] %v3036_v37 }
  0xe7   : > { %5028 = vst [vmem:[#allocation87_spill] sm:$0xff] %v3039_v33  ;;  %v3089_v33 = vpop.permute.xlu0 %711 }
  0xe8   : > { %5029 = vst [vmem:[#allocation88_spill] sm:$0xff] %v3042_v25  ;;  %v1117_v25 = vperm.slane %v2593_v55, 6  ;;  %v3108_v55 = vadd.f32 %v565_v14, %v2546_v41  ;;  %v917_v14 = vmul.f32 %v2702_v16, %v3091_v35  ;;  %v802_v5 = vmul.f32 %v2672_v8, %v3089_v33 }
  0xe9   : > { %5030 = vst [vmem:[#allocation89_spill] sm:$0xff] %v3054_v42  ;;  %v3085_v42 = vperm.slane %v1115_v38, 2  ;;  %v3101_v38 = vpop.permute.xlu1 %715  ;;  %v803_v43 = vmul.f32 %v2674_v9, %v3089_v33  ;;  %v805_v54 = vmul.f32 %v2702_v16, %v3089_v33 }
  0xea   : > { %5031 = vst [vmem:[#allocation90_spill] sm:$0xff] %v3057_v36  ;;  %v3083_v36 = vperm.slane %v1458_v27, 3  ;;  %v3103_v27 = vperm.slane %v1116_v53, 2  ;;  %v860_v53 = vmul.f32 %v2681_v57, %v3019_v11  ;;  %v3123_v37 = vperm.slane %v1117_v25, 2  ;;  %1059 = vperm.xlu2 %2222, %v2449_v20   ;;  %2223 = vset.pattern.permute.xlu1 %v4979_v12 }
  0xeb   : > { %5032 = vst [vmem:[#allocation91_spill] sm:$0xff] %v3079_v2  ;;  %v810_v15 = vmul.f32 %v2672_v8, %v3101_v38  ;;  %v811_v31 = vmul.f32 %v2674_v9, %v3101_v38  ;;  %v812_v18 = vmul.f32 %v2681_v57, %v3101_v38  ;;  %v813_v25 = vmul.f32 %v2702_v16, %v3101_v38 }
  0xec   : > { %5033 = vst [vmem:[#allocation92_spill] sm:$0xff] %v3089_v33  ;;  %v3147_v11 = vadd.f32 %v915_v1, %v699_v22  ;;  %v804_v2 = vmul.f32 %v2681_v57, %v3089_v33  ;;  %1415 = vperm.xlu1 %2223, %v2467_v23  }
  0xed   : > { %5034 = vst [vmem:[#allocation93_spill] sm:$0xff] %v3091_v35  ;;  %v3183_v23 = vadd.f32 %v812_v18, %v2837_v62  ;;  %v3186_v1 = vadd.f32 %v813_v25, %v2848_v49  ;;  %v5054_v18 = vld [vmem:[#allocation38_spill] sm:$0xff] }
  0xee   : > { %5035 = vst [vmem:[#allocation94_spill] sm:$0xff] %v3096_v44  ;;  %v3158_v44 = vadd.f32 %v917_v14, %v701_v51  ;;  %v566_v51 = vmul.f32 %v2643_v30, %v3005_v7 }
  0xef   : > { %5036 = vst [vmem:[#allocation95_spill] sm:$0xff] %v3101_v38  ;;  %v3156_v38 = vadd.f32 %v916_v6, %v700_v34  ;;  %v3165_v22 = vpop.permute.xlu0 %731  ;;  %v3176_v34 = vadd.f32 %v811_v31, %v2823_v52  ;;  %v5056_v6 = vld [vmem:[#allocation39_spill] sm:$0xff] }
  0xf0   : > { %5037 = vst [vmem:[#allocation96_spill] sm:$0xff] %v3105_v24  ;;  %v842_v49 = vmul.f32 %v2672_v8, %v3165_v22  ;;  %v3210_v14 = vadd.f32 %v805_v54, %v5056_v6  ;;  %v844_v25 = vmul.f32 %v2681_v57, %v3165_v22 }
  0xf1   : > { %5038 = vst [vmem:[#allocation97_spill] sm:$0xff] %v3108_v55  ;;  %v3153_v55 = vadd.f32 %v860_v53, %v2949_v58  ;;  %v3170_v58 = vadd.f32 %v861_v17, %v2967_v4  ;;  %v3180_v61 = vpop.permute.xlu1 %723  ;;  %v3189_v4 = vadd.f32 %v802_v5, %v2654_v56  ;;  %v5052_v17 = vld [vmem:[#allocation37_spill] sm:$0xff]  ;;  %v843_v56 = vmul.f32 %v2674_v9, %v3165_v22 }
  0xf2   : > { %5039 = vst [vmem:[#allocation98_spill] sm:$0xff] %v3125_v26  ;;  %v3207_v53 = vadd.f32 %v804_v2, %v5054_v18  ;;  %v845_v5 = vmul.f32 %v2702_v16, %v3165_v22  ;;  %v826_v33 = vmul.f32 %v2672_v8, %v3180_v61  ;;  %v827_v2 = vmul.f32 %v2674_v9, %v3180_v61  ;;  %v5058_v18 = vld [vmem:[#allocation56_spill] sm:$0xff] }
  0xf3   : > { %5040 = vst [vmem:[#allocation99_spill] sm:$0xff] %v3128_v47  ;;  %v3150_v47 = vadd.f32 %v859_v28, %v2943_v13  ;;  %v3167_v13 = vpop.permute.xlu2 %755  ;;  %v3173_v28 = vadd.f32 %v810_v15, %v2812_v48  ;;  %v3192_v48 = vadd.f32 %v803_v43, %v5052_v17  ;;  %v574_v43 = vmul.f32 %v2643_v30, %v3007_v3  ;;  %v5066_v30 = vld [vmem:[#allocation66_spill] sm:$0xff] }
  0xf4   : > { %5042 = vst [vmem:[#allocation101_spill] sm:$0xff] %v3153_v55  ;;  %v890_v52 = vmul.f32 %v2672_v8, %v3167_v13  ;;  %v891_v31 = vmul.f32 %v2674_v9, %v3167_v13  ;;  %v892_v15 = vmul.f32 %v2681_v57, %v3167_v13  ;;  %v893_v62 = vmul.f32 %v2702_v16, %v3167_v13 }
  0xf5   : > { %5041 = vst [vmem:[#allocation100_spill] sm:$0xff] %v3150_v47  ;;  %v3219_v17 = vadd.f32 %v566_v51, %v2546_v41  ;;  %v828_v54 = vmul.f32 %v2681_v57, %v3180_v61  ;;  %v918_v6 = vmul.f32 %v5058_v18, %v3091_v35  ;;  %2225 = vset.pattern.permute.xlu2 %v4979_v12  ;;  %v5096_v47 = vld [vmem:[#allocation46_spill] sm:$0xff] }
  0xf6   : > { %5043 = vst [vmem:[#allocation102_spill] sm:$0xff] %v3165_v22  ;;  %v3231_v22 = vadd.f32 %v890_v52, %v2993_v45  ;;  %v3234_v51 = vadd.f32 %v891_v31, %v3010_v0  ;;  %v829_v45 = vmul.f32 %v2702_v16, %v3180_v61  ;;  %v5068_v52 = vld [vmem:[#allocation27_spill] sm:$0xff]  ;;  %1403 = vperm.xlu1 %2223, %v2449_v20   ;;  %v5078_v20 = vld [vmem:[#allocation41_spill] sm:$0xff] }
  0xf7   : > { %5044 = vst [vmem:[#allocation103_spill] sm:$0xff] %v3167_v13  ;;  %v3237_v13 = vadd.f32 %v892_v15, %v3013_v59  ;;  %v1462_v0 = vperm.slane %v5068_v52, 3  ;;  %v3253_v59 = vpop.permute.xlu0 %743  ;;  %v5070_v31 = vld [vmem:[#allocation67_spill] sm:$0xff]  ;;  %v5072_v15 = vld [vmem:[#allocation68_spill] sm:$0xff] }
  0xf8   : > { %5045 = vst [vmem:[#allocation104_spill] sm:$0xff] %v3170_v58 }
  0xf9   : > { %5046 = vst [vmem:[#allocation105_spill] sm:$0xff] %v3173_v28  ;;  %v868_v28 = vmul.f32 %v2681_v57, %v3253_v59 }
  0xfa   : > { %5047 = vst [vmem:[#allocation106_spill] sm:$0xff] %v3176_v34  ;;  %v5080_v34 = vld [vmem:[#allocation42_spill] sm:$0xff] }
  0xfb   : > { %5048 = vst [vmem:[#allocation107_spill] sm:$0xff] %v3180_v61 }
  0xfc   : > { %5049 = vst [vmem:[#allocation108_spill] sm:$0xff] %v3183_v23  ;;  %v3271_v23 = vadd.f32 %v827_v2, %v5078_v20  ;;  %v5083_v2 = vld [vmem:[#allocation43_spill] sm:$0xff] }
  0xfd   : > { %5050 = vst [vmem:[#allocation109_spill] sm:$0xff] %v3186_v1  ;;  %v3247_v1 = vadd.f32 %v843_v56, %v5066_v30  ;;  %v1118_v30 = vperm.slane %v5068_v52, 2  ;;  %v3265_v56 = vpop.permute.xlu2 %1451 }
  0xfe   : > { %5051 = vst [vmem:[#allocation110_spill] sm:$0xff] %v3189_v4  ;;  %2226 = vset.pattern.permute.xlu1 %v4996_v60 }
  0xff   : > { %5053 = vst [vmem:[#allocation37_spill] sm:$0xff] %v3192_v48  ;;  %v5064_v48 = vld [vmem:[#allocation64_spill] sm:$0xff] }
 0x100   : > { %5055 = vst [vmem:[#allocation38_spill] sm:$0xff] %v3207_v53  ;;  %v5063_v53 = vld [vmem:[#allocation7_spill] sm:$0xff]  ;;  %v3244_v4 = vadd.f32 %v842_v49, %v5064_v48  ;;  %v702_v48 = vadd.f32 %v574_v43, %v2609_v63  ;;  %v3263_v49 = vpop.permute.xlu1 %735  ;;  %v866_v43 = vmul.f32 %v2672_v8, %v3253_v59 }
 0x101   : > { %5057 = vst [vmem:[#allocation39_spill] sm:$0xff] %v3210_v14  ;;  %v3240_v14 = vadd.f32 %v893_v62, %v3024_v32  ;;  %1407 = vperm.xlu2 %2225, %v5063_v53   ;;  %v3256_v32 = vadd.f32 %v844_v25, %v5070_v31  ;;  %v3259_v62 = vadd.f32 %v845_v5, %v5072_v15  ;;  %v5076_v53 = vld [vmem:[#allocation40_spill] sm:$0xff] }
 0x102   : > { %5059 = vst [vmem:[#allocation111_spill] sm:$0xff] %v3231_v22  ;;  %v3268_v61 = vadd.f32 %v826_v33, %v5076_v53  ;;  %v3274_v25 = vadd.f32 %v828_v54, %v5080_v34  ;;  %v5082_v5 = vld [vmem:[#allocation32_spill] sm:$0xff]  ;;  %v867_v15 = vmul.f32 %v2674_v9, %v3253_v59  ;;  %v869_v33 = vmul.f32 %v2702_v16, %v3253_v59 }
 0x103   : > { %5060 = vst [vmem:[#allocation112_spill] sm:$0xff] %v3234_v51  ;;  %v567_v31 = vmul.f32 %v5082_v5, %v3005_v7  ;;  %v3287_v53 = vadd.f32 %v829_v45, %v5083_v2  ;;  %v3289_v34 = vadd.f32 %v918_v6, %v702_v48  ;;  %v3291_v54 = vperm.slane %v1462_v0, 3 }
 0x104   : > { %5061 = vst [vmem:[#allocation113_spill] sm:$0xff] %v3237_v13  ;;  %v575_v20 = vmul.f32 %v5082_v5, %v3007_v3  ;;  %v852_v45 = vmul.f32 %v2681_v57, %v3263_v49  ;;  %v1595_v6 = vmul.f32 %v3093_v29, %v3265_v56  ;;  %v3307_v0 = vmul.f32 %v3105_v24, %v3265_v56  ;;  %v5107_v13 = vld [vmem:[#allocation97_spill] sm:$0xff] }
 0x105   : > { %5062 = vst [vmem:[#allocation114_spill] sm:$0xff] %v3240_v14  ;;  %v3311_v48 = vmul.f32 %v3125_v26, %v3265_v56  ;;  %v853_v2 = vmul.f32 %v2702_v16, %v3263_v49  ;;  %v3319_v5 = vadd.f32 %v867_v15, %v2946_v46  ;;  %v3325_v58 = vadd.f32 %v869_v33, %v2970_v10  ;;  %v5094_v15 = vld [vmem:[#allocation45_spill] sm:$0xff] }
 0x106   : > { %5065 = vst [vmem:[#allocation7_spill] sm:$0xff] %v3244_v4  ;;  %v3330_v55 = vmul.f32 %v3291_v54, %v3265_v56 }
 0x107   : > { %5067 = vst [vmem:[#allocation64_spill] sm:$0xff] %v3247_v1  ;;  %v3352_v1 = vpop.permute.xlu0 %1107 }
 0x108   : > { %5069 = vst [vmem:[#allocation66_spill] sm:$0xff] %v3253_v59  ;;  %v3316_v59 = vadd.f32 %v866_v43, %v2934_v40  ;;  %v703_v40 = vadd.f32 %v575_v20, %v2609_v63  ;;  %v5090_v43 = vld [vmem:[#allocation63_spill] sm:$0xff]  ;;  %v3350_v20 = vpop.permute.xlu1 %763 }
 0x109   : > { %5071 = vst [vmem:[#allocation27_spill] sm:$0xff] %v3256_v32  ;;  %2227 = vset.pattern.permute.xlu2 %v4996_v60  ;;  %v919_v46 = vmul.f32 %v5090_v43, %v3091_v35  ;;  %v3347_v32 = vperm.slane %v1118_v30, 2  ;;  %v5101_v60 = vld [vmem:[#allocation48_spill] sm:$0xff]  ;;  %v906_v30 = vmul.f32 %v2672_v8, %v3350_v20 }
 0x10a   : > { %5073 = vst [vmem:[#allocation67_spill] sm:$0xff] %v3259_v62  ;;  %v3345_v62 = vadd.f32 %v852_v45, %v5096_v47  ;;  %v3355_v4 = vadd.f32 %v853_v2, %v5101_v60  ;;  %v3361_v47 = vpop.permute.xlu2 %1103  ;;  %v1250_v45 = vmul.f32 %v3076_v21, %v3352_v1  ;;  %v1251_v2 = vmul.f32 %v3085_v42, %v3352_v1 }
 0x10b   : > { %5074 = vst [vmem:[#allocation68_spill] sm:$0xff] %v3263_v49  ;;  %v1252_v60 = vmul.f32 %v3103_v27, %v3352_v1 }
 0x10c   : > { %5075 = vst [vmem:[#allocation115_spill] sm:$0xff] %v3265_v56 }
 0x10d   : > { %5077 = vst [vmem:[#allocation40_spill] sm:$0xff] %v3268_v61  ;;  %v851_v61 = vmul.f32 %v2674_v9, %v3263_v49 }
 0x10e   : > { %5079 = vst [vmem:[#allocation41_spill] sm:$0xff] %v3271_v23  ;;  %v850_v23 = vmul.f32 %v2672_v8, %v3263_v49  ;;  %v695_v49 = vadd.f32 %v567_v31, %v2546_v41  ;;  %v5099_v31 = vld [vmem:[#allocation6_spill] sm:$0xff] }
 0x10f   : > { %5081 = vst [vmem:[#allocation42_spill] sm:$0xff] %v3274_v25  ;;  %v1594_v25 = vmul.f32 %v3083_v36, %v3265_v56  ;;  %v3342_v33 = vadd.f32 %v851_v61, %v5094_v15  ;;  %1051 = vperm.xlu1 %2226, %v5099_v31   ;;  %v5103_v61 = vld [vmem:[#allocation34_spill] sm:$0xff]  ;;  %v907_v31 = vmul.f32 %v2674_v9, %v3350_v20 }
 0x110   : > { %5084 = vst [vmem:[#allocation43_spill] sm:$0xff] %v3287_v53  ;;  %v3322_v53 = vadd.f32 %v868_v28, %v2952_v39  ;;  %v5091_v39 = vld [vmem:[#allocation5_spill] sm:$0xff]  ;;  %v5092_v28 = vld [vmem:[#allocation44_spill] sm:$0xff]  ;;  %v568_v15 = vmul.f32 %v5103_v61, %v3005_v7 }
 0x111   : > { %5085 = vst [vmem:[#allocation116_spill] sm:$0xff] %v3291_v54  ;;  %1055 = vperm.xlu2 %2227, %v5091_v39   ;;  %v3339_v10 = vadd.f32 %v850_v23, %v5092_v28  ;;  %v1119_v23 = vperm.slane %v5068_v52, 6  ;;  %v1463_v28 = vperm.slane %v5068_v52, 7  ;;  %v908_v52 = vmul.f32 %v2681_v57, %v3350_v20  ;;  %v5109_v54 = vld [vmem:[#allocation74_spill] sm:$0xff] }
 0x112   : > { %5086 = vst [vmem:[#allocation117_spill] sm:$0xff] %v3316_v59  ;;  %v5106_v59 = vld [vmem:[#allocation94_spill] sm:$0xff]  ;;  %v3391_v7 = vmul.f32 %v5109_v54, %v3091_v35 }
 0x113   : > { %5087 = vst [vmem:[#allocation118_spill] sm:$0xff] %v3319_v5  ;;  %v576_v5 = vmul.f32 %v5103_v61, %v3007_v3  ;;  %v1036_v14 = vadd.f32 %v908_v52, %v5106_v59  ;;  %v3387_v22 = vperm.slane %v1119_v23, 2  ;;  %v911_v59 = vmul.f32 %v5090_v43, %v3350_v20 }
 0x114   : > { %5088 = vst [vmem:[#allocation119_spill] sm:$0xff] %v3322_v53  ;;  %v3381_v53 = vadd.f32 %v919_v46, %v703_v40  ;;  %v3395_v40 = vperm.slane %v1463_v28, 3  ;;  %v3406_v23 = vmul.f32 %v3076_v21, %v3361_v47 }
 0x115   : > { %5089 = vst [vmem:[#allocation120_spill] sm:$0xff] %v3325_v58  ;;  %v1380_v46 = vadd.f32 %v1252_v60, %v1036_v14  ;;  %v3414_v14 = vmul.f32 %v3103_v27, %v3361_v47  ;;  %v1255_v28 = vmul.f32 %v3387_v22, %v3352_v1  ;;  %v3448_v52 = vadd.f32 %v576_v5, %v2609_v63 }
 0x116   : > { %5093 = vst [vmem:[#allocation5_spill] sm:$0xff] %v3339_v10  ;;  %v5105_v10 = vld [vmem:[#allocation91_spill] sm:$0xff] }
 0x117   : > { %5095 = vst [vmem:[#allocation44_spill] sm:$0xff] %v3342_v33  ;;  %v1034_v33 = vadd.f32 %v906_v30, %v3060_v50  ;;  %v1035_v58 = vadd.f32 %v907_v31, %v5105_v10  ;;  %v910_v50 = vmul.f32 %v5058_v18, %v3350_v20  ;;  %2228 = vset.pattern.permute.xlu1 %v4979_v12  ;;  %v5116_v18 = vld [vmem:[#allocation85_spill] sm:$0xff] }
 0x118   : > { %5097 = vst [vmem:[#allocation45_spill] sm:$0xff] %v3345_v62  ;;  %v1253_v62 = vmul.f32 %v3123_v37, %v3352_v1  ;;  %1399 = vperm.xlu1 %2228, %v5091_v39   ;;  %v3434_v12 = vadd.f32 %v3307_v0, %v1380_v46  ;;  %v1599_v30 = vmul.f32 %v3395_v40, %v3265_v56 }
 0x119   : > { %5098 = vst [vmem:[#allocation46_spill] sm:$0xff] %v3347_v32  ;;  %v1378_v26 = vadd.f32 %v1250_v45, %v1034_v33  ;;  %v1379_v24 = vadd.f32 %v1251_v2, %v1035_v58  ;;  %v3410_v58 = vmul.f32 %v3085_v42, %v3361_v47  ;;  %v1254_v33 = vmul.f32 %v3347_v32, %v3352_v1  ;;  %v3442_v45 = vpop.permute.xlu2 %751 }
 0x11a   : > { %5100 = vst [vmem:[#allocation6_spill] sm:$0xff] %v3350_v20  ;;  %v1039_v2 = vadd.f32 %v911_v59, %v695_v49  ;;  %v883_v60 = vmul.f32 %v2674_v9, %v3442_v45  ;;  %v884_v46 = vmul.f32 %v2681_v57, %v3442_v45  ;;  %v885_v35 = vmul.f32 %v2702_v16, %v3442_v45 }
 0x11b   : > { %5102 = vst [vmem:[#allocation48_spill] sm:$0xff] %v3355_v4  ;;  %v909_v4 = vmul.f32 %v2702_v16, %v3350_v20 }
 0x11c   : > { %5104 = vst [vmem:[#allocation121_spill] sm:$0xff] %v3361_v47  ;;  %v1012_v61 = vadd.f32 %v884_v46, %v5116_v18 }
 0x11d   : > { %v1037_v51 = vadd.f32 %v909_v4, %v5107_v13  ;;  %5108 = vst [vmem:[#allocation91_spill] sm:$0xff] %v3387_v22  ;;  %v3400_v13 = vadd.f32 %v568_v15, %v2546_v41  ;;  %v3402_v4 = vadd.f32 %v1594_v25, %v1378_v26  ;;  %v3420_v26 = vadd.f32 %v1595_v6, %v1379_v24  ;;  %v3431_v15 = vpop.permute.xlu1 %1111 }
 0x11e   : > { %5110 = vst [vmem:[#allocation94_spill] sm:$0xff] %v3395_v40  ;;  %v3424_v25 = vmul.f32 %v3123_v37, %v3361_v47  ;;  %v1038_v6 = vadd.f32 %v910_v50, %v3219_v17  ;;  %v1258_v31 = vmul.f32 %v3076_v21, %v3431_v15  ;;  %v1259_v0 = vmul.f32 %v3085_v42, %v3431_v15 }
 0x11f   : > { %v1381_v10 = vadd.f32 %v1253_v62, %v1037_v51  ;;  %v5111_v51 = vmov 0   ;;  %v3418_v62 = vpop.permute.xlu0 %1095  ;;  %5113 = vst [vmem:[#allocation122_spill] sm:$0xff] %v3442_v45  ;;  %v1260_v17 = vmul.f32 %v3103_v27, %v3431_v15  ;;  %v1261_v49 = vmul.f32 %v3123_v37, %v3431_v15 }
 0x120   : > { %2229 = vset.pattern.permute.xlu2 %v5111_v51  ;;  %5112 = vst [vmem:[#allocation97_spill] sm:$0xff] %v3418_v62  ;;  %v1226_v5 = vmul.f32 %v3076_v21, %v3418_v62  ;;  %v5115_v51 = vld [vmem:[#allocation84_spill] sm:$0xff]  ;;  %v1227_v43 = vmul.f32 %v3085_v42, %v3418_v62  ;;  %v1228_v47 = vmul.f32 %v3103_v27, %v3418_v62 }
 0x121   : > { %v3437_v24 = vadd.f32 %v3311_v48, %v1381_v10  ;;  %v882_v48 = vmul.f32 %v2672_v8, %v3442_v45  ;;  %v5114_v10 = vld [vmem:[#allocation83_spill] sm:$0xff]  ;;  %v1011_v39 = vadd.f32 %v883_v60, %v5115_v51  ;;  %v1262_v63 = vmul.f32 %v3347_v32, %v3431_v15 }
 0x122   : > { %v1387_v60 = vadd.f32 %v1259_v0, %v3147_v11  ;;  %v1389_v50 = vadd.f32 %v1261_v49, %v3158_v44  ;;  %v1229_v18 = vmul.f32 %v3123_v37, %v3418_v62  ;;  %v1382_v46 = vadd.f32 %v1254_v33, %v1038_v6  ;;  %v5124_v62 = vld [vmem:[#allocation59_spill] sm:$0xff] }
 0x123   : > { %v1010_v59 = vadd.f32 %v882_v48, %v5114_v10  ;;  %v1386_v48 = vadd.f32 %v1258_v31, %v3145_v19  ;;  %v1388_v10 = vadd.f32 %v1260_v17, %v3156_v38  ;;  %v1383_v45 = vadd.f32 %v1255_v28, %v1039_v2  ;;  %v5119_v31 = vld [vmem:[#allocation86_spill] sm:$0xff]  ;;  %v5121_v17 = vld [vmem:[#allocation55_spill] sm:$0xff] }
 0x124   : > { %v3488_v32 = vadd.f32 %v1227_v43, %v1011_v39  ;;  %v3490_v19 = vadd.f32 %v1228_v47, %v1012_v61  ;;  %v1263_v11 = vmul.f32 %v3387_v22, %v3431_v15  ;;  %v1013_v0 = vadd.f32 %v885_v35, %v5119_v31  ;;  %v3504_v43 = vpop.permute.xlu2 %1091  ;;  %v5123_v31 = vld [vmem:[#allocation58_spill] sm:$0xff] }
 0x125   : > { %v3486_v56 = vadd.f32 %v1226_v5, %v1010_v59  ;;  %v3494_v38 = vpop.permute.xlu1 %759  ;;  %v3502_v28 = vadd.f32 %v1262_v63, %v3289_v34  ;;  %5120 = vst [vmem:[#allocation85_spill] sm:$0xff] %v3504_v43  ;;  %v3519_v34 = vadd.f32 %v3330_v55, %v1382_v46  ;;  %v3521_v2 = vadd.f32 %v1599_v30, %v1383_v45  ;;  %v5122_v5 = vld [vmem:[#allocation57_spill] sm:$0xff] }
 0x126   : > { %5118 = vst [vmem:[#allocation84_spill] sm:$0xff] %v3494_v38  ;;  %v898_v61 = vmul.f32 %v2672_v8, %v3494_v38  ;;  %v899_v47 = vmul.f32 %v2674_v9, %v3494_v38  ;;  %v900_v35 = vmul.f32 %v2681_v57, %v3494_v38  ;;  %v901_v6 = vmul.f32 %v2702_v16, %v3494_v38  ;;  %v5125_v46 = vld [vmem:[#allocation77_spill] sm:$0xff] }
 0x127   : > { %v3481_v41 = vpop.permute.xlu0 %1063  ;;  %v3529_v38 = vmul.f32 %v3076_v21, %v3504_v43  ;;  %v3535_v55 = vadd.f32 %v1229_v18, %v1013_v0  ;;  %v3538_v30 = vadd.f32 %v1263_v11, %v3381_v53  ;;  %v3542_v45 = vmul.f32 %v3103_v27, %v3504_v43  ;;  %v5129_v11 = vld [vmem:[#allocation79_spill] sm:$0xff] }
 0x128   : > { %5117 = vst [vmem:[#allocation83_spill] sm:$0xff] %v3481_v41  ;;  %v1162_v44 = vmul.f32 %v3076_v21, %v3481_v41  ;;  %v1163_v33 = vmul.f32 %v3085_v42, %v3481_v41  ;;  %v1164_v39 = vmul.f32 %v3103_v27, %v3481_v41  ;;  %v1165_v63 = vmul.f32 %v3123_v37, %v3481_v41 }
 0x129   : > { %v1026_v49 = vadd.f32 %v898_v61, %v5121_v17  ;;  %v1027_v59 = vadd.f32 %v899_v47, %v5122_v5  ;;  %v1028_v51 = vadd.f32 %v900_v35, %v5123_v31  ;;  %v1029_v22 = vadd.f32 %v901_v6, %v5124_v62  ;;  %v5127_v47 = vld [vmem:[#allocation78_spill] sm:$0xff]  ;;  %v5131_v6 = vld [vmem:[#allocation80_spill] sm:$0xff] }
 0x12a   : > { %v3533_v41 = vmul.f32 %v3085_v42, %v3504_v43  ;;  %v3546_v62 = vmul.f32 %v3123_v37, %v3504_v43  ;;  %v3549_v61 = vadd.f32 %v1162_v44, %v5125_v46  ;;  %v3552_v35 = vadd.f32 %v1163_v33, %v5127_v47  ;;  %v5135_v31 = vld [vmem:[#allocation98_spill] sm:$0xff] }
 0x12b   : > { %v3555_v18 = vadd.f32 %v3406_v23, %v1026_v49  ;;  %v3558_v53 = vadd.f32 %v3410_v58, %v1027_v59  ;;  %v3561_v0 = vadd.f32 %v1164_v39, %v5129_v11  ;;  %v3564_v17 = vadd.f32 %v1165_v63, %v5131_v6  ;;  %v5134_v63 = vld [vmem:[#allocation96_spill] sm:$0xff]  ;;  %v5137_v46 = vld [vmem:[#allocation30_spill] sm:$0xff]  ;;  %v5138_v11 = vld [vmem:[#allocation81_spill] sm:$0xff] }
 0x12c   : > { %5126 = vst [vmem:[#allocation86_spill] sm:$0xff] %v3549_v61  ;;  %v3569_v44 = vadd.f32 %v3414_v14, %v1028_v51  ;;  %v3572_v33 = vadd.f32 %v3424_v25, %v1029_v22  ;;  %v912_v22 = vmul.f32 %v5109_v54, %v3350_v20  ;;  %v3590_v25 = vadd.f32 %v3391_v7, %v3448_v52  ;;  %v5139_v6 = vld [vmem:[#allocation65_spill] sm:$0xff]  ;;  %v3597_v23 = vpop.permute.xlu2 %1439  ;;  %v5142_v7 = vld [vmem:[#allocation116_spill] sm:$0xff] }
 0x12d   : > { %5128 = vst [vmem:[#allocation55_spill] sm:$0xff] %v3552_v35  ;;  %v3584_v51 = vpop.permute.xlu1 %1099  ;;  %v1120_v47 = vperm.slane %v5137_v46, 2  ;;  %v3595_v49 = vmul.f32 %v5139_v6, %v5138_v11  ;;  %v3609_v11 = vmul.f32 %v5139_v6, %v3007_v3  ;;  %v5144_v3 = vmax.f32 %v3402_v4, 0.0 }
 0x12e   : > { %5130 = vst [vmem:[#allocation57_spill] sm:$0xff] %v3561_v0  ;;  %v1234_v61 = vmul.f32 %v3076_v21, %v3584_v51  ;;  %v1235_v54 = vmul.f32 %v3085_v42, %v3584_v51 }
 0x12f   : > { %5132 = vst [vmem:[#allocation58_spill] sm:$0xff] %v3564_v17  ;;  %v3566_v5 = vpop.permute.xlu0 %1455 }
 0x130   : > { %5133 = vst [vmem:[#allocation59_spill] sm:$0xff] %v3566_v5  ;;  %v1602_v58 = vmul.f32 %v3083_v36, %v3566_v5  ;;  %v1603_v39 = vmul.f32 %v3093_v29, %v3566_v5  ;;  %v1604_v59 = vmul.f32 %v5134_v63, %v3566_v5  ;;  %v1605_v14 = vmul.f32 %v5135_v31, %v3566_v5 }
 0x131   : > { %5136 = vst [vmem:[#allocation77_spill] sm:$0xff] %v3584_v51  ;;  %v3605_v52 = vmul.f32 %v5142_v7, %v3566_v5 }
 0x132   : > { %5140 = vst [vmem:[#allocation78_spill] sm:$0xff] %v3595_v49  ;;  %v1730_v43 = vadd.f32 %v1602_v58, %v1386_v48  ;;  %v1731_v17 = vadd.f32 %v1603_v39, %v1387_v60  ;;  %v1732_v0 = vadd.f32 %v1604_v59, %v1388_v10  ;;  %v1733_v35 = vadd.f32 %v1605_v14, %v1389_v50 }
 0x133   : > { %5141 = vst [vmem:[#allocation79_spill] sm:$0xff] %v3597_v23  ;;  %v1236_v50 = vmul.f32 %v3103_v27, %v3584_v51  ;;  %v1237_v10 = vmul.f32 %v3123_v37, %v3584_v51  ;;  %v3617_v58 = vmul.f32 %v3395_v40, %v3566_v5  ;;  %v3620_v39 = vadd.f32 %v912_v22, %v3400_v13  ;;  %v5149_v51 = vld [vmem:[#allocation111_spill] sm:$0xff] }
 0x134   : > { %5143 = vst [vmem:[#allocation80_spill] sm:$0xff] %v3609_v11  ;;  %v1858_v20 = vmax.f32 %v1730_v43, 0.0  ;;  %v1859_v49 = vmax.f32 %v1731_v17, 0.0  ;;  %v1860_v48 = vmax.f32 %v1732_v0, 0.0  ;;  %v1861_v60 = vmax.f32 %v1733_v35, 0.0  ;;  %v5150_v11 = vld [vmem:[#allocation112_spill] sm:$0xff] }
 0x135   : > { %v5145_v43 = vmax.f32 %v3420_v26, 0.0  ;;  %v5146_v35 = vmax.f32 %v3434_v12, 0.0  ;;  %v5147_v14 = vmax.f32 %v3437_v24, 0.0  ;;  %v1362_v40 = vadd.f32 %v1234_v61, %v5149_v51 }
 0x136   : > { %v1923_v59 = vpack.c.bf16 %v1858_v20, %v5144_v3  ;;  %v1363_v5 = vadd.f32 %v1235_v54, %v5150_v11  ;;  %v1570_v13 = vmul.f32 %v3083_v36, %v3597_v23  ;;  %v1571_v20 = vmul.f32 %v3093_v29, %v3597_v23  ;;  %v5151_v54 = vld [vmem:[#allocation113_spill] sm:$0xff]  ;;  %v3652_v11 = vpop.permute.xlu1 %747 }
 0x137   : > { %v1924_v0 = vpack.c.bf16 %v1859_v49, %v5145_v43  ;;  %v1925_v17 = vpack.c.bf16 %v1860_v48, %v5146_v35  ;;  %v1926_v6 = vpack.c.bf16 %v1861_v60, %v5147_v14  ;;  %v3630_v7 = vpop.permute.xlu0 %1443  ;;  %v1464_v24 = vperm.slane %v5137_v46, 3  ;;  %5153 = vst [vmem:[#allocation30_spill] sm:$0xff] %v3652_v11  ;;  %v5154_v60 = vld [vmem:[#allocation114_spill] sm:$0xff]  ;;  %v3680_v35 = vld [vmem:[%s2579_s9 + $0x18] sm:$0xff] }
 0x138   : > { %5148 = vst [vmem:[#allocation96_spill] sm:$0xff] %v3630_v7  ;;  %1937 = vmatpush.bf16.msra.mxu0 %v1923_v59  ;;  %v1578_v4 = vmul.f32 %v3083_v36, %v3630_v7  ;;  %v1579_v26 = vmul.f32 %v3093_v29, %v3630_v7  ;;  %v1580_v12 = vmul.f32 %v5134_v63, %v3630_v7  ;;  %v3650_v22 = vperm.slane %v1120_v47, 2 }
 0x139   : > { %1950 = vmatpush.bf16.msra.mxu1 %v1924_v0  ;;  %1963 = vmatpush.bf16.msra.mxu2 %v1925_v17  ;;  %v1364_v61 = vadd.f32 %v1236_v50, %v5151_v54  ;;  %v1581_v49 = vmul.f32 %v5135_v31, %v3630_v7  ;;  %v1572_v51 = vmul.f32 %v5134_v63, %v3597_v23  ;;  %v3662_v50 = vpop.permute.xlu2 %1087  ;;  %v5157_v17 = vld [vmem:[#allocation47_spill] sm:$0xff] }
 0x13a   : > { %1976 = vmatpush.bf16.msra.mxu3 %v1926_v6  ;;  %5152 = vst [vmem:[#allocation98_spill] sm:$0xff] %v3650_v22  ;;  %v3654_v48 = vadd.f32 %v1578_v4, %v1362_v40  ;;  %v1365_v3 = vadd.f32 %v1237_v10, %v5154_v60  ;;  %v3658_v46 = vadd.f32 %v1570_v13, %v3486_v56  ;;  %v3677_v10 = vperm.slane %v1464_v24, 3  ;;  %v5158_v13 = vld [vmem:[#allocation51_spill] sm:$0xff]  ;;  %v5161_v60 = vld [vmem:[#allocation54_spill] sm:$0xff] }
 0x13b   : > { %v1573_v6 = vmul.f32 %v5135_v31, %v3597_v23  ;;  %5155 = vst [vmem:[#allocation81_spill] sm:$0xff] %v3662_v50  ;;  %v3664_v59 = vadd.f32 %v1579_v26, %v1363_v5  ;;  %v3666_v43 = vadd.f32 %v1580_v12, %v1364_v61  ;;  %v874_v47 = vmul.f32 %v2672_v8, %v3652_v11 }
 0x13c   : > { %v875_v40 = vmul.f32 %v2674_v9, %v3652_v11  ;;  %v3672_v0 = vadd.f32 %v1581_v49, %v1365_v3  ;;  %v3675_v56 = vadd.f32 %v1571_v20, %v3488_v32  ;;  %5156 = vst [vmem:[#allocation111_spill] sm:$0xff] %v3677_v10  ;;  %v876_v8 = vmul.f32 %v2681_v57, %v3652_v11  ;;  %v5160_v57 = vld [vmem:[#allocation52_spill] sm:$0xff] }
 0x13d   : > { %v1002_v14 = vadd.f32 %v874_v47, %v5157_v17  ;;  %v3688_v9 = vadd.f32 %v1572_v51, %v3490_v19  ;;  %v1834_v26 = vmax.f32 %v3654_v48, 0.0  ;;  %v877_v20 = vmul.f32 %v2702_v16, %v3652_v11  ;;  %v5162_v47 = vld [vmem:[#allocation117_spill] sm:$0xff]  ;;  %v5168_v11 = vld [vmem:[#allocation120_spill] sm:$0xff] }
 0x13e   : > { %v1003_v4 = vadd.f32 %v875_v40, %v5158_v13  ;;  %v1210_v12 = vmul.f32 %v3076_v21, %v3662_v50  ;;  %v1835_v24 = vmax.f32 %v3664_v59, 0.0  ;;  %v1836_v54 = vmax.f32 %v3666_v43, 0.0  ;;  %v5163_v13 = vld [vmem:[#allocation118_spill] sm:$0xff] }
 0x13f   : > { %v3698_v61 = vpop.permute.xlu0 %1427  ;;  %v1004_v49 = vadd.f32 %v876_v8, %v5160_v57  ;;  %v1211_v19 = vmul.f32 %v3085_v42, %v3662_v50  ;;  %v1837_v51 = vmax.f32 %v3672_v0, 0.0  ;;  %v1005_v16 = vadd.f32 %v877_v20, %v5161_v60 }
 0x140   : > { %5159 = vst [vmem:[#allocation112_spill] sm:$0xff] %v3698_v61  ;;  %v3707_v3 = vadd.f32 %v1573_v6, %v3535_v55  ;;  %v1346_v59 = vadd.f32 %v3529_v38, %v1002_v14  ;;  %v1347_v43 = vadd.f32 %v3533_v41, %v1003_v4  ;;  %v3712_v40 = vadd.f32 %v1210_v12, %v5162_v47  ;;  %v3728_v41 = vpop.permute.xlu1 %1447 }
 0x141   : > { %v3716_v17 = vmul.f32 %v3083_v36, %v3698_v61  ;;  %v1348_v0 = vadd.f32 %v3542_v45, %v1004_v49  ;;  %v3720_v8 = vadd.f32 %v1211_v19, %v5163_v13  ;;  %v3724_v55 = vmul.f32 %v3093_v29, %v3698_v61  ;;  %5164 = vst [vmem:[#allocation113_spill] sm:$0xff] %v3728_v41  ;;  %v3730_v6 = vpop.permute.xlu2 %1075 }
 0x142   : > { %v1212_v38 = vmul.f32 %v3103_v27, %v3662_v50  ;;  %5165 = vst [vmem:[#allocation114_spill] sm:$0xff] %v3730_v6  ;;  %v1349_v14 = vadd.f32 %v3546_v62, %v1005_v16  ;;  %v3735_v4 = vmul.f32 %v5134_v63, %v3698_v61  ;;  %v1213_v45 = vmul.f32 %v3123_v37, %v3662_v50  ;;  %v5167_v50 = vld [vmem:[#allocation119_spill] sm:$0xff] }
 0x143   : > { %v3741_v20 = vmul.f32 %v5135_v31, %v3698_v61  ;;  %v1586_v12 = vmul.f32 %v3083_v36, %v3728_v41  ;;  %v1587_v57 = vmul.f32 %v3093_v29, %v3728_v41  ;;  %v1588_v62 = vmul.f32 %v5134_v63, %v3728_v41 }
 0x144   : > { %v1589_v49 = vmul.f32 %v5135_v31, %v3728_v41  ;;  %v1186_v19 = vmul.f32 %v3076_v21, %v3730_v6  ;;  %v1187_v60 = vmul.f32 %v3085_v42, %v3730_v6  ;;  %v1734_v16 = vadd.f32 %v3605_v52, %v3502_v28 }
 0x145   : > { %v1735_v47 = vadd.f32 %v3617_v58, %v3538_v30  ;;  %v1714_v13 = vadd.f32 %v1586_v12, %v3555_v18  ;;  %v1715_v5 = vadd.f32 %v1587_v57, %v3558_v53  ;;  %v1716_v48 = vadd.f32 %v1588_v62, %v3569_v44  ;;  %v5170_v58 = vld [vmem:[#allocation7_spill] sm:$0xff]  ;;  %v5171_v12 = vld [vmem:[#allocation64_spill] sm:$0xff] }
 0x146   : > { %v1717_v32 = vadd.f32 %v1589_v49, %v3572_v33  ;;  %v3766_v23 = vadd.f32 %v1212_v38, %v5167_v50  ;;  %v3769_v41 = vadd.f32 %v1213_v45, %v5168_v11  ;;  %v1188_v28 = vmul.f32 %v3103_v27, %v3730_v6 }
 0x147   : > { %v3763_v61 = vpop.permute.xlu0 %1423  ;;  %v1256_v30 = vmul.f32 %v3650_v22, %v3352_v1  ;;  %v1842_v18 = vmax.f32 %v1714_v13, 0.0  ;;  %v1843_v53 = vmax.f32 %v1715_v5, 0.0  ;;  %v1844_v52 = vmax.f32 %v1716_v48, 0.0 }
 0x148   : > { %5166 = vst [vmem:[#allocation47_spill] sm:$0xff] %v3763_v61  ;;  %v1845_v44 = vmax.f32 %v1717_v32, 0.0  ;;  %v1314_v33 = vadd.f32 %v1186_v19, %v5170_v58  ;;  %v1315_v57 = vadd.f32 %v1187_v60, %v5171_v12  ;;  %v1862_v62 = vmax.f32 %v1734_v16, 0.0  ;;  %v3777_v7 = vpop.permute.xlu1 %1435 }
 0x149   : > { %5169 = vst [vmem:[#allocation51_spill] sm:$0xff] %v3769_v41  ;;  %v1863_v50 = vmax.f32 %v1735_v47, 0.0  ;;  %v1915_v38 = vpack.c.bf16 %v1842_v18, %v1834_v26  ;;  %v1916_v49 = vpack.c.bf16 %v1843_v53, %v1835_v24  ;;  %v1917_v11 = vpack.c.bf16 %v1844_v52, %v1836_v54  ;;  %v3791_v26 = vpop.permute.xlu2 %1419 }
 0x14a   : > { %v1918_v45 = vpack.c.bf16 %v1845_v44, %v1837_v51  ;;  %5172 = vst [vmem:[#allocation52_spill] sm:$0xff] %v3777_v7  ;;  %v1189_v41 = vmul.f32 %v3123_v37, %v3730_v6  ;;  %v5173_v13 = vmax.f32 %v3519_v34, 0.0  ;;  %v5175_v32 = vmax.f32 %v3521_v2, 0.0 }
 0x14b   : > { %v1264_v19 = vmul.f32 %v3650_v22, %v3431_v15  ;;  %1938 = vmatpush.bf16.msra.mxu0 %v1915_v38  ;;  %1951 = vmatpush.bf16.msra.mxu1 %v1916_v49  ;;  %5177 = vst [vmem:[#allocation118_spill] sm:$0xff] %v3791_v26  ;;  %v1562_v24 = vmul.f32 %v3083_v36, %v3777_v7  ;;  %v1828_v2 = vmax.f32 %v3688_v9, 0.0  ;;  %v1829_v60 = vmax.f32 %v3707_v3, 0.0  ;;  %v5180_v3 = vld [vmem:[#allocation67_spill] sm:$0xff] }
 0x14c   : > { %v3783_v5 = vpack.c.bf16 %v1862_v62, %v5173_v13  ;;  %v3787_v48 = vpack.c.bf16 %v1863_v50, %v5175_v32  ;;  %v1563_v54 = vmul.f32 %v3093_v29, %v3777_v7  ;;  %v1564_v34 = vmul.f32 %v5134_v63, %v3777_v7  ;;  %1964 = vmatpush.bf16.msra.mxu2 %v1917_v11  ;;  %v5179_v62 = vld [vmem:[#allocation27_spill] sm:$0xff] }
 0x14d   : > { %1977 = vmatpush.bf16.msra.mxu3 %v1918_v45  ;;  %v1565_v51 = vmul.f32 %v5135_v31, %v3777_v7  ;;  %v1530_v16 = vmul.f32 %v3083_v36, %v3791_v26  ;;  %v1531_v47 = vmul.f32 %v3093_v29, %v3791_v26  ;;  %v1690_v18 = vadd.f32 %v1562_v24, %v1346_v59 }
 0x14e   : > { %5174 = vst [vmem:[#allocation54_spill] sm:$0xff] %v3783_v5  ;;  %v1691_v53 = vadd.f32 %v1563_v54, %v1347_v43  ;;  %v1692_v52 = vadd.f32 %v1564_v34, %v1348_v0  ;;  %v1532_v44 = vmul.f32 %v5134_v63, %v3791_v26  ;;  %v1316_v50 = vadd.f32 %v1188_v28, %v5179_v62 }
 0x14f   : > { %5176 = vst [vmem:[#allocation117_spill] sm:$0xff] %v3787_v48  ;;  %v1693_v9 = vadd.f32 %v1565_v51, %v1349_v14  ;;  %v3809_v58 = vpop.permute.xlu0 %1411  ;;  %v3811_v12 = vadd.f32 %v1530_v16, %v1314_v33  ;;  %v1317_v38 = vadd.f32 %v1189_v41, %v5180_v3  ;;  %v1818_v49 = vmax.f32 %v1690_v18, 0.0  ;;  %v5206_v48 = vld [vmem:[#allocation105_spill] sm:$0xff] }
 0x150   : > { %5178 = vst [vmem:[#allocation119_spill] sm:$0xff] %v3809_v58  ;;  %v1819_v11 = vmax.f32 %v1691_v53, 0.0  ;;  %v1820_v45 = vmax.f32 %v1692_v52, 0.0  ;;  %v3815_v13 = vadd.f32 %v1531_v47, %v1315_v57  ;;  %v3817_v43 = vadd.f32 %v1532_v44, %v1316_v50  ;;  %v5186_v50 = vld [vmem:[#allocation99_spill] sm:$0xff] }
 0x151   : > { %v1821_v59 = vmax.f32 %v1693_v9, 0.0  ;;  %v3820_v0 = vadd.f32 %v1256_v30, %v3620_v39  ;;  %v3823_v14 = vadd.f32 %v1264_v19, %v3590_v25  ;;  %v5181_v33 = vmax.f32 %v3658_v46, 0.0  ;;  %v3840_v46 = vpop.permute.xlu1 %1083  ;;  %v5193_v30 = vld [vmem:[#allocation89_spill] sm:$0xff]  ;;  %v5202_v39 = vld [vmem:[#allocation59_spill] sm:$0xff] }
 0x152   : > { %v5182_v28 = vmax.f32 %v3675_v56, 0.0  ;;  %v1909_v24 = vpack.c.bf16 %v1828_v2, %v1820_v45  ;;  %v5183_v54 = vperm.slane %v3680_v35, 5  ;;  %v3835_v51 = vmul.f32 %v3083_v36, %v3763_v61  ;;  %5184 = vst [vmem:[#allocation120_spill] sm:$0xff] %v3840_v46  ;;  %v5188_v45 = vld [vmem:[#allocation101_spill] sm:$0xff] }
 0x153   : > { %v1907_v32 = vpack.c.bf16 %v5181_v33, %v1818_v49  ;;  %v1910_v34 = vpack.c.bf16 %v1829_v60, %v1821_v59  ;;  %v1533_v25 = vmul.f32 %v5135_v31, %v3791_v26  ;;  %v3844_v56 = vmul.f32 %v3093_v29, %v3763_v61  ;;  %v3855_v60 = vpop.permute.xlu2 %1071  ;;  %v5187_v49 = vld [vmem:[#allocation100_spill] sm:$0xff] }
 0x154   : > { %v1908_v41 = vpack.c.bf16 %v5182_v28, %v1819_v11  ;;  %v3831_v57 = vperm.slane %v5183_v54, 1  ;;  %v3849_v19 = vmul.f32 %v5134_v63, %v3763_v61  ;;  %v3853_v2 = vmul.f32 %v5135_v31, %v3763_v61  ;;  %1965 = vmatpush.bf16.msra.mxu2 %v1909_v24  ;;  %5185 = vst [vmem:[#allocation7_spill] sm:$0xff] %v3855_v60 }
 0x155   : > { %1939 = vmatpush.bf16.msra.mxu0 %v1907_v32  ;;  %1978 = vmatpush.bf16.msra.mxu3 %v1910_v34  ;;  %v1202_v16 = vmul.f32 %v3076_v21, %v3840_v46  ;;  %v1203_v47 = vmul.f32 %v3085_v42, %v3840_v46  ;;  %v1204_v18 = vmul.f32 %v3103_v27, %v3840_v46  ;;  %v5189_v32 = vld [vmem:[#allocation104_spill] sm:$0xff] }
 0x156   : > { %1952 = vmatpush.bf16.msra.mxu1 %v1908_v41  ;;  %v1205_v52 = vmul.f32 %v3123_v37, %v3840_v46  ;;  %v3866_v44 = vadd.f32 %v1533_v25, %v1317_v38  ;;  %v1178_v9 = vmul.f32 %v3076_v21, %v3855_v60  ;;  %v1179_v62 = vmul.f32 %v3085_v42, %v3855_v60 }
 0x157   : > { %v1330_v3 = vadd.f32 %v1202_v16, %v5186_v50  ;;  %v1331_v11 = vadd.f32 %v1203_v47, %v5187_v49  ;;  %v1332_v59 = vadd.f32 %v1204_v18, %v5188_v45  ;;  %v1180_v33 = vmul.f32 %v3103_v27, %v3855_v60  ;;  %v3878_v41 = vpop.permute.xlu0 %1395  ;;  %v5192_v49 = vld [vmem:[#allocation88_spill] sm:$0xff] }
 0x158   : > { %v1333_v28 = vadd.f32 %v1205_v52, %v5189_v32  ;;  %5190 = vst [vmem:[#allocation64_spill] sm:$0xff] %v3878_v41  ;;  %v3882_v38 = vmul.f32 %v3083_v36, %v3809_v58  ;;  %v3886_v24 = vmul.f32 %v3093_v29, %v3809_v58  ;;  %v3890_v54 = vmul.f32 %v5134_v63, %v3809_v58  ;;  %v5191_v52 = vld [vmem:[#allocation87_spill] sm:$0xff] }
 0x159   : > { %v1674_v34 = vadd.f32 %v3716_v17, %v1330_v3  ;;  %v1675_v25 = vadd.f32 %v3724_v55, %v1331_v11  ;;  %v1676_v16 = vadd.f32 %v3735_v4, %v1332_v59  ;;  %v3898_v50 = vadd.f32 %v1178_v9, %v5191_v52  ;;  %v3920_v11 = vpop.permute.xlu1 %1431 }
 0x15a   : > { %v1677_v18 = vadd.f32 %v3741_v20, %v1333_v28  ;;  %v3901_v45 = vadd.f32 %v1179_v62, %v5192_v49  ;;  %v1181_v32 = vmul.f32 %v3123_v37, %v3855_v60  ;;  %v3906_v17 = vadd.f32 %v1180_v33, %v5193_v30  ;;  %5196 = vst [vmem:[#allocation99_spill] sm:$0xff] %v3920_v11  ;;  %v5198_v30 = vld [vmem:[#allocation90_spill] sm:$0xff] }
 0x15b   : > { %v1802_v53 = vmax.f32 %v1674_v34, 0.0  ;;  %v3910_v55 = vmul.f32 %v5135_v31, %v3809_v58  ;;  %v3914_v4 = vmul.f32 %v3083_v36, %v3878_v41  ;;  %v1803_v20 = vmax.f32 %v1675_v25, 0.0  ;;  %v3922_v59 = vpop.permute.xlu2 %1059  ;;  %v5201_v25 = vld [vmem:[#allocation115_spill] sm:$0xff]  ;;  %v5203_v58 = vld [vmem:[#allocation14_spill] sm:$0xff] }
 0x15c   : > { %v1804_v9 = vmax.f32 %v1676_v16, 0.0  ;;  %v1805_v3 = vmax.f32 %v1677_v18, 0.0  ;;  %v3918_v62 = vmul.f32 %v3093_v29, %v3878_v41  ;;  %5197 = vst [vmem:[#allocation100_spill] sm:$0xff] %v3922_v59  ;;  %v3925_v33 = vadd.f32 %v1181_v32, %v5198_v30  ;;  %v5204_v60 = vld [vmem:[#allocation78_spill] sm:$0xff] }
 0x15d   : > { %5194 = vst [vmem:[#allocation27_spill] sm:$0xff] %v3914_v4  ;;  %v3929_v28 = vmul.f32 %v5134_v63, %v3878_v41  ;;  %v3933_v34 = vmul.f32 %v5135_v31, %v3878_v41  ;;  %v1600_v16 = vmul.f32 %v3677_v10, %v5201_v25  ;;  %v1554_v18 = vmul.f32 %v3083_v36, %v3920_v11 }
 0x15e   : > { %5195 = vst [vmem:[#allocation67_spill] sm:$0xff] %v3918_v62  ;;  %v1555_v52 = vmul.f32 %v3093_v29, %v3920_v11  ;;  %v1556_v49 = vmul.f32 %v5134_v63, %v3920_v11  ;;  %v1557_v32 = vmul.f32 %v5135_v31, %v3920_v11  ;;  %v1154_v30 = vmul.f32 %v3076_v21, %v3922_v59  ;;  %v5205_v11 = vld [vmem:[#allocation51_spill] sm:$0xff] }
 0x15f   : > { %5199 = vst [vmem:[#allocation101_spill] sm:$0xff] %v3929_v28  ;;  %v1155_v47 = vmul.f32 %v3085_v42, %v3922_v59  ;;  %v1608_v41 = vmul.f32 %v3677_v10, %v5202_v39  ;;  %v3953_v61 = vadd.f32 %v5204_v60, %v5203_v58  ;;  %v1682_v26 = vadd.f32 %v1554_v18, %v3712_v40  ;;  %v5209_v58 = vld [vmem:[#allocation80_spill] sm:$0xff] }
 0x160   : > { %5200 = vst [vmem:[#allocation104_spill] sm:$0xff] %v3933_v34  ;;  %v1683_v6 = vadd.f32 %v1555_v52, %v3720_v8  ;;  %v1684_v46 = vadd.f32 %v1556_v49, %v3766_v23  ;;  %v1685_v7 = vadd.f32 %v1557_v32, %v5205_v11  ;;  %v3960_v5 = vadd.f32 %v1154_v30, %v5206_v48  ;;  %v5208_v34 = vld [vmem:[#allocation28_spill] sm:$0xff]  ;;  %v5210_v52 = vld [vmem:[#allocation106_spill] sm:$0xff]  ;;  %v5211_v49 = vld [vmem:[#allocation93_spill] sm:$0xff] }
 0x161   : > { %v1156_v22 = vmul.f32 %v3103_v27, %v3922_v59  ;;  %v1157_v10 = vmul.f32 %v3123_v37, %v3922_v59  ;;  %v705_v60 = vadd.f32 %v5209_v58, %v5208_v34  ;;  %v1810_v28 = vmax.f32 %v1682_v26, 0.0 }
 0x162   : > { %5207 = vst [vmem:[#allocation87_spill] sm:$0xff] %v3960_v5  ;;  %v1811_v40 = vmax.f32 %v1683_v6, 0.0  ;;  %v1812_v18 = vmax.f32 %v1684_v46, 0.0  ;;  %v1813_v8 = vmax.f32 %v1685_v7, 0.0  ;;  %v3969_v23 = vadd.f32 %v1155_v47, %v5210_v52  ;;  %v5212_v5 = vld [vmem:[#allocation108_spill] sm:$0xff]  ;;  %v5213_v6 = vld [vmem:[#allocation109_spill] sm:$0xff] }
 0x163   : > { %v1728_v11 = vadd.f32 %v1600_v16, %v3820_v0  ;;  %v1736_v48 = vadd.f32 %v1608_v41, %v3823_v14  ;;  %v921_v32 = vmul.f32 %v3831_v57, %v5211_v49  ;;  %v1899_v30 = vpack.c.bf16 %v1810_v28, %v1802_v53  ;;  %v5214_v46 = vld [vmem:[#allocation72_spill] sm:$0xff]  ;;  %v5215_v47 = vld [vmem:[#allocation31_spill] sm:$0xff]  ;;  %v3983_v0 = vpop.permute.xlu1 %1079  ;;  %v3985_v14 = vpop.permute.xlu2 %1407  ;;  %v5218_v41 = vld [vmem:[#allocation6_spill] sm:$0xff] }
 0x164   : > { %v1900_v62 = vpack.c.bf16 %v1811_v40, %v1803_v20  ;;  %v1901_v59 = vpack.c.bf16 %v1812_v18, %v1804_v9  ;;  %v1902_v4 = vpack.c.bf16 %v1813_v8, %v1805_v3  ;;  %v3976_v34 = vadd.f32 %v1156_v22, %v5212_v5  ;;  %5216 = vst [vmem:[#allocation88_spill] sm:$0xff] %v3983_v0  ;;  %v5220_v18 = vld [vmem:[#allocation44_spill] sm:$0xff]  ;;  %v5221_v52 = vld [vmem:[#allocation45_spill] sm:$0xff] }
 0x165   : > { %v3979_v26 = vadd.f32 %v1157_v10, %v5213_v6  ;;  %v1856_v7 = vmax.f32 %v1728_v11, 0.0  ;;  %v550_v58 = vmul.f32 %v5215_v47, %v5214_v46  ;;  %1940 = vmatpush.bf16.msra.mxu0 %v1899_v30  ;;  %5217 = vst [vmem:[#allocation89_spill] sm:$0xff] %v3985_v14  ;;  %v1864_v53 = vmax.f32 %v1736_v48, 0.0  ;;  %v5222_v48 = vld [vmem:[#allocation48_spill] sm:$0xff] }
 0x166   : > { %1953 = vmatpush.bf16.msra.mxu1 %v1900_v62  ;;  %v913_v20 = vmul.f32 %v3831_v57, %v5218_v41  ;;  %v3989_v9 = vadd.f32 %v921_v32, %v705_v60  ;;  %v1121_v22 = vperm.slane %v3680_v35, 6  ;;  %1966 = vmatpush.bf16.msra.mxu2 %v1901_v59  ;;  %v1194_v10 = vmul.f32 %v3076_v21, %v3983_v0  ;;  %v5219_v60 = vld [vmem:[#allocation5_spill] sm:$0xff]  ;;  %v5223_v32 = vld [vmem:[#allocation86_spill] sm:$0xff] }
 0x167   : > { %1979 = vmatpush.bf16.msra.mxu3 %v1902_v4  ;;  %v1195_v5 = vmul.f32 %v3085_v42, %v3983_v0  ;;  %v1196_v3 = vmul.f32 %v3103_v27, %v3983_v0  ;;  %v1465_v62 = vperm.slane %v3680_v35, 7  ;;  %v1197_v28 = vmul.f32 %v3123_v37, %v3983_v0  ;;  %v5224_v41 = vld [vmem:[#allocation33_spill] sm:$0xff] }
 0x168   : > { %v1506_v16 = vmul.f32 %v3083_v36, %v3985_v14  ;;  %v1507_v4 = vmul.f32 %v3093_v29, %v3985_v14  ;;  %v1508_v59 = vmul.f32 %v5134_v63, %v3985_v14  ;;  %v1322_v40 = vadd.f32 %v1194_v10, %v5219_v60  ;;  %v5225_v60 = vld [vmem:[#allocation25_spill] sm:$0xff] }
 0x169   : > { %v1323_v8 = vadd.f32 %v1195_v5, %v5220_v18  ;;  %v1324_v11 = vadd.f32 %v1196_v3, %v5221_v52  ;;  %v1509_v35 = vmul.f32 %v5135_v31, %v3985_v14  ;;  %v1325_v49 = vadd.f32 %v1197_v28, %v5222_v48  ;;  %v5226_v52 = vld [vmem:[#allocation55_spill] sm:$0xff] }
 0x16a   : > { %v4014_v30 = vadd.f32 %v1506_v16, %v5223_v32  ;;  %v4016_v6 = vperm.slane %v1121_v22, 2  ;;  %v4020_v0 = vmul.f32 %v5215_v47, %v5224_v41  ;;  %v1666_v10 = vadd.f32 %v3835_v51, %v1322_v40  ;;  %v5227_v22 = vld [vmem:[#allocation57_spill] sm:$0xff]  ;;  %v5228_v32 = vld [vmem:[#allocation58_spill] sm:$0xff] }
 0x16b   : > { %v1667_v5 = vadd.f32 %v3844_v56, %v1323_v8  ;;  %v1668_v3 = vadd.f32 %v3849_v19, %v1324_v11  ;;  %v4026_v18 = vadd.f32 %v550_v58, %v5225_v60  ;;  %v1669_v28 = vadd.f32 %v3853_v2, %v1325_v49  ;;  %v4039_v19 = vpop.permute.xlu1 %1067 }
 0x16c   : > { %v4030_v16 = vadd.f32 %v1507_v4, %v5226_v52  ;;  %v4033_v48 = vadd.f32 %v1508_v59, %v5227_v22  ;;  %v4036_v14 = vadd.f32 %v1509_v35, %v5228_v32  ;;  %v1794_v47 = vmax.f32 %v1666_v10, 0.0  ;;  %5229 = vst [vmem:[#allocation90_spill] sm:$0xff] %v4039_v19  ;;  %v4046_v59 = vpop.permute.xlu2 %1055  ;;  %v5236_v52 = vld [vmem:[#allocation41_spill] sm:$0xff]  ;;  %v5237_v32 = vld [vmem:[#allocation42_spill] sm:$0xff] }
 0x16d   : > { %v1795_v51 = vmax.f32 %v1667_v5, 0.0  ;;  %v1796_v40 = vmax.f32 %v1668_v3, 0.0  ;;  %v1797_v58 = vmax.f32 %v1669_v28, 0.0  ;;  %v4041_v8 = vpack.c.bf16 %v1864_v53, %v1856_v7  ;;  %5230 = vst [vmem:[#allocation115_spill] sm:$0xff] %v4046_v59 }
 0x16e   : > { %v1041_v2 = vadd.f32 %v913_v20, %v3953_v61  ;;  %v1257_v4 = vmul.f32 %v4016_v6, %v3352_v1  ;;  %v5231_v11 = vmax.f32 %v3811_v12, 0.0  ;;  %v5232_v49 = vmax.f32 %v3815_v13, 0.0  ;;  %v5235_v13 = vld [vmem:[#allocation40_spill] sm:$0xff] }
 0x16f   : > { %v5233_v5 = vmax.f32 %v3817_v43, 0.0  ;;  %v1170_v7 = vmul.f32 %v3076_v21, %v4039_v19  ;;  %v5234_v53 = vmax.f32 %v3866_v44, 0.0  ;;  %v1171_v1 = vmul.f32 %v3085_v42, %v4039_v19 }
 0x170   : > { %v1891_v35 = vpack.c.bf16 %v1794_v47, %v5231_v11  ;;  %v1892_v10 = vpack.c.bf16 %v1795_v51, %v5232_v49  ;;  %v1172_v20 = vmul.f32 %v3103_v27, %v4039_v19  ;;  %v1173_v12 = vmul.f32 %v3123_v37, %v4039_v19 }
 0x171   : > { %v1893_v3 = vpack.c.bf16 %v1796_v40, %v5233_v5  ;;  %v1894_v61 = vpack.c.bf16 %v1797_v58, %v5234_v53  ;;  %v1298_v43 = vadd.f32 %v1170_v7, %v5235_v13  ;;  %v1146_v28 = vmul.f32 %v3076_v21, %v4046_v59  ;;  %v5238_v40 = vld [vmem:[#allocation43_spill] sm:$0xff] }
 0x172   : > { %1941 = vmatpush.bf16.msra.mxu0 %v1891_v35  ;;  %1954 = vmatpush.bf16.msra.mxu1 %v1892_v10  ;;  %v1147_v44 = vmul.f32 %v3085_v42, %v4046_v59  ;;  %v1299_v22 = vadd.f32 %v1171_v1, %v5236_v52  ;;  %v1300_v51 = vadd.f32 %v1172_v20, %v5237_v32  ;;  %v4078_v5 = vperm.slane %v1465_v62, 3  ;;  %v5239_v1 = vld [vmem:[#allocation110_spill] sm:$0xff] }
 0x173   : > { %1967 = vmatpush.bf16.msra.mxu2 %v1893_v3  ;;  %1980 = vmatpush.bf16.msra.mxu3 %v1894_v61  ;;  %v1301_v58 = vadd.f32 %v1173_v12, %v5238_v40  ;;  %v1642_v35 = vadd.f32 %v3882_v38, %v1298_v43  ;;  %v1148_v10 = vmul.f32 %v3103_v27, %v4046_v59  ;;  %v5240_v38 = vld [vmem:[#allocation37_spill] sm:$0xff] }
 0x174   : > { %v1643_v3 = vadd.f32 %v3886_v24, %v1299_v22  ;;  %v1644_v7 = vadd.f32 %v3890_v54, %v1300_v51  ;;  %v1149_v61 = vmul.f32 %v3123_v37, %v4046_v59  ;;  %v4086_v20 = vadd.f32 %v1146_v28, %v5239_v1  ;;  %v5241_v22 = vld [vmem:[#allocation38_spill] sm:$0xff]  ;;  %v5243_v51 = vld [vmem:[#allocation39_spill] sm:$0xff] }
 0x175   : > { %v1645_v53 = vadd.f32 %v3910_v55, %v1301_v58  ;;  %v4089_v12 = vadd.f32 %v1147_v44, %v5240_v38  ;;  %v1265_v13 = vmul.f32 %v4016_v6, %v3431_v15  ;;  %v1385_v62 = vadd.f32 %v1257_v4, %v1041_v2  ;;  %v4096_v55 = vpop.permute.xlu1 %1415  ;;  %v5244_v44 = vld [vmem:[#allocation32_spill] sm:$0xff] }
 0x176   : > { %v1770_v43 = vmax.f32 %v1642_v35, 0.0  ;;  %v1771_v52 = vmax.f32 %v1643_v3, 0.0  ;;  %v1772_v24 = vmax.f32 %v1644_v7, 0.0  ;;  %v4094_v54 = vadd.f32 %v1148_v10, %v5241_v22  ;;  %5242 = vst [vmem:[#allocation59_spill] sm:$0xff] %v4096_v55  ;;  %v5245_v7 = vld [vmem:[#allocation24_spill] sm:$0xff] }
 0x177   : > { %v1773_v32 = vmax.f32 %v1645_v53, 0.0  ;;  %v4099_v40 = vadd.f32 %v1149_v61, %v5243_v51  ;;  %v1601_v28 = vmul.f32 %v4078_v5, %v5201_v25  ;;  %v551_v58 = vmul.f32 %v5244_v44, %v5214_v46 }
 0x178   : > { %v1522_v15 = vmul.f32 %v3083_v36, %v4096_v55  ;;  %v1523_v2 = vmul.f32 %v3093_v29, %v4096_v55  ;;  %v1524_v4 = vmul.f32 %v5134_v63, %v4096_v55  ;;  %v1525_v35 = vmul.f32 %v5135_v31, %v4096_v55 }
 0x179   : > { %v1393_v10 = vadd.f32 %v1265_v13, %v3989_v9  ;;  %v1729_v3 = vadd.f32 %v1601_v28, %v1385_v62  ;;  %v686_v25 = vadd.f32 %v4020_v0, %v5245_v7  ;;  %v559_v53 = vmul.f32 %v5244_v44, %v5224_v41  ;;  %v5246_v9 = vld [vmem:[#allocation34_spill] sm:$0xff] }
 0x17a   : > { %v1650_v61 = vadd.f32 %v1522_v15, %v3898_v50  ;;  %v1651_v1 = vadd.f32 %v1523_v2, %v3901_v45  ;;  %v1652_v38 = vadd.f32 %v1524_v4, %v3906_v17  ;;  %v1653_v22 = vadd.f32 %v1525_v35, %v3925_v33  ;;  %v5247_v17 = vld [vmem:[#allocation103_spill] sm:$0xff]  ;;  %v5248_v33 = vld [vmem:[#allocation56_spill] sm:$0xff]  ;;  %v5250_v35 = vld [vmem:[#allocation77_spill] sm:$0xff] }
 0x17b   : > { %v679_v51 = vadd.f32 %v551_v58, %v5225_v60  ;;  %v687_v49 = vadd.f32 %v559_v53, %v5245_v7  ;;  %v552_v13 = vmul.f32 %v5246_v9, %v5214_v46  ;;  %v4128_v0 = vmul.f32 %v5246_v9, %v5224_v41  ;;  %v5249_v58 = vld [vmem:[#allocation84_spill] sm:$0xff]  ;;  %v5251_v53 = vld [vmem:[#allocation46_spill] sm:$0xff] }
 0x17c   : > { %v1778_v62 = vmax.f32 %v1650_v61, 0.0  ;;  %v1779_v28 = vmax.f32 %v1651_v1, 0.0  ;;  %v1780_v50 = vmax.f32 %v1652_v38, 0.0  ;;  %v1781_v15 = vmax.f32 %v1653_v22, 0.0 }
 0x17d   : > { %v1609_v45 = vmul.f32 %v4078_v5, %v5202_v39  ;;  %v894_v2 = vmul.f32 %v5248_v33, %v5247_v17  ;;  %v902_v4 = vmul.f32 %v5248_v33, %v5249_v58  ;;  %v1238_v11 = vmul.f32 %v5251_v53, %v5250_v35  ;;  %v4138_v61 = vpop.permute.xlu1 %1403  ;;  %v5252_v39 = vld [vmem:[#allocation121_spill] sm:$0xff] }
 0x17e   : > { %v1883_v47 = vpack.c.bf16 %v1778_v62, %v1770_v43  ;;  %v1884_v56 = vpack.c.bf16 %v1779_v28, %v1771_v52  ;;  %v1885_v59 = vpack.c.bf16 %v1780_v50, %v1772_v24  ;;  %v1886_v55 = vpack.c.bf16 %v1781_v15, %v1773_v32  ;;  %v5254_v50 = vld [vmem:[#allocation96_spill] sm:$0xff] }
 0x17f   : > { %v1737_v1 = vadd.f32 %v1609_v45, %v1393_v10  ;;  %v1022_v38 = vadd.f32 %v894_v2, %v4026_v18  ;;  %v1030_v22 = vadd.f32 %v902_v4, %v686_v25  ;;  %v1246_v19 = vmul.f32 %v5251_v53, %v5252_v39  ;;  %v5255_v15 = vld [vmem:[#allocation116_spill] sm:$0xff]  ;;  %v5257_v4 = vld [vmem:[#allocation63_spill] sm:$0xff] }
 0x180   : > { %1942 = vmatpush.bf16.msra.mxu0 %v1883_v47  ;;  %1955 = vmatpush.bf16.msra.mxu1 %v1884_v56  ;;  %v1498_v9 = vmul.f32 %v3083_v36, %v4138_v61  ;;  %v1499_v43 = vmul.f32 %v3093_v29, %v4138_v61  ;;  %v1500_v52 = vmul.f32 %v5134_v63, %v4138_v61  ;;  %v1857_v24 = vmax.f32 %v1729_v3, 0.0  ;;  %v5253_v47 = vld [vmem:[#allocation87_spill] sm:$0xff] }
 0x181   : > { %1968 = vmatpush.bf16.msra.mxu2 %v1885_v59  ;;  %1981 = vmatpush.bf16.msra.mxu3 %v1886_v55  ;;  %v1501_v18 = vmul.f32 %v5135_v31, %v4138_v61  ;;  %v1865_v32 = vmax.f32 %v1737_v1, 0.0  ;;  %v1366_v10 = vadd.f32 %v1238_v11, %v1022_v38  ;;  %v1374_v25 = vadd.f32 %v1246_v19, %v1030_v22  ;;  %v5256_v59 = vld [vmem:[#allocation113_spill] sm:$0xff] }
 0x182   : > { %v1626_v56 = vadd.f32 %v1498_v9, %v5253_v47  ;;  %v1627_v62 = vadd.f32 %v1499_v43, %v3969_v23  ;;  %v1628_v28 = vadd.f32 %v1500_v52, %v3976_v34  ;;  %v1582_v45 = vmul.f32 %v5255_v15, %v5254_v50 }
 0x183   : > { %v1629_v2 = vadd.f32 %v1501_v18, %v3979_v26  ;;  %v4157_v3 = vpack.c.bf16 %v1865_v32, %v1857_v24  ;;  %v1590_v55 = vmul.f32 %v5255_v15, %v5256_v59  ;;  %v895_v11 = vmul.f32 %v5257_v4, %v5247_v17 }
 0x184   : > { %v1754_v19 = vmax.f32 %v1626_v56, 0.0  ;;  %v1755_v1 = vmax.f32 %v1627_v62, 0.0  ;;  %v1756_v9 = vmax.f32 %v1628_v28, 0.0  ;;  %v1710_v38 = vadd.f32 %v1582_v45, %v1366_v10  ;;  %v5262_v45 = vld [vmem:[#allocation91_spill] sm:$0xff] }
 0x185   : > { %v1757_v23 = vmax.f32 %v1629_v2, 0.0  ;;  %v1718_v22 = vadd.f32 %v1590_v55, %v1374_v25  ;;  %v903_v34 = vmul.f32 %v5257_v4, %v5249_v58  ;;  %v680_v43 = vadd.f32 %v552_v13, %v5225_v60  ;;  %v4176_v55 = vpop.permute.xlu1 %1051 }
 0x186   : > { %v5258_v26 = vmax.f32 %v4014_v30, 0.0  ;;  %v5259_v24 = vmax.f32 %v4030_v16, 0.0  ;;  %v5260_v32 = vmax.f32 %v4033_v48, 0.0  ;;  %v1023_v56 = vadd.f32 %v895_v11, %v679_v51  ;;  %v5263_v48 = vld [vmem:[#allocation94_spill] sm:$0xff] }
 0x187   : > { %v5261_v62 = vmax.f32 %v4036_v14, 0.0  ;;  %v1846_v28 = vmax.f32 %v1718_v22, 0.0  ;;  %v1031_v25 = vadd.f32 %v903_v34, %v687_v49  ;;  %v1239_v2 = vmul.f32 %v5262_v45, %v5250_v35  ;;  %v5265_v34 = vld [vmem:[#allocation70_spill] sm:$0xff] }
 0x188   : > { %v1875_v52 = vpack.c.bf16 %v5258_v26, %v1754_v19  ;;  %v1876_v18 = vpack.c.bf16 %v5259_v24, %v1755_v1  ;;  %v1877_v47 = vpack.c.bf16 %v5260_v32, %v1756_v9  ;;  %v1838_v30 = vmax.f32 %v1710_v38, 0.0 }
 0x189   : > { %v1878_v10 = vpack.c.bf16 %v5261_v62, %v1757_v23  ;;  %v1247_v16 = vmul.f32 %v5262_v45, %v5252_v39  ;;  %v1583_v13 = vmul.f32 %v5263_v48, %v5254_v50  ;;  %v1591_v14 = vmul.f32 %v5263_v48, %v5256_v59  ;;  %v5264_v23 = vld [vmem:[#allocation69_spill] sm:$0xff]  ;;  %v5269_v62 = vld [vmem:[#allocation27_spill] sm:$0xff] }
 0x18a   : > { %1943 = vmatpush.bf16.msra.mxu0 %v1875_v52  ;;  %1956 = vmatpush.bf16.msra.mxu1 %v1876_v18  ;;  %v1138_v49 = vmul.f32 %v3076_v21, %v4176_v55  ;;  %v1139_v51 = vmul.f32 %v3085_v42, %v4176_v55  ;;  %v1140_v11 = vmul.f32 %v3103_v27, %v4176_v55  ;;  %v5266_v52 = vld [vmem:[#allocation73_spill] sm:$0xff]  ;;  %v5267_v42 = vld [vmem:[#allocation76_spill] sm:$0xff] }
 0x18b   : > { %1969 = vmatpush.bf16.msra.mxu2 %v1877_v47  ;;  %1982 = vmatpush.bf16.msra.mxu3 %v1878_v10  ;;  %v1141_v19 = vmul.f32 %v3123_v37, %v4176_v55  ;;  %v4192_v1 = vpack.c.bf16 %v1846_v28, %v1838_v30  ;;  %v1367_v9 = vadd.f32 %v1239_v2, %v1023_v56  ;;  %v5268_v47 = vld [vmem:[#allocation74_spill] sm:$0xff]  ;;  %v5270_v56 = vld [vmem:[#allocation67_spill] sm:$0xff] }
 0x18c   : > { %v1375_v38 = vadd.f32 %v1247_v16, %v1031_v25  ;;  %v1266_v22 = vadd.f32 %v1138_v49, %v5264_v23  ;;  %v1267_v26 = vadd.f32 %v1139_v51, %v5265_v34  ;;  %v1268_v24 = vadd.f32 %v1140_v11, %v5266_v52  ;;  %v5271_v25 = vld [vmem:[#allocation101_spill] sm:$0xff]  ;;  %v5272_v16 = vld [vmem:[#allocation104_spill] sm:$0xff] }
 0x18d   : > { %v688_v21 = vadd.f32 %v4128_v0, %v5245_v7  ;;  %v1269_v18 = vadd.f32 %v1141_v19, %v5267_v42  ;;  %v1711_v32 = vadd.f32 %v1583_v13, %v1367_v9  ;;  %v896_v37 = vmul.f32 %v5268_v47, %v5247_v17  ;;  %v4214_v52 = vpop.permute.xlu1 %1399 }
 0x18e   : > { %v1719_v27 = vadd.f32 %v1591_v14, %v1375_v38  ;;  %v1610_v10 = vadd.f32 %v5269_v62, %v1266_v22  ;;  %v1611_v28 = vadd.f32 %v5270_v56, %v1267_v26  ;;  %v1612_v2 = vadd.f32 %v5271_v25, %v1268_v24  ;;  %v5273_v22 = vld [vmem:[#allocation98_spill] sm:$0xff]  ;;  %v5274_v24 = vld [vmem:[#allocation111_spill] sm:$0xff] }
 0x18f   : > { %v904_v30 = vmul.f32 %v5268_v47, %v5249_v58  ;;  %v1613_v49 = vadd.f32 %v5272_v16, %v1269_v18  ;;  %v1839_v51 = vmax.f32 %v1711_v32, 0.0  ;;  %v1024_v11 = vadd.f32 %v896_v37, %v680_v43  ;;  %v5275_v18 = vld [vmem:[#allocation65_spill] sm:$0xff] }
 0x190   : > { %v1847_v0 = vmax.f32 %v1719_v27, 0.0  ;;  %v1738_v19 = vmax.f32 %v1610_v10, 0.0  ;;  %v1739_v13 = vmax.f32 %v1611_v28, 0.0  ;;  %v1740_v14 = vmax.f32 %v1612_v2, 0.0 }
 0x191   : > { %v1032_v9 = vadd.f32 %v904_v30, %v688_v21  ;;  %v1741_v38 = vmax.f32 %v1613_v49, 0.0  ;;  %v1240_v34 = vmul.f32 %v5273_v22, %v5250_v35  ;;  %v1248_v26 = vmul.f32 %v5273_v22, %v5252_v39 }
 0x192   : > { %v4208_v23 = vpack.c.bf16 %v1847_v0, %v1839_v51  ;;  %v1584_v42 = vmul.f32 %v5274_v24, %v5254_v50  ;;  %v1592_v43 = vmul.f32 %v5274_v24, %v5256_v59  ;;  %v553_v21 = vmul.f32 %v5275_v18, %v5214_v46 }
 0x193   : > { %v561_v32 = vmul.f32 %v5275_v18, %v5224_v41  ;;  %v1490_v27 = vmul.f32 %v3083_v36, %v4214_v52  ;;  %v1491_v37 = vmul.f32 %v3093_v29, %v4214_v52  ;;  %v1492_v62 = vmul.f32 %v5134_v63, %v4214_v52 }
 0x194   : > { %v1493_v10 = vmul.f32 %v5135_v31, %v4214_v52  ;;  %v1368_v56 = vadd.f32 %v1240_v34, %v1024_v11  ;;  %v1376_v28 = vadd.f32 %v1248_v26, %v1032_v9  ;;  %v681_v25 = vadd.f32 %v553_v21, %v5225_v60  ;;  %v5276_v21 = vld [vmem:[#allocation26_spill] sm:$0xff] }
 0x195   : > { %v689_v46 = vadd.f32 %v561_v32, %v5245_v7  ;;  %v1618_v41 = vadd.f32 %v1490_v27, %v4086_v20  ;;  %v1619_v2 = vadd.f32 %v1491_v37, %v4089_v12  ;;  %v1620_v36 = vadd.f32 %v1492_v62, %v4094_v54  ;;  %v5280_v37 = vld [vmem:[#allocation54_spill] sm:$0xff]  ;;  %v5282_v62 = vld [vmem:[#allocation21_spill] sm:$0xff] }
 0x196   : > { %v1621_v29 = vadd.f32 %v1493_v10, %v4099_v40  ;;  %v1712_v30 = vadd.f32 %v1584_v42, %v1368_v56  ;;  %v1720_v16 = vadd.f32 %v1592_v43, %v1376_v28  ;;  %v897_v63 = vmul.f32 %v3831_v57, %v5247_v17  ;;  %v5283_v56 = vld [vmem:[#allocation11_spill] sm:$0xff] }
 0x197   : > { %v905_v31 = vmul.f32 %v3831_v57, %v5249_v58  ;;  %v1746_v49 = vmax.f32 %v1618_v41, 0.0  ;;  %v1747_v60 = vmax.f32 %v1619_v2, 0.0  ;;  %v1748_v51 = vmax.f32 %v1620_v36, 0.0  ;;  %v5285_v36 = vld [vmem:[#allocation85_spill] sm:$0xff] }
 0x198   : > { %v1749_v7 = vmax.f32 %v1621_v29, 0.0  ;;  %v1840_v0 = vmax.f32 %v1712_v30, 0.0  ;;  %v1848_v20 = vmax.f32 %v1720_v16, 0.0  ;;  %v1025_v11 = vadd.f32 %v897_v63, %v681_v25  ;;  %v5284_v25 = vld [vmem:[#allocation122_spill] sm:$0xff]  ;;  %v5286_v63 = vld [vmem:[#allocation97_spill] sm:$0xff] }
 0x199   : > { %v1033_v12 = vadd.f32 %v905_v31, %v689_v46  ;;  %v1867_v9 = vpack.c.bf16 %v1746_v49, %v1738_v19  ;;  %v1868_v54 = vpack.c.bf16 %v1747_v60, %v1739_v13  ;;  %v1869_v34 = vpack.c.bf16 %v1748_v51, %v1740_v14  ;;  %v5277_v19 = vld [vmem:[#allocation31_spill] sm:$0xff]  ;;  %v5287_v51 = vld [vmem:[#allocation52_spill] sm:$0xff] }
 0x19a   : > { %v1870_v40 = vpack.c.bf16 %v1749_v7, %v1741_v38  ;;  %v1921_v26 = vpack.c.bf16 %v1848_v20, %v1840_v0  ;;  %v1241_v42 = vmul.f32 %v4016_v6, %v5250_v35  ;;  %v1249_v17 = vmul.f32 %v4016_v6, %v5252_v39  ;;  %v5278_v14 = vld [vmem:[#allocation71_spill] sm:$0xff]  ;;  %v4257_v39 = vld [vmem:[%s4749_s3] sm:$0x1] }
 0x19b   : > { %v1585_v58 = vmul.f32 %v4078_v5, %v5254_v50  ;;  %1944 = vmatpush.bf16.msra.mxu0 %v1867_v9  ;;  %1957 = vmatpush.bf16.msra.mxu1 %v1868_v54  ;;  %v1593_v43 = vmul.f32 %v4078_v5, %v5256_v59  ;;  %v534_v13 = vmul.f32 %v5277_v19, %v5276_v21  ;;  %v5279_v50 = vld [vmem:[#allocation30_spill] sm:$0xff]  ;;  %v5281_v59 = vld [vmem:[#allocation117_spill] sm:$0xff] }
 0x19c   : > { %v542_v38 = vmul.f32 %v5277_v19, %v5278_v14  ;;  %1970 = vmatpush.bf16.msra.mxu2 %v1869_v34  ;;  %1983 = vmatpush.bf16.msra.mxu3 %v1870_v40  ;;  %v1369_v35 = vadd.f32 %v1241_v42, %v1025_v11  ;;  %v1377_v32 = vadd.f32 %v1249_v17, %v1033_v12 }
 0x19d   : > { %v878_v27 = vmul.f32 %v5248_v33, %v5279_v50  ;;  %v662_v10 = vadd.f32 %v534_v13, %v5282_v62  ;;  %v886_v46 = vmul.f32 %v5248_v33, %v5284_v25  ;;  %v1222_v29 = vmul.f32 %v5251_v53, %v5285_v36 }
 0x19e   : > { %v670_v28 = vadd.f32 %v542_v38, %v5283_v56  ;;  %v1713_v41 = vadd.f32 %v1585_v58, %v1369_v35  ;;  %v1721_v2 = vadd.f32 %v1593_v43, %v1377_v32  ;;  %v1230_v31 = vmul.f32 %v5251_v53, %v5286_v63  ;;  %1945 = vmatmul.bf16.vlgmr.msra.gmra.mxu0 %v4257_v39  ;;  %v5289_v32 = vld [vmem:[#allocation34_spill] sm:$0xff] }
 0x19f   : > { %1989 = vmatpush.bf16.msrb.mxu0 %v5280_v37  ;;  %2002 = vmatpush.bf16.msrb.mxu1 %v5281_v59  ;;  %v1006_v30 = vadd.f32 %v878_v27, %v662_v10  ;;  %v535_v11 = vmul.f32 %v5244_v44, %v5276_v21  ;;  %v543_v9 = vmul.f32 %v5244_v44, %v5278_v14 }
 0x1a0   : > { %2015 = vmatpush.bf16.msrb.mxu2 %v4041_v8  ;;  %2028 = vmatpush.bf16.msrb.mxu3 %v4157_v3  ;;  %v1014_v16 = vadd.f32 %v886_v46, %v670_v28  ;;  %v1841_v49 = vmax.f32 %v1713_v41, 0.0  ;;  %v1849_v60 = vmax.f32 %v1721_v2, 0.0  ;;  %v1566_v8 = vmul.f32 %v5255_v15, %v5287_v51  ;;  %v5288_v3 = vld [vmem:[#allocation79_spill] sm:$0xff] }
 0x1a1   : > { %1971 = vmatmul.bf16.vlgmr.msra.gmra.mxu2 %v4257_v39  ;;  %1984 = vmatmul.bf16.vlgmr.msra.gmra.mxu3 %v4257_v39  ;;  %v1574_v7 = vmul.f32 %v5255_v15, %v5288_v3  ;;  %v1350_v0 = vadd.f32 %v1222_v29, %v1006_v30  ;;  %v879_v54 = vmul.f32 %v5257_v4, %v5279_v50 }
 0x1a2   : > { %1958 = vmatmul.bf16.vlgmr.msra.gmra.mxu1 %v4257_v39  ;;  %v1358_v20 = vadd.f32 %v1230_v31, %v1014_v16  ;;  %v1922_v12 = vpack.c.bf16 %v1849_v60, %v1841_v49  ;;  %v887_v34 = vmul.f32 %v5257_v4, %v5284_v25  ;;  %v1223_v42 = vmul.f32 %v5262_v45, %v5285_v36 }
 0x1a3   : > { %1990 = vmatpush.bf16.msrb.mxu0 %v4192_v1  ;;  %2003 = vmatpush.bf16.msrb.mxu1 %v4208_v23  ;;  %v1694_v40 = vadd.f32 %v1566_v8, %v1350_v0  ;;  %v663_v23 = vadd.f32 %v535_v11, %v5282_v62  ;;  %v1231_v17 = vmul.f32 %v5262_v45, %v5286_v63 }
 0x1a4   : > { %2016 = vmatpush.bf16.msrb.mxu2 %v1921_v26  ;;  %v1702_v1 = vadd.f32 %v1574_v7, %v1358_v20  ;;  %2029 = vmatpush.bf16.msrb.mxu3 %v1922_v12  ;;  %v671_v26 = vadd.f32 %v543_v9, %v5283_v56  ;;  %v1567_v58 = vmul.f32 %v5263_v48, %v5287_v51 }
 0x1a5   : > { %v1575_v43 = vmul.f32 %v5263_v48, %v5288_v3  ;;  %v1822_v13 = vmax.f32 %v1694_v40, 0.0  ;;  %v1007_v35 = vadd.f32 %v879_v54, %v663_v23  ;;  %v536_v27 = vmul.f32 %v5289_v32, %v5276_v21 }
 0x1a6   : > { %v1830_v38 = vmax.f32 %v1702_v1, 0.0  ;;  %v1015_v37 = vadd.f32 %v887_v34, %v671_v26  ;;  %v544_v59 = vmul.f32 %v5289_v32, %v5278_v14  ;;  %v880_v10 = vmul.f32 %v5268_v47, %v5279_v50 }
 0x1a7   : > { %v888_v28 = vmul.f32 %v5268_v47, %v5284_v25  ;;  %v1351_v41 = vadd.f32 %v1223_v42, %v1007_v35  ;;  %v664_v2 = vadd.f32 %v536_v27, %v5282_v62  ;;  %v1224_v29 = vmul.f32 %v5273_v22, %v5285_v36 }
 0x1a8   : > { %v1911_v46 = vpack.c.bf16 %v1830_v38, %v1822_v13  ;;  %v1359_v30 = vadd.f32 %v1231_v17, %v1015_v37  ;;  %v672_v16 = vadd.f32 %v544_v59, %v5283_v56  ;;  %v1232_v31 = vmul.f32 %v5273_v22, %v5286_v63 }
 0x1a9   : > { %v1568_v49 = vmul.f32 %v5274_v24, %v5287_v51  ;;  %v1695_v60 = vadd.f32 %v1567_v58, %v1351_v41  ;;  %v1008_v8 = vadd.f32 %v880_v10, %v664_v2  ;;  %v1576_v7 = vmul.f32 %v5274_v24, %v5288_v3  ;;  %v5292_v10 = vld [vmem:[#allocation82_spill] sm:$0xff] }
 0x1aa   : > { %1991 = vmatpush.bf16.msrb.mxu0 %v1911_v46  ;;  %v537_v0 = vmul.f32 %v5275_v18, %v5276_v21  ;;  %v1703_v20 = vadd.f32 %v1575_v43, %v1359_v30  ;;  %v1016_v11 = vadd.f32 %v888_v28, %v672_v16  ;;  %v545_v12 = vmul.f32 %v5275_v18, %v5278_v14  ;;  %v5293_v28 = vld [vmem:[#allocation66_spill] sm:$0xff]  ;;  %v5296_v16 = vld [vmem:[#allocation120_spill] sm:$0xff] }
 0x1ab   : > { %v881_v9 = vmul.f32 %v3831_v57, %v5279_v50  ;;  %v1823_v54 = vmax.f32 %v1695_v60, 0.0  ;;  %v1352_v34 = vadd.f32 %v1224_v29, %v1008_v8  ;;  %v889_v1 = vmul.f32 %v3831_v57, %v5284_v25  ;;  %v5294_v2 = vld [vmem:[#allocation10_spill] sm:$0xff]  ;;  %v5297_v8 = vld [vmem:[#allocation81_spill] sm:$0xff] }
 0x1ac   : > { %v665_v40 = vadd.f32 %v537_v0, %v5282_v62  ;;  %v1831_v23 = vmax.f32 %v1703_v20, 0.0  ;;  %v1360_v42 = vadd.f32 %v1232_v31, %v1016_v11  ;;  %v673_v26 = vadd.f32 %v545_v12, %v5283_v56  ;;  %v5290_v56 = vld [vmem:[#allocation60_spill] sm:$0xff]  ;;  %v5295_v29 = vld [vmem:[#allocation22_spill] sm:$0xff] }
 0x1ad   : > { %v1225_v21 = vmul.f32 %v4016_v6, %v5285_v36  ;;  %v1696_v17 = vadd.f32 %v1568_v49, %v1352_v34  ;;  %v1233_v14 = vmul.f32 %v4016_v6, %v5286_v63  ;;  %v1569_v50 = vmul.f32 %v4078_v5, %v5287_v51  ;;  %v5291_v36 = vld [vmem:[#allocation61_spill] sm:$0xff]  ;;  %v5298_v0 = vld [vmem:[#allocation112_spill] sm:$0xff] }
 0x1ae   : > { %v1009_v58 = vadd.f32 %v881_v9, %v665_v40  ;;  %v1912_v43 = vpack.c.bf16 %v1831_v23, %v1823_v54  ;;  %v1704_v62 = vadd.f32 %v1576_v7, %v1360_v42  ;;  %v1017_v13 = vadd.f32 %v889_v1, %v673_v26  ;;  %v5299_v54 = vld [vmem:[#allocation99_spill] sm:$0xff] }
 0x1af   : > { %v1577_v25 = vmul.f32 %v4078_v5, %v5288_v3  ;;  %v1824_v38 = vmax.f32 %v1696_v17, 0.0  ;;  %v518_v27 = vmul.f32 %v5277_v19, %v5290_v56  ;;  %v526_v37 = vmul.f32 %v5277_v19, %v5291_v36 }
 0x1b0   : > { %v1353_v35 = vadd.f32 %v1225_v21, %v1009_v58  ;;  %2004 = vmatpush.bf16.msrb.mxu1 %v1912_v43  ;;  %v1832_v59 = vmax.f32 %v1704_v62, 0.0  ;;  %v1361_v63 = vadd.f32 %v1233_v14, %v1017_v13  ;;  %v862_v51 = vmul.f32 %v5248_v33, %v5292_v10 }
 0x1b1   : > { %v870_v46 = vmul.f32 %v5248_v33, %v5293_v28  ;;  %v646_v3 = vadd.f32 %v518_v27, %v5294_v2  ;;  %v654_v30 = vadd.f32 %v526_v37, %v5295_v29  ;;  %v1206_v31 = vmul.f32 %v5251_v53, %v5296_v16 }
 0x1b2   : > { %v1697_v41 = vadd.f32 %v1569_v50, %v1353_v35  ;;  %v1913_v49 = vpack.c.bf16 %v1832_v59, %v1824_v38  ;;  %v1705_v60 = vadd.f32 %v1577_v25, %v1361_v63  ;;  %v1214_v7 = vmul.f32 %v5251_v53, %v5297_v8 }
 0x1b3   : > { %v1550_v20 = vmul.f32 %v5255_v15, %v5298_v0  ;;  %v990_v12 = vadd.f32 %v862_v51, %v646_v3  ;;  %v998_v9 = vadd.f32 %v870_v46, %v654_v30  ;;  %v1558_v34 = vmul.f32 %v5255_v15, %v5299_v54 }
 0x1b4   : > { %v1825_v11 = vmax.f32 %v1697_v41, 0.0  ;;  %2017 = vmatpush.bf16.msrb.mxu2 %v1913_v49  ;;  %v1833_v40 = vmax.f32 %v1705_v60, 0.0  ;;  %v519_v1 = vmul.f32 %v5244_v44, %v5290_v56  ;;  %v527_v23 = vmul.f32 %v5244_v44, %v5291_v36 }
 0x1b5   : > { %v863_v42 = vmul.f32 %v5257_v4, %v5292_v10  ;;  %v1334_v26 = vadd.f32 %v1206_v31, %v990_v12  ;;  %v1342_v21 = vadd.f32 %v1214_v7, %v998_v9  ;;  %v871_v17 = vmul.f32 %v5257_v4, %v5293_v28 }
 0x1b6   : > { %v1207_v58 = vmul.f32 %v5262_v45, %v5296_v16  ;;  %v1914_v14 = vpack.c.bf16 %v1833_v40, %v1825_v11  ;;  %v647_v50 = vadd.f32 %v519_v1, %v5294_v2  ;;  %v655_v43 = vadd.f32 %v527_v23, %v5295_v29 }
 0x1b7   : > { %v1215_v62 = vmul.f32 %v5262_v45, %v5297_v8  ;;  %v1678_v13 = vadd.f32 %v1550_v20, %v1334_v26  ;;  %v1686_v25 = vadd.f32 %v1558_v34, %v1342_v21  ;;  %v1551_v38 = vmul.f32 %v5263_v48, %v5298_v0 }
 0x1b8   : > { %v1559_v35 = vmul.f32 %v5263_v48, %v5299_v54  ;;  %2030 = vmatpush.bf16.msrb.mxu3 %v1914_v14  ;;  %v991_v27 = vadd.f32 %v863_v42, %v647_v50  ;;  %v999_v37 = vadd.f32 %v871_v17, %v655_v43  ;;  %v520_v59 = vmul.f32 %v5289_v32, %v5290_v56 }
 0x1b9   : > { %v528_v63 = vmul.f32 %v5289_v32, %v5291_v36  ;;  %v1806_v51 = vmax.f32 %v1678_v13, 0.0  ;;  %v1814_v46 = vmax.f32 %v1686_v25, 0.0  ;;  %v864_v41 = vmul.f32 %v5268_v47, %v5292_v10 }
 0x1ba   : > { %v872_v3 = vmul.f32 %v5268_v47, %v5293_v28  ;;  %v1335_v30 = vadd.f32 %v1207_v58, %v991_v27  ;;  %v1343_v31 = vadd.f32 %v1215_v62, %v999_v37  ;;  %v648_v49 = vadd.f32 %v520_v59, %v5294_v2  ;;  %v5300_v59 = vld [vmem:[#allocation50_spill] sm:$0xff] }
 0x1bb   : > { %v656_v60 = vadd.f32 %v528_v63, %v5295_v29  ;;  %v1903_v7 = vpack.c.bf16 %v1814_v46, %v1806_v51  ;;  %v1208_v20 = vmul.f32 %v5273_v22, %v5296_v16  ;;  %v1216_v11 = vmul.f32 %v5273_v22, %v5297_v8  ;;  %v5301_v63 = vld [vmem:[#allocation23_spill] sm:$0xff] }
 0x1bc   : > { %v1552_v12 = vmul.f32 %v5274_v24, %v5298_v0  ;;  %v1679_v9 = vadd.f32 %v1551_v38, %v1335_v30  ;;  %v1687_v34 = vadd.f32 %v1559_v35, %v1343_v31  ;;  %v992_v40 = vadd.f32 %v864_v41, %v648_v49  ;;  %v5303_v30 = vld [vmem:[#allocation68_spill] sm:$0xff]  ;;  %v5304_v49 = vld [vmem:[#allocation19_spill] sm:$0xff] }
 0x1bd   : > { %v1000_v1 = vadd.f32 %v872_v3, %v656_v60  ;;  %1992 = vmatpush.bf16.msrb.mxu0 %v1903_v7  ;;  %v1560_v23 = vmul.f32 %v5274_v24, %v5299_v54  ;;  %v521_v42 = vmul.f32 %v5275_v18, %v5290_v56  ;;  %v529_v26 = vmul.f32 %v5275_v18, %v5291_v36  ;;  %v5305_v60 = vld [vmem:[#allocation18_spill] sm:$0xff] }
 0x1be   : > { %v865_v21 = vmul.f32 %v3831_v57, %v5292_v10  ;;  %v1807_v17 = vmax.f32 %v1679_v9, 0.0  ;;  %v1815_v58 = vmax.f32 %v1687_v34, 0.0  ;;  %v1336_v14 = vadd.f32 %v1208_v20, %v992_v40  ;;  %v5306_v20 = vld [vmem:[#allocation114_spill] sm:$0xff]  ;;  %v5307_v34 = vld [vmem:[#allocation88_spill] sm:$0xff] }
 0x1bf   : > { %v1344_v50 = vadd.f32 %v1216_v11, %v1000_v1  ;;  %v649_v43 = vadd.f32 %v521_v42, %v5294_v2  ;;  %v657_v62 = vadd.f32 %v529_v26, %v5295_v29  ;;  %v873_v13 = vmul.f32 %v3831_v57, %v5293_v28  ;;  %v5308_v1 = vld [vmem:[#allocation118_spill] sm:$0xff] }
 0x1c0   : > { %v1209_v56 = vmul.f32 %v4016_v6, %v5296_v16  ;;  %v1904_v25 = vpack.c.bf16 %v1815_v58, %v1807_v17  ;;  %v1680_v38 = vadd.f32 %v1552_v12, %v1336_v14  ;;  %v1217_v10 = vmul.f32 %v4016_v6, %v5297_v8  ;;  %v5302_v8 = vld [vmem:[#allocation102_spill] sm:$0xff] }
 0x1c1   : > { %v1688_v36 = vadd.f32 %v1560_v23, %v1344_v50  ;;  %v993_v35 = vadd.f32 %v865_v21, %v649_v43  ;;  %v1001_v27 = vadd.f32 %v873_v13, %v657_v62  ;;  %v1553_v37 = vmul.f32 %v4078_v5, %v5298_v0  ;;  %v5309_v21 = vld [vmem:[#allocation47_spill] sm:$0xff] }
 0x1c2   : > { %v1561_v2 = vmul.f32 %v4078_v5, %v5299_v54  ;;  %2005 = vmatpush.bf16.msrb.mxu1 %v1904_v25  ;;  %v1808_v29 = vmax.f32 %v1680_v38, 0.0  ;;  %v502_v16 = vmul.f32 %v5277_v19, %v5300_v59  ;;  %v510_v51 = vmul.f32 %v5277_v19, %v5301_v63 }
 0x1c3   : > { %v1816_v28 = vmax.f32 %v1688_v36, 0.0  ;;  %v1337_v46 = vadd.f32 %v1209_v56, %v993_v35  ;;  %v1345_v41 = vadd.f32 %v1217_v10, %v1001_v27  ;;  %v846_v3 = vmul.f32 %v5248_v33, %v5302_v8 }
 0x1c4   : > { %v854_v0 = vmul.f32 %v5248_v33, %v5303_v30  ;;  %v630_v54 = vadd.f32 %v502_v16, %v5304_v49  ;;  %v638_v7 = vadd.f32 %v510_v51, %v5305_v60  ;;  %v1190_v11 = vmul.f32 %v5251_v53, %v5306_v20 }
 0x1c5   : > { %v1905_v31 = vpack.c.bf16 %v1816_v28, %v1808_v29  ;;  %v1681_v12 = vadd.f32 %v1553_v37, %v1337_v46  ;;  %v1689_v9 = vadd.f32 %v1561_v2, %v1345_v41  ;;  %v1198_v40 = vmul.f32 %v5251_v53, %v5307_v34 }
 0x1c6   : > { %v1534_v23 = vmul.f32 %v5255_v15, %v5308_v1  ;;  %v974_v42 = vadd.f32 %v846_v3, %v630_v54  ;;  %v982_v26 = vadd.f32 %v854_v0, %v638_v7  ;;  %v1542_v17 = vmul.f32 %v5255_v15, %v5309_v21 }
 0x1c7   : > { %2018 = vmatpush.bf16.msrb.mxu2 %v1905_v31  ;;  %v503_v58 = vmul.f32 %v5244_v44, %v5300_v59  ;;  %v1809_v14 = vmax.f32 %v1681_v12, 0.0  ;;  %v1817_v50 = vmax.f32 %v1689_v9, 0.0  ;;  %v511_v43 = vmul.f32 %v5244_v44, %v5301_v63 }
 0x1c8   : > { %v847_v62 = vmul.f32 %v5257_v4, %v5302_v8  ;;  %v1318_v13 = vadd.f32 %v1190_v11, %v974_v42  ;;  %v1326_v56 = vadd.f32 %v1198_v40, %v982_v26  ;;  %v855_v38 = vmul.f32 %v5257_v4, %v5303_v30 }
 0x1c9   : > { %v631_v25 = vadd.f32 %v503_v58, %v5304_v49  ;;  %v1906_v36 = vpack.c.bf16 %v1817_v50, %v1809_v14  ;;  %v639_v10 = vadd.f32 %v511_v43, %v5305_v60  ;;  %v1191_v35 = vmul.f32 %v5262_v45, %v5306_v20 }
 0x1ca   : > { %v1199_v27 = vmul.f32 %v5262_v45, %v5307_v34  ;;  %v1662_v37 = vadd.f32 %v1534_v23, %v1318_v13  ;;  %v1670_v2 = vadd.f32 %v1542_v17, %v1326_v56  ;;  %v1535_v28 = vmul.f32 %v5263_v48, %v5308_v1 }
 0x1cb   : > { %v975_v29 = vadd.f32 %v847_v62, %v631_v25  ;;  %2031 = vmatpush.bf16.msrb.mxu3 %v1906_v36  ;;  %v983_v16 = vadd.f32 %v855_v38, %v639_v10  ;;  %v1543_v51 = vmul.f32 %v5263_v48, %v5309_v21  ;;  %v504_v46 = vmul.f32 %v5289_v32, %v5300_v59 }
 0x1cc   : > { %v512_v41 = vmul.f32 %v5289_v32, %v5301_v63  ;;  %v1790_v3 = vmax.f32 %v1662_v37, 0.0  ;;  %v1798_v0 = vmax.f32 %v1670_v2, 0.0  ;;  %v848_v54 = vmul.f32 %v5268_v47, %v5302_v8 }
 0x1cd   : > { %v1319_v31 = vadd.f32 %v1191_v35, %v975_v29  ;;  %v1327_v7 = vadd.f32 %v1199_v27, %v983_v16  ;;  %v632_v11 = vadd.f32 %v504_v46, %v5304_v49  ;;  %v856_v9 = vmul.f32 %v5268_v47, %v5303_v30  ;;  %v5310_v46 = vld [vmem:[#allocation20_spill] sm:$0xff] }
 0x1ce   : > { %v640_v12 = vadd.f32 %v512_v41, %v5305_v60  ;;  %v1895_v40 = vpack.c.bf16 %v1798_v0, %v1790_v3  ;;  %v1192_v42 = vmul.f32 %v5273_v22, %v5306_v20  ;;  %v1200_v26 = vmul.f32 %v5273_v22, %v5307_v34  ;;  %v5311_v41 = vld [vmem:[#allocation49_spill] sm:$0xff] }
 0x1cf   : > { %v1663_v23 = vadd.f32 %v1535_v28, %v1319_v31  ;;  %v1671_v17 = vadd.f32 %v1543_v51, %v1327_v7  ;;  %v976_v58 = vadd.f32 %v848_v54, %v632_v11  ;;  %v1536_v50 = vmul.f32 %v5274_v24, %v5308_v1  ;;  %v5313_v7 = vld [vmem:[#allocation75_spill] sm:$0xff] }
 0x1d0   : > { %v984_v14 = vadd.f32 %v856_v9, %v640_v12  ;;  %1993 = vmatpush.bf16.msrb.mxu0 %v1895_v40  ;;  %v1544_v62 = vmul.f32 %v5274_v24, %v5309_v21  ;;  %v505_v13 = vmul.f32 %v5275_v18, %v5300_v59  ;;  %v513_v56 = vmul.f32 %v5275_v18, %v5301_v63  ;;  %v5314_v12 = vld [vmem:[#allocation8_spill] sm:$0xff]  ;;  %v5315_v9 = vld [vmem:[#allocation9_spill] sm:$0xff] }
 0x1d1   : > { %v1791_v43 = vmax.f32 %v1663_v23, 0.0  ;;  %v1799_v25 = vmax.f32 %v1671_v17, 0.0  ;;  %v1320_v38 = vadd.f32 %v1192_v42, %v976_v58  ;;  %v849_v10 = vmul.f32 %v3831_v57, %v5302_v8  ;;  %v5316_v23 = vld [vmem:[#allocation90_spill] sm:$0xff]  ;;  %v5317_v58 = vld [vmem:[#allocation7_spill] sm:$0xff] }
 0x1d2   : > { %v1328_v36 = vadd.f32 %v1200_v26, %v984_v14  ;;  %v633_v35 = vadd.f32 %v505_v13, %v5304_v49  ;;  %v641_v27 = vadd.f32 %v513_v56, %v5305_v60  ;;  %v857_v37 = vmul.f32 %v3831_v57, %v5303_v30  ;;  %v5319_v56 = vld [vmem:[#allocation59_spill] sm:$0xff] }
 0x1d3   : > { %v1193_v2 = vmul.f32 %v4016_v6, %v5306_v20  ;;  %v1896_v59 = vpack.c.bf16 %v1799_v25, %v1791_v43  ;;  %v1664_v29 = vadd.f32 %v1536_v50, %v1320_v38  ;;  %v1201_v63 = vmul.f32 %v4016_v6, %v5307_v34  ;;  %v5312_v34 = vld [vmem:[#allocation107_spill] sm:$0xff] }
 0x1d4   : > { %v1672_v28 = vadd.f32 %v1544_v62, %v1328_v36  ;;  %v977_v16 = vadd.f32 %v849_v10, %v633_v35  ;;  %v985_v51 = vadd.f32 %v857_v37, %v641_v27  ;;  %v1537_v8 = vmul.f32 %v4078_v5, %v5308_v1  ;;  %v5318_v50 = vld [vmem:[#allocation119_spill] sm:$0xff] }
 0x1d5   : > { %v1545_v49 = vmul.f32 %v4078_v5, %v5309_v21  ;;  %2006 = vmatpush.bf16.msrb.mxu1 %v1896_v59  ;;  %v1792_v60 = vmax.f32 %v1664_v29, 0.0  ;;  %v486_v20 = vmul.f32 %v5277_v19, %v5310_v46  ;;  %v494_v3 = vmul.f32 %v5277_v19, %v5311_v41 }
 0x1d6   : > { %v1800_v30 = vmax.f32 %v1672_v28, 0.0  ;;  %v1321_v0 = vadd.f32 %v1193_v2, %v977_v16  ;;  %v1329_v31 = vadd.f32 %v1201_v63, %v985_v51  ;;  %v830_v54 = vmul.f32 %v5248_v33, %v5312_v34 }
 0x1d7   : > { %v838_v1 = vmul.f32 %v5248_v33, %v5313_v7  ;;  %v614_v21 = vadd.f32 %v486_v20, %v5314_v12  ;;  %v622_v40 = vadd.f32 %v494_v3, %v5315_v9  ;;  %v1174_v42 = vmul.f32 %v5251_v53, %v5316_v23 }
 0x1d8   : > { %v1897_v11 = vpack.c.bf16 %v1800_v30, %v1792_v60  ;;  %v1665_v26 = vadd.f32 %v1537_v8, %v1321_v0  ;;  %v1673_v17 = vadd.f32 %v1545_v49, %v1329_v31  ;;  %v1182_v14 = vmul.f32 %v5251_v53, %v5317_v58 }
 0x1d9   : > { %v1518_v43 = vmul.f32 %v5255_v15, %v5318_v50  ;;  %v958_v62 = vadd.f32 %v830_v54, %v614_v21  ;;  %v966_v13 = vadd.f32 %v838_v1, %v622_v40  ;;  %v1526_v25 = vmul.f32 %v5255_v15, %v5319_v56 }
 0x1da   : > { %2019 = vmatpush.bf16.msrb.mxu2 %v1897_v11  ;;  %v487_v38 = vmul.f32 %v5244_v44, %v5310_v46  ;;  %v1793_v36 = vmax.f32 %v1665_v26, 0.0  ;;  %v1801_v10 = vmax.f32 %v1673_v17, 0.0  ;;  %v495_v35 = vmul.f32 %v5244_v44, %v5311_v41 }
 0x1db   : > { %v831_v27 = vmul.f32 %v5257_v4, %v5312_v34  ;;  %v1302_v37 = vadd.f32 %v1174_v42, %v958_v62  ;;  %v1310_v2 = vadd.f32 %v1182_v14, %v966_v13  ;;  %v839_v29 = vmul.f32 %v5257_v4, %v5313_v7 }
 0x1dc   : > { %v615_v59 = vadd.f32 %v487_v38, %v5314_v12  ;;  %v1898_v28 = vpack.c.bf16 %v1801_v10, %v1793_v36  ;;  %v623_v63 = vadd.f32 %v495_v35, %v5315_v9  ;;  %v1175_v16 = vmul.f32 %v5262_v45, %v5316_v23 }
 0x1dd   : > { %v1183_v51 = vmul.f32 %v5262_v45, %v5317_v58  ;;  %v1646_v8 = vadd.f32 %v1518_v43, %v1302_v37  ;;  %v1654_v49 = vadd.f32 %v1526_v25, %v1310_v2  ;;  %v1519_v30 = vmul.f32 %v5263_v48, %v5318_v50 }
 0x1de   : > { %v959_v60 = vadd.f32 %v831_v27, %v615_v59  ;;  %2032 = vmatpush.bf16.msrb.mxu3 %v1898_v28  ;;  %v967_v20 = vadd.f32 %v839_v29, %v623_v63  ;;  %v1527_v3 = vmul.f32 %v5263_v48, %v5319_v56  ;;  %v488_v0 = vmul.f32 %v5289_v32, %v5310_v46 }
 0x1df   : > { %v496_v31 = vmul.f32 %v5289_v32, %v5311_v41  ;;  %v1774_v54 = vmax.f32 %v1646_v8, 0.0  ;;  %v1782_v1 = vmax.f32 %v1654_v49, 0.0  ;;  %v832_v21 = vmul.f32 %v5268_v47, %v5312_v34 }
 0x1e0   : > { %v1303_v11 = vadd.f32 %v1175_v16, %v959_v60  ;;  %v1311_v40 = vadd.f32 %v1183_v51, %v967_v20  ;;  %v616_v42 = vadd.f32 %v488_v0, %v5314_v12  ;;  %v840_v17 = vmul.f32 %v5268_v47, %v5313_v7  ;;  %v5320_v0 = vld [vmem:[#allocation35_spill] sm:$0xff] }
 0x1e1   : > { %v624_v26 = vadd.f32 %v496_v31, %v5315_v9  ;;  %v1887_v14 = vpack.c.bf16 %v1782_v1, %v1774_v54  ;;  %v1176_v62 = vmul.f32 %v5273_v22, %v5316_v23  ;;  %v1184_v13 = vmul.f32 %v5273_v22, %v5317_v58  ;;  %v5321_v31 = vld [vmem:[#allocation36_spill] sm:$0xff] }
 0x1e2   : > { %v1647_v43 = vadd.f32 %v1519_v30, %v1303_v11  ;;  %v1655_v25 = vadd.f32 %v1527_v3, %v1311_v40  ;;  %v960_v38 = vadd.f32 %v832_v21, %v616_v42  ;;  %v1520_v10 = vmul.f32 %v5274_v24, %v5318_v50  ;;  %v5323_v40 = vld [vmem:[#allocation62_spill] sm:$0xff] }
 0x1e3   : > { %v968_v36 = vadd.f32 %v840_v17, %v624_v26  ;;  %1994 = vmatpush.bf16.msrb.mxu0 %v1887_v14  ;;  %v1528_v27 = vmul.f32 %v5274_v24, %v5319_v56  ;;  %v489_v37 = vmul.f32 %v5275_v18, %v5310_v46  ;;  %v497_v2 = vmul.f32 %v5275_v18, %v5311_v41  ;;  %v5324_v26 = vld [vmem:[#allocation12_spill] sm:$0xff]  ;;  %v5325_v17 = vld [vmem:[#allocation15_spill] sm:$0xff] }
 0x1e4   : > { %v1775_v35 = vmax.f32 %v1647_v43, 0.0  ;;  %v1783_v59 = vmax.f32 %v1655_v25, 0.0  ;;  %v1304_v29 = vadd.f32 %v1176_v62, %v960_v38  ;;  %v833_v63 = vmul.f32 %v3831_v57, %v5312_v34  ;;  %v5326_v43 = vld [vmem:[#allocation100_spill] sm:$0xff]  ;;  %v5327_v38 = vld [vmem:[#allocation83_spill] sm:$0xff] }
 0x1e5   : > { %v1312_v28 = vadd.f32 %v1184_v13, %v968_v36  ;;  %v617_v16 = vadd.f32 %v489_v37, %v5314_v12  ;;  %v625_v51 = vadd.f32 %v497_v2, %v5315_v9  ;;  %v841_v8 = vmul.f32 %v3831_v57, %v5313_v7  ;;  %v5328_v37 = vld [vmem:[#allocation89_spill] sm:$0xff] }
 0x1e6   : > { %v1177_v49 = vmul.f32 %v4016_v6, %v5316_v23  ;;  %v1888_v46 = vpack.c.bf16 %v1783_v59, %v1775_v35  ;;  %v1648_v60 = vadd.f32 %v1520_v10, %v1304_v29  ;;  %v1185_v41 = vmul.f32 %v4016_v6, %v5317_v58  ;;  %v5322_v58 = vld [vmem:[#allocation95_spill] sm:$0xff] }
 0x1e7   : > { %v1656_v30 = vadd.f32 %v1528_v27, %v1312_v28  ;;  %v961_v20 = vadd.f32 %v833_v63, %v617_v16  ;;  %v969_v3 = vadd.f32 %v841_v8, %v625_v51  ;;  %v1521_v34 = vmul.f32 %v4078_v5, %v5318_v50 }
 0x1e8   : > { %v1529_v12 = vmul.f32 %v4078_v5, %v5319_v56  ;;  %2007 = vmatpush.bf16.msrb.mxu1 %v1888_v46  ;;  %v1776_v9 = vmax.f32 %v1648_v60, 0.0  ;;  %v470_v23 = vmul.f32 %v5277_v19, %v5320_v0  ;;  %v478_v54 = vmul.f32 %v5277_v19, %v5321_v31 }
 0x1e9   : > { %v1784_v7 = vmax.f32 %v1656_v30, 0.0  ;;  %v1305_v1 = vadd.f32 %v1177_v49, %v961_v20  ;;  %v1313_v11 = vadd.f32 %v1185_v41, %v969_v3  ;;  %v814_v21 = vmul.f32 %v5248_v33, %v5322_v58 }
 0x1ea   : > { %v822_v50 = vmul.f32 %v5248_v33, %v5323_v40  ;;  %v598_v56 = vadd.f32 %v470_v23, %v5324_v26  ;;  %v606_v14 = vadd.f32 %v478_v54, %v5325_v17  ;;  %v1158_v62 = vmul.f32 %v5251_v53, %v5326_v43 }
 0x1eb   : > { %v1889_v42 = vpack.c.bf16 %v1784_v7, %v1776_v9  ;;  %v1649_v13 = vadd.f32 %v1521_v34, %v1305_v1  ;;  %v1657_v25 = vadd.f32 %v1529_v12, %v1313_v11  ;;  %v1166_v36 = vmul.f32 %v5251_v53, %v5327_v38 }
 0x1ec   : > { %v1502_v10 = vmul.f32 %v5255_v15, %v4138_v61  ;;  %v942_v35 = vadd.f32 %v814_v21, %v598_v56  ;;  %v950_v27 = vadd.f32 %v822_v50, %v606_v14  ;;  %v1510_v2 = vmul.f32 %v5255_v15, %v5328_v37 }
 0x1ed   : > { %2020 = vmatpush.bf16.msrb.mxu2 %v1889_v42  ;;  %v471_v59 = vmul.f32 %v5244_v44, %v5320_v0  ;;  %v1777_v29 = vmax.f32 %v1649_v13, 0.0  ;;  %v1785_v28 = vmax.f32 %v1657_v25, 0.0  ;;  %v479_v63 = vmul.f32 %v5244_v44, %v5321_v31 }
 0x1ee   : > { %v815_v16 = vmul.f32 %v5257_v4, %v5322_v58  ;;  %v1286_v51 = vadd.f32 %v1158_v62, %v942_v35  ;;  %v1294_v8 = vadd.f32 %v1166_v36, %v950_v27  ;;  %v823_v46 = vmul.f32 %v5257_v4, %v5323_v40 }
 0x1ef   : > { %v599_v49 = vadd.f32 %v471_v59, %v5324_v26  ;;  %v1890_v60 = vpack.c.bf16 %v1785_v28, %v1777_v29  ;;  %v607_v30 = vadd.f32 %v479_v63, %v5325_v17  ;;  %v1159_v41 = vmul.f32 %v5262_v45, %v5326_v43 }
 0x1f0   : > { %v1167_v20 = vmul.f32 %v5262_v45, %v5327_v38  ;;  %v1630_v3 = vadd.f32 %v1502_v10, %v1286_v51  ;;  %v1638_v34 = vadd.f32 %v1510_v2, %v1294_v8  ;;  %v1503_v9 = vmul.f32 %v5263_v48, %v4138_v61 }
 0x1f1   : > { %v943_v12 = vadd.f32 %v815_v16, %v599_v49  ;;  %2033 = vmatpush.bf16.msrb.mxu3 %v1890_v60  ;;  %v951_v7 = vadd.f32 %v823_v46, %v607_v30  ;;  %v1511_v23 = vmul.f32 %v5263_v48, %v5328_v37  ;;  %v472_v54 = vmul.f32 %v5289_v32, %v5320_v0 }
 0x1f2   : > { %v480_v1 = vmul.f32 %v5289_v32, %v5321_v31  ;;  %v1758_v11 = vmax.f32 %v1630_v3, 0.0  ;;  %v1766_v21 = vmax.f32 %v1638_v34, 0.0  ;;  %v816_v42 = vmul.f32 %v5268_v47, %v5322_v58 }
 0x1f3   : > { %v1287_v50 = vadd.f32 %v1159_v41, %v943_v12  ;;  %v1295_v56 = vadd.f32 %v1167_v20, %v951_v7  ;;  %v600_v14 = vadd.f32 %v472_v54, %v5324_v26  ;;  %v824_v13 = vmul.f32 %v5268_v47, %v5323_v40 }
 0x1f4   : > { %v608_v62 = vadd.f32 %v480_v1, %v5325_v17  ;;  %v1879_v25 = vpack.c.bf16 %v1766_v21, %v1758_v11  ;;  %v1160_v10 = vmul.f32 %v5273_v22, %v5326_v43  ;;  %v1168_v35 = vmul.f32 %v5273_v22, %v5327_v38  ;;  %v5330_v1 = vld [vmem:[#allocation17_spill] sm:$0xff] }
 0x1f5   : > { %v1631_v36 = vadd.f32 %v1503_v9, %v1287_v50  ;;  %v1639_v27 = vadd.f32 %v1511_v23, %v1295_v56  ;;  %v944_v2 = vadd.f32 %v816_v42, %v600_v14  ;;  %v1504_v29 = vmul.f32 %v5274_v24, %v4138_v61  ;;  %v5329_v23 = vld [vmem:[#allocation29_spill] sm:$0xff] }
 0x1f6   : > { %v952_v59 = vadd.f32 %v824_v13, %v608_v62  ;;  %1995 = vmatpush.bf16.msrb.mxu0 %v1879_v25  ;;  %v1512_v63 = vmul.f32 %v5274_v24, %v5328_v37  ;;  %v473_v16 = vmul.f32 %v5275_v18, %v5320_v0  ;;  %v481_v51 = vmul.f32 %v5275_v18, %v5321_v31  ;;  %v5333_v14 = vld [vmem:[#allocation13_spill] sm:$0xff]  ;;  %v5334_v13 = vld [vmem:[#allocation16_spill] sm:$0xff] }
 0x1f7   : > { %v1759_v28 = vmax.f32 %v1631_v36, 0.0  ;;  %v1767_v8 = vmax.f32 %v1639_v27, 0.0  ;;  %v1288_v49 = vadd.f32 %v1160_v10, %v944_v2  ;;  %v817_v60 = vmul.f32 %v3831_v57, %v5322_v58  ;;  %v5336_v2 = vld [vmem:[#allocation64_spill] sm:$0xff] }
 0x1f8   : > { %v1296_v46 = vadd.f32 %v1168_v35, %v952_v59  ;;  %v601_v30 = vadd.f32 %v473_v16, %v5324_v26  ;;  %v609_v41 = vadd.f32 %v481_v51, %v5325_v17  ;;  %v825_v20 = vmul.f32 %v3831_v57, %v5323_v40  ;;  %v1931_v40 = vld [vmem:[%s4750_s4] sm:$0x3] }
 0x1f9   : > { %v1161_v3 = vmul.f32 %v4016_v6, %v5326_v43  ;;  %v1880_v0 = vpack.c.bf16 %v1767_v8, %v1759_v28  ;;  %v1632_v34 = vadd.f32 %v1504_v29, %v1288_v49  ;;  %v1169_v31 = vmul.f32 %v4016_v6, %v5327_v38  ;;  %1934 = vperm.xlu2 %2229, %v1931_v40  }
 0x1fa   : > { %v1640_v12 = vadd.f32 %v1512_v63, %v1296_v46  ;;  %v945_v9 = vadd.f32 %v817_v60, %v601_v30  ;;  %v953_v7 = vadd.f32 %v825_v20, %v609_v41  ;;  %v1505_v58 = vmul.f32 %v4078_v5, %v4138_v61  ;;  %v5331_v61 = vld [vmem:[#allocation53_spill] sm:$0xff] }
 0x1fb   : > { %v1513_v26 = vmul.f32 %v4078_v5, %v5328_v37  ;;  %2008 = vmatpush.bf16.msrb.mxu1 %v1880_v0  ;;  %v1760_v17 = vmax.f32 %v1632_v34, 0.0  ;;  %v454_v54 = vmul.f32 %v5277_v19, %v5329_v23  ;;  %v462_v38 = vmul.f32 %v5277_v19, %v5330_v1  ;;  %v5332_v37 = vld [vmem:[#allocation92_spill] sm:$0xff]  ;;  %v5335_v19 = vld [vmem:[#allocation115_spill] sm:$0xff] }
 0x1fc   : > { %v1768_v43 = vmax.f32 %v1640_v12, 0.0  ;;  %v1289_v11 = vadd.f32 %v1161_v3, %v945_v9  ;;  %v1297_v21 = vadd.f32 %v1169_v31, %v953_v7  ;;  %v798_v50 = vmul.f32 %v5248_v33, %v5331_v61 }
 0x1fd   : > { %v806_v42 = vmul.f32 %v5248_v33, %v5332_v37  ;;  %v582_v62 = vadd.f32 %v454_v54, %v5333_v14  ;;  %v590_v25 = vadd.f32 %v462_v38, %v5334_v13  ;;  %v1142_v36 = vmul.f32 %v5251_v53, %v4176_v55 }
 0x1fe   : > { %v1881_v56 = vpack.c.bf16 %v1768_v43, %v1760_v17  ;;  %v1633_v10 = vadd.f32 %v1505_v58, %v1289_v11  ;;  %v1641_v35 = vadd.f32 %v1513_v26, %v1297_v21  ;;  %v1150_v27 = vmul.f32 %v5251_v53, %v5335_v19 }
 0x1ff   : > { %v1486_v59 = vmul.f32 %v5255_v15, %v5336_v2  ;;  %v926_v29 = vadd.f32 %v798_v50, %v582_v62  ;;  %v934_v28 = vadd.f32 %v806_v42, %v590_v25  ;;  %v1494_v33 = vmul.f32 %v5255_v15, %v4214_v52 }
 0x200   : > { %2021 = vmatpush.bf16.msrb.mxu2 %v1881_v56  ;;  %v455_v63 = vmul.f32 %v5244_v44, %v5329_v23  ;;  %v1761_v16 = vmax.f32 %v1633_v10, 0.0  ;;  %v1769_v51 = vmax.f32 %v1641_v35, 0.0  ;;  %v463_v8 = vmul.f32 %v5244_v44, %v5330_v1 }
 0x201   : > { %v799_v53 = vmul.f32 %v5257_v4, %v5331_v61  ;;  %v1270_v49 = vadd.f32 %v1142_v36, %v926_v29  ;;  %v1278_v46 = vadd.f32 %v1150_v27, %v934_v28  ;;  %v807_v30 = vmul.f32 %v5257_v4, %v5332_v37 }
 0x202   : > { %v583_v60 = vadd.f32 %v455_v63, %v5333_v14  ;;  %v1882_v41 = vpack.c.bf16 %v1769_v51, %v1761_v16  ;;  %v591_v15 = vadd.f32 %v463_v8, %v5334_v13  ;;  %v1143_v20 = vmul.f32 %v5262_v45, %v4176_v55 }
 0x203   : > { %v1151_v3 = vmul.f32 %v5262_v45, %v5335_v19  ;;  %v1614_v44 = vadd.f32 %v1486_v59, %v1270_v49  ;;  %v1622_v0 = vadd.f32 %v1494_v33, %v1278_v46  ;;  %v1487_v12 = vmul.f32 %v5263_v48, %v5336_v2 }
 0x204   : > { %v927_v34 = vadd.f32 %v799_v53, %v583_v60  ;;  %2034 = vmatpush.bf16.msrb.mxu3 %v1882_v41  ;;  %v935_v31 = vadd.f32 %v807_v30, %v591_v15  ;;  %v1495_v4 = vmul.f32 %v5263_v48, %v4214_v52  ;;  %v456_v9 = vmul.f32 %v5289_v32, %v5329_v23 }
 0x205   : > { %v464_v7 = vmul.f32 %v5289_v32, %v5330_v1  ;;  %v1742_v58 = vmax.f32 %v1614_v44, 0.0  ;;  %v1750_v26 = vmax.f32 %v1622_v0, 0.0  ;;  %v800_v40 = vmul.f32 %v5268_v47, %v5331_v61 }
 0x206   : > { %v1271_v45 = vadd.f32 %v1143_v20, %v927_v34  ;;  %v1279_v17 = vadd.f32 %v1151_v3, %v935_v31  ;;  %v584_v43 = vadd.f32 %v456_v9, %v5333_v14  ;;  %v808_v48 = vmul.f32 %v5268_v47, %v5332_v37 }
 0x207   : > { %v592_v54 = vadd.f32 %v464_v7, %v5334_v13  ;;  %v1871_v38 = vpack.c.bf16 %v1750_v26, %v1742_v58  ;;  %v1144_v21 = vmul.f32 %v5273_v22, %v4176_v55  ;;  %v1152_v32 = vmul.f32 %v5273_v22, %v5335_v19 }
 0x208   : > { %v1615_v11 = vadd.f32 %v1487_v12, %v1271_v45  ;;  %v1623_v50 = vadd.f32 %v1495_v4, %v1279_v17  ;;  %v928_v42 = vadd.f32 %v800_v40, %v584_v43  ;;  %v1488_v62 = vmul.f32 %v5274_v24, %v5336_v2 }
 0x209   : > { %v936_v56 = vadd.f32 %v808_v48, %v592_v54  ;;  %1996 = vmatpush.bf16.msrb.mxu0 %v1871_v38  ;;  %v1496_v36 = vmul.f32 %v5274_v24, %v4214_v52  ;;  %v457_v47 = vmul.f32 %v5275_v18, %v5329_v23  ;;  %v465_v10 = vmul.f32 %v5275_v18, %v5330_v1 }
 0x20a   : > { %v1743_v25 = vmax.f32 %v1615_v11, 0.0  ;;  %v1751_v35 = vmax.f32 %v1623_v50, 0.0  ;;  %v1272_v27 = vadd.f32 %v1144_v21, %v928_v42  ;;  %v801_v59 = vmul.f32 %v3831_v57, %v5331_v61 }
 0x20b   : > { %v1280_v22 = vadd.f32 %v1152_v32, %v936_v56  ;;  %v585_v29 = vadd.f32 %v457_v47, %v5333_v14  ;;  %v593_v28 = vadd.f32 %v465_v10, %v5334_v13  ;;  %v809_v33 = vmul.f32 %v3831_v57, %v5332_v37 }
 0x20c   : > { %v1145_v24 = vmul.f32 %v4016_v6, %v4176_v55  ;;  %v1872_v23 = vpack.c.bf16 %v1751_v35, %v1743_v25  ;;  %v1616_v63 = vadd.f32 %v1488_v62, %v1272_v27  ;;  %v1153_v18 = vmul.f32 %v4016_v6, %v5335_v19  ;;  %1997 = vmatmul.bf16.vlgmr.msrb.gmra.mxu0 %v4257_v39 }
 0x20d   : > { %v1624_v16 = vadd.f32 %v1496_v36, %v1280_v22  ;;  %v929_v1 = vadd.f32 %v801_v59, %v585_v29  ;;  %v937_v61 = vadd.f32 %v809_v33, %v593_v28  ;;  %v1497_v14 = vmul.f32 %v4078_v5, %v4214_v52 }
 0x20e   : > { %2009 = vmatpush.bf16.msrb.mxu1 %v1872_v23  ;;  %v1744_v13 = vmax.f32 %v1616_v63, 0.0  ;;  %v1489_v55 = vmul.f32 %v4078_v5, %v5336_v2 }
 0x20f   : > { %v1752_v51 = vmax.f32 %v1624_v16, 0.0  ;;  %v1273_v57 = vadd.f32 %v1145_v24, %v929_v1  ;;  %v1281_v37 = vadd.f32 %v1153_v18, %v937_v61 }
 0x211   : > { %v1873_v8 = vpack.c.bf16 %v1752_v51, %v1744_v13  ;;  %v1617_v53 = vadd.f32 %v1489_v55, %v1273_v57  ;;  %v1625_v49 = vadd.f32 %v1497_v14, %v1281_v37  ;;  %2010 = vmatmul.bf16.vlgmr.msrb.gmra.mxu1 %v4257_v39 }
 0x213   : > { %2022 = vmatpush.bf16.msrb.mxu2 %v1873_v8  ;;  %v1745_v6 = vmax.f32 %v1617_v53, 0.0  ;;  %v1753_v19 = vmax.f32 %v1625_v49, 0.0 }
 0x215   : > { %v1874_v46 = vpack.c.bf16 %v1753_v19, %v1745_v6 }
 0x216   : > { %2023 = vmatmul.bf16.vlgmr.msrb.gmra.mxu2 %v4257_v39 }
 0x217   : > { %2035 = vmatpush.bf16.msrb.mxu3 %v1874_v46 }
 0x21a   : > { %2036 = vmatmul.bf16.vlgmr.msrb.gmra.mxu3 %v4257_v39 }
 0x21b   : > { %v1946_v52 = vpop.f32.mrf.mxu0 }
 0x21f   : > { %v1959_v60 = vpop.f32.mrf.mxu1 }
 0x223   : > { %v1948_v2 = vpop.f32.mrf.mxu0 }
 0x224   : > { %v1972_v30 = vpop.f32.mrf.mxu2  ;;  %v1985_v5 = vpop.f32.mrf.mxu3 }
 0x227   : > { %v1961_v41 = vpop.f32.mrf.mxu1 }
 0x22c   : > { %v1974_v15 = vpop.f32.mrf.mxu2  ;;  %v1987_v20 = vpop.f32.mrf.mxu3 }
 0x253   : > { %v1935_v3 = vpop.permute.xlu2 %1934 }
 0x254   : > { %v1947_v44 = vadd.f32 %v1946_v52, %v1935_v3  ;;  %v1960_v0 = vadd.f32 %v1959_v60, %v1935_v3  ;;  %v1973_v34 = vadd.f32 %v1972_v30, %v1935_v3  ;;  %v1986_v12 = vadd.f32 %v1985_v5, %v1935_v3 }
 0x256   : > { %v2049_v39 = vrot.slane %v1960_v0, 6  ;;  %v2050_v31 = vrot.slane %v1973_v34, 4  ;;  %v2051_v4 = vrot.slane %v1986_v12, 2 }
 0x258   : > { %v2056_v7 = vsel %vm2055_vm0, %v1947_v44, %v2049_v39  ;;  %v2058_v58 = vsel %vm2057_vm1, %v2050_v31, %v2051_v4 }
 0x259   : > { %v2060_v26 = vsel %vm2059_vm2, %v2056_v7, %v2058_v58 }
 0x25a   : > { %2066 = vst [vmem:[%s218_s16] sm:$0xff] %v2060_v26 }
 0x289   : > { %v1998_v9 = vpop.f32.mrf.mxu0 }
 0x28a   : > { %v1999_v11 = vadd.f32 %v1998_v9, %v1935_v3 }
 0x28e   : > { %v2011_v45 = vpop.f32.mrf.mxu1 }
 0x28f   : > { %v2012_v54 = vadd.f32 %v2011_v45, %v1935_v3 }
 0x291   : > { %v2000_v40 = vpop.f32.mrf.mxu0  ;;  %v2052_v21 = vrot.slane %v2012_v54, 6 }
 0x293   : > { %v2061_v62 = vsel %vm2055_vm0, %v1999_v11, %v2052_v21 }
 0x296   : > { %v2013_v17 = vpop.f32.mrf.mxu1 }
 0x299   : > { %v2024_v43 = vpop.f32.mrf.mxu2 }
 0x29a   : > { %v2025_v48 = vadd.f32 %v2024_v43, %v1935_v3 }
 0x29c   : > { %v2053_v32 = vrot.slane %v2025_v48, 4 }
 0x29d   : > { %v2037_v38 = vpop.f32.mrf.mxu3 }
 0x29e   : > { %v2038_v50 = vadd.f32 %v2037_v38, %v1935_v3 }
 0x2a0   : > { %v2054_v42 = vrot.slane %v2038_v50, 2 }
 0x2a1   : > { %v2026_v56 = vpop.f32.mrf.mxu2 }
 0x2a2   : > { %v2062_v25 = vsel %vm2057_vm1, %v2053_v32, %v2054_v42 }
 0x2a3   : > { %v2063_v36 = vsel %vm2059_vm2, %v2061_v62, %v2062_v25 }
 0x2a4   : > { %2067 = vst [vmem:[%s218_s16 + $0x8] sm:$0xff] %v2063_v36 }
 0x2a5   : > { %v2039_v47 = vpop.f32.mrf.mxu3 }
 0x2a6   : > { %2259 = shalt.err (!%p2256_p3)
}
 0x2a7   : > { %2157 = dma.vmem_to_hbm [thread:$0]  (%p2368_p5), %s2083_s30, 256, %s2085_s6, %s2069_s22  }
 0x2a8 PF: > { %p2163_p4 = scmp.ge.s32.totalorder %s2294_s21, 2  ;;  %s2096_s14 = sand.u32 1, %s2282_s18  }
 0x2a9   : > { %s2097_s15 = scalar_lea.sflag [#allocation3], %s2096_s14 }
 0x2aa   : > { %p2160_p7 = pnand %p2163_p4, %p2372_p6 }
 0x2ac   : > { %p2161_p8 = pneg %p2160_p7 }
 0x2ae   : > { %2277 = dma.done.wait (%p2161_p8), %s2097_s15, 256  }
 0x2af   : > { %2279 = vsyncadd (%p2161_p8), %s2097_s15, 4294967040  ;;  %p15_p9 = scmp.ge.s32.totalorder %s2355_s24, 4   ;;  %s5337_s18 = smov %s2286_s19 }
 0x2b0   : > { %s5338_s19 = smov %s2290_s20  ;;  %s5339_s20 = smov %s2366_s27 }
 0x2b1   : > { %s5340_s21 = smov %s2355_s24  ;;  %17 = sbr.rel (!%p15_p9) target bundleno = 3 (0x3), region = 75 }
 0x2b6   :  { %2103 = vsyncpa [#allocation3], 1 }
 0x2b7   :  { %2105 = vsyncpa [#allocation3 + $0x1], 1 }

</bundles_post_ra>
